<compile_context>
chip_gen: v6e
topology: v6e:2x2x1
jax: 0.10.0
libtpu: 0.0.40
codegen_flags: <defaults>
</compile_context>

<pallas_src>
import functools
import math

import jax
import jax.numpy as jnp
from jax.experimental import pallas as pl
from jax.experimental.pallas import tpu as pltpu


# ----------------------------------------------------------------------------
# Kernel
# ----------------------------------------------------------------------------
def _layer_norm(y, gamma, beta, eps=1e-5):
    """Row LayerNorm in f32 (eps matches PyTorch nn.LayerNorm default)."""
    mu = jnp.mean(y, axis=-1, keepdims=True)
    var = jnp.mean((y - mu) * (y - mu), axis=-1, keepdims=True)
    return (y - mu) * jax.lax.rsqrt(var + eps) * gamma + beta


def _encoder_kernel(x_ref, wqkv_ref, bqkv_ref, wo_ref, bo_ref,
                    w1_ref, b1_ref, w2_ref, b2_ref,
                    g_ref, be_ref, o_ref, *, n_heads):
    """Fused: MHA + residual/LN + FFN(ReLU) + residual/LN for one batch row."""
    x32 = x_ref[0]                                   # (S, D) f32 (residual #1)
    S, D = x32.shape
    dh = D // n_heads
    scale = 1.0 / math.sqrt(dh)

    # ---- Stage 1: multi-head self-attention --------------------------------
    x_bf = x32.astype(jnp.bfloat16)
    # Fused QKV projection: one wide MXU matmul, f32 accumulation.
    qkv = (jnp.dot(x_bf, wqkv_ref[...], preferred_element_type=jnp.float32)
           + bqkv_ref[...])                          # (S, 3D) f32

    # Per-head attention; output projection accumulated head-by-head with
    # per-head Wo blocks (no lane-narrow concatenate of head slabs).
    attn = jnp.zeros((S, D), jnp.float32)
    for h in range(n_heads):                         # static unroll (8 heads)
        q = qkv[:, h * dh:(h + 1) * dh].astype(jnp.bfloat16)
        k = qkv[:, D + h * dh:D + (h + 1) * dh].astype(jnp.bfloat16)
        v = qkv[:, 2 * D + h * dh:2 * D + (h + 1) * dh].astype(jnp.bfloat16)

        s = jnp.dot(q, k.T, preferred_element_type=jnp.float32) * scale  # (S, S)
        m = jnp.max(s, axis=-1, keepdims=True)
        e = jnp.exp(s - m)
        p = e * pl.reciprocal(jnp.sum(e, axis=-1, keepdims=True), approx=True)

        oh = jnp.dot(p.astype(jnp.bfloat16), v,
                     preferred_element_type=jnp.float32)                 # (S, dh)
        attn = attn + jnp.dot(oh.astype(jnp.bfloat16), wo_ref[h],
                              preferred_element_type=jnp.float32)        # (S, D)
    attn = attn + bo_ref[...]

    # Residual add + LayerNorm #1 (f32).
    y1 = _layer_norm(x32 + attn, g_ref[...], be_ref[...])   # (S, D) residual #2

    # ---- Stage 2: position-wise FFN -----------------------------------------
    h1 = (jnp.dot(y1.astype(jnp.bfloat16), w1_ref[...],
                  preferred_element_type=jnp.float32) + b1_ref[...])     # (S, Dff)
    h1 = jnp.maximum(h1, 0.0)                                            # ReLU
    ff = (jnp.dot(h1.astype(jnp.bfloat16), w2_ref[...],
                  preferred_element_type=jnp.float32) + b2_ref[...])     # (S, D)

    # Residual add + LayerNorm #2 (same gamma/beta, as in the module).
    o_ref[0] = _layer_norm(y1 + ff, g_ref[...], be_ref[...])


# ----------------------------------------------------------------------------
# Wrapper
# ----------------------------------------------------------------------------
_VMEM_LIMIT = 32 * 1024 * 1024   # explicit; safe on v5e/v6e/v7x, ample here


def encoder_forward(x, p, *, n_heads=8):
    """Encoder.forward as a single fused Pallas kernel, gridded over batch."""
    B, S, D = x.shape
    H, dh, _ = p["wo_h"].shape
    Dff = p["w1"].shape[1]
    return pl.pallas_call(
        functools.partial(_encoder_kernel, n_heads=n_heads),
        out_shape=jax.ShapeDtypeStruct((B, S, D), jnp.float32),
        grid=(B,),
        in_specs=[
            pl.BlockSpec((1, S, D), lambda b: (b, 0, 0)),      # x (and residual)
            pl.BlockSpec((D, 3 * D), lambda b: (0, 0)),        # fused Wqkv (bf16)
            pl.BlockSpec((1, 3 * D), lambda b: (0, 0)),        # fused bqkv
            pl.BlockSpec((H, dh, D), lambda b: (0, 0, 0)),     # Wo, head-blocked (bf16)
            pl.BlockSpec((1, D), lambda b: (0, 0)),            # bo
            pl.BlockSpec((D, Dff), lambda b: (0, 0)),          # W1 (bf16)
            pl.BlockSpec((1, Dff), lambda b: (0, 0)),          # b1
            pl.BlockSpec((Dff, D), lambda b: (0, 0)),          # W2 (bf16)
            pl.BlockSpec((1, D), lambda b: (0, 0)),            # b2
            pl.BlockSpec((1, D), lambda b: (0, 0)),            # ln gamma (shared)
            pl.BlockSpec((1, D), lambda b: (0, 0)),            # ln beta  (shared)
        ],
        out_specs=pl.BlockSpec((1, S, D), lambda b: (b, 0, 0)),
        compiler_params=pltpu.CompilerParams(
            dimension_semantics=("parallel",),
            vmem_limit_bytes=_VMEM_LIMIT),
    )(x, p["wqkv"], p["bqkv"], p["wo_h"], p["bo"],
      p["w1"], p["b1"], p["w2"], p["b2"], p["ln_gamma"], p["ln_beta"])


# ----------------------------------------------------------------------------
# Pure-JAX reference (same synthetic params / same math in f32)
# ----------------------------------------------------------------------------
def encoder_reference(x, p, *, n_heads=8):
    B, S, D = x.shape
    dh = D // n_heads
    wqkv = p["wqkv"].astype(jnp.float32)
    wo = p["wo_h"].astype(jnp.float32).reshape(D, D)
    qkv = x @ wqkv + p["bqkv"]
    q, k, v = qkv[..., :D], qkv[..., D:2 * D], qkv[..., 2 * D:]

    def split(t):   # (B,S,D) -> (B,H,S,dh)
        return t.reshape(B, S, n_heads, dh).transpose(0, 2, 1, 3)

    q, k, v = split(q), split(k), split(v)
    s = jnp.einsum("bhqd,bhkd->bhqk", q, k) / math.sqrt(dh)
    pattn = jax.nn.softmax(s, axis=-1)
    ctx = jnp.einsum("bhqk,bhkd->bhqd", pattn, v)
    ctx = ctx.transpose(0, 2, 1, 3).reshape(B, S, D)
    attn = ctx @ wo + p["bo"]

    def ln(y):
        mu = jnp.mean(y, axis=-1, keepdims=True)
        var = jnp.mean((y - mu) ** 2, axis=-1, keepdims=True)
        return (y - mu) * jax.lax.rsqrt(var + 1e-5) * p["ln_gamma"] + p["ln_beta"]

    y1 = ln(x + attn)
    h = jnp.maximum(y1 @ p["w1"].astype(jnp.float32) + p["b1"], 0.0)
    ff = h @ p["w2"].astype(jnp.float32) + p["b2"]
    return ln(y1 + ff)


# ----------------------------------------------------------------------------
# Deterministic parameter init + demo
# ----------------------------------------------------------------------------
def init_params(key, d_model, d_ff, n_heads):
    keys = jax.random.split(key, 6)
    s = 0.02
    dh = d_model // n_heads
    wq = s * jax.random.normal(keys[0], (d_model, d_model), jnp.float32)
    wk = s * jax.random.normal(keys[1], (d_model, d_model), jnp.float32)
    wv = s * jax.random.normal(keys[2], (d_model, d_model), jnp.float32)
    wo = s * jax.random.normal(keys[3], (d_model, d_model), jnp.float32)
    return {
        # matmul weights stored in bf16 (f32 accumulation inside the kernel)
        "wqkv": jnp.concatenate([wq, wk, wv], axis=1).astype(jnp.bfloat16),
        "bqkv": jnp.zeros((1, 3 * d_model), jnp.float32),
        "wo_h": wo.reshape(n_heads, dh, d_model).astype(jnp.bfloat16),
        "bo": jnp.zeros((1, d_model), jnp.float32),
        # single LayerNorm, reused for both Add&Norm stages (as in the module)
        "ln_gamma": jnp.ones((1, d_model), jnp.float32),
        "ln_beta": jnp.zeros((1, d_model), jnp.float32),
        "w1": (s * jax.random.normal(keys[4], (d_model, d_ff), jnp.float32)
               ).astype(jnp.bfloat16),
        "b1": jnp.zeros((1, d_ff), jnp.float32),
        "w2": (s * jax.random.normal(keys[5], (d_ff, d_model), jnp.float32)
               ).astype(jnp.bfloat16),
        "b2": jnp.zeros((1, d_model), jnp.float32),
    }


if __name__ == "__main__":
    # Small demo shapes; d_model chosen as a multiple of 128 (lane-dense),
    # seq a multiple of 8; d_ff = 2048 is fixed by the module.
    B, S, d_model, d_ff, n_heads = 2, 16, 128, 2048, 8
    key = jax.random.PRNGKey(0)
    kx, kp = jax.random.split(key)
    x = jax.random.normal(kx, (B, S, d_model), jnp.float32)
    params = init_params(kp, d_model, d_ff, n_heads)

    out = jax.jit(functools.partial(encoder_forward, n_heads=n_heads))(x, params)
    jax.block_until_ready(out)

    assert out.shape == (B, S, d_model) and out.dtype == jnp.float32
    assert bool(jnp.all(jnp.isfinite(out)))

    # Loose check vs f32 reference (kernel uses bf16 matmul inputs + approx recip).
    ref = encoder_reference(x, params, n_heads=n_heads)
    max_err = float(jnp.max(jnp.abs(out - ref)))
    assert max_err < 1e-1, f"max abs error too large: {max_err}"

    print("KERNEL_OK")
</pallas_src>

<mosaic_0001>
module attributes {stable_mosaic.version = 11 : i64} {
  func.func @_encoder_kernel(%arg0: i32, %arg1: memref<1x16x128xf32, #tpu.memory_space<vmem>>, %arg2: memref<128x384xbf16, #tpu.memory_space<vmem>>, %arg3: memref<1x384xf32, #tpu.memory_space<vmem>>, %arg4: memref<8x16x128xbf16, #tpu.memory_space<vmem>>, %arg5: memref<1x128xf32, #tpu.memory_space<vmem>>, %arg6: memref<128x2048xbf16, #tpu.memory_space<vmem>>, %arg7: memref<1x2048xf32, #tpu.memory_space<vmem>>, %arg8: memref<2048x128xbf16, #tpu.memory_space<vmem>>, %arg9: memref<1x128xf32, #tpu.memory_space<vmem>>, %arg10: memref<1x128xf32, #tpu.memory_space<vmem>>, %arg11: memref<1x128xf32, #tpu.memory_space<vmem>>, %arg12: memref<1x16x128xf32, #tpu.memory_space<vmem>>) attributes {dimension_semantics = [#tpu.dimension_semantics<parallel>], iteration_bounds = array<i64: 2>, scalar_prefetch = 0 : i64, scratch_operands = 0 : i64, tpu.core_type = #tpu.core_type<tc>, window_params = [{transform_indices = @transform_0, window_bounds = array<i64: 1, 16, 128>}, {pipeline_mode = #tpu.pipeline_mode<synchronous>, transform_indices = @transform_1, window_bounds = array<i64: 128, 384>}, {pipeline_mode = #tpu.pipeline_mode<synchronous>, transform_indices = @transform_2, window_bounds = array<i64: 1, 384>}, {pipeline_mode = #tpu.pipeline_mode<synchronous>, transform_indices = @transform_3, window_bounds = array<i64: 8, 16, 128>}, {pipeline_mode = #tpu.pipeline_mode<synchronous>, transform_indices = @transform_4, window_bounds = array<i64: 1, 128>}, {pipeline_mode = #tpu.pipeline_mode<synchronous>, transform_indices = @transform_5, window_bounds = array<i64: 128, 2048>}, {pipeline_mode = #tpu.pipeline_mode<synchronous>, transform_indices = @transform_6, window_bounds = array<i64: 1, 2048>}, {pipeline_mode = #tpu.pipeline_mode<synchronous>, transform_indices = @transform_7, window_bounds = array<i64: 2048, 128>}, {pipeline_mode = #tpu.pipeline_mode<synchronous>, transform_indices = @transform_8, window_bounds = array<i64: 1, 128>}, {pipeline_mode = #tpu.pipeline_mode<synchronous>, transform_indices = @transform_9, window_bounds = array<i64: 1, 128>}, {pipeline_mode = #tpu.pipeline_mode<synchronous>, transform_indices = @transform_10, window_bounds = array<i64: 1, 128>}, {transform_indices = @transform_11, window_bounds = array<i64: 1, 16, 128>}]} {
    %c0 = arith.constant 0 : index
    %c0_0 = arith.constant 0 : index
    %c0_1 = arith.constant 0 : index
    %0 = vector.load %arg1[%c0, %c0_0, %c0_1] : memref<1x16x128xf32, #tpu.memory_space<vmem>>, vector<1x16x128xf32>
    %1 = vector.shape_cast %0 : vector<1x16x128xf32> to vector<16x128xf32>
    %2 = arith.truncf %1 : vector<16x128xf32> to vector<16x128xbf16>
    %c0_2 = arith.constant 0 : index
    %c0_3 = arith.constant 0 : index
    %3 = vector.load %arg2[%c0_2, %c0_3] : memref<128x384xbf16, #tpu.memory_space<vmem>>, vector<128x384xbf16>
    %cst = arith.constant dense<0.000000e+00> : vector<16x384xf32>
    %4 = tpu.matmul %2, %3, %cst {dimension_numbers = #tpu.dot_dimension_numbers<[1], [0], [0], [1], [0, 0, 1, 1], [], []>} : vector<16x128xbf16>, vector<128x384xbf16>, vector<16x384xf32> -> vector<16x384xf32>
    %c0_4 = arith.constant 0 : index
    %c0_5 = arith.constant 0 : index
    %5 = vector.load %arg3[%c0_4, %c0_5] : memref<1x384xf32, #tpu.memory_space<vmem>>, vector<1x384xf32>
    %6 = vector.broadcast %5 : vector<1x384xf32> to vector<16x384xf32>
    %7 = arith.addf %4, %6 : vector<16x384xf32>
    %cst_6 = arith.constant 0.000000e+00 : f32
    %8 = vector.broadcast %cst_6 : f32 to vector<16x128xf32>
    %9 = vector.extract_strided_slice %7 {offsets = [0, 0], sizes = [16, 16], strides = [1, 1]} : vector<16x384xf32> to vector<16x16xf32>
    %10 = arith.truncf %9 : vector<16x16xf32> to vector<16x16xbf16>
    %11 = vector.extract_strided_slice %7 {offsets = [0, 128], sizes = [16, 16], strides = [1, 1]} : vector<16x384xf32> to vector<16x16xf32>
    %12 = arith.truncf %11 : vector<16x16xf32> to vector<16x16xbf16>
    %13 = vector.extract_strided_slice %7 {offsets = [0, 256], sizes = [16, 16], strides = [1, 1]} : vector<16x384xf32> to vector<16x16xf32>
    %14 = arith.truncf %13 : vector<16x16xf32> to vector<16x16xbf16>
    %15 = tpu.transpose %12, [1, 0] : vector<16x16xbf16> -> vector<16x16xbf16>
    %cst_7 = arith.constant dense<0.000000e+00> : vector<16x16xf32>
    %16 = tpu.matmul %10, %15, %cst_7 {dimension_numbers = #tpu.dot_dimension_numbers<[1], [0], [0], [1], [0, 0, 1, 1], [], []>} : vector<16x16xbf16>, vector<16x16xbf16>, vector<16x16xf32> -> vector<16x16xf32>
    %cst_8 = arith.constant 2.500000e-01 : f32
    %17 = vector.broadcast %cst_8 : f32 to vector<16x16xf32>
    %18 = arith.mulf %16, %17 : vector<16x16xf32>
    %cst_9 = arith.constant dense<0xFF800000> : vector<16xf32>
    %19 = vector.multi_reduction <maximumf>, %18, %cst_9 [1] : vector<16x16xf32> to vector<16xf32>
    %20 = vector.shape_cast %19 : vector<16xf32> to vector<16x1xf32>
    %21 = vector.broadcast %20 : vector<16x1xf32> to vector<16x16xf32>
    %22 = arith.subf %18, %21 : vector<16x16xf32>
    %23 = math.exp %22 : vector<16x16xf32>
    %cst_10 = arith.constant dense<0.000000e+00> : vector<16xf32>
    %24 = vector.multi_reduction <add>, %23, %cst_10 [1] : vector<16x16xf32> to vector<16xf32>
    %25 = vector.shape_cast %24 : vector<16xf32> to vector<16x1xf32>
    %26 = tpu.reciprocal %25 {approx = true} : vector<16x1xf32> -> vector<16x1xf32>
    %27 = vector.broadcast %26 : vector<16x1xf32> to vector<16x16xf32>
    %28 = arith.mulf %23, %27 : vector<16x16xf32>
    %29 = arith.truncf %28 : vector<16x16xf32> to vector<16x16xbf16>
    %cst_11 = arith.constant dense<0.000000e+00> : vector<16x16xf32>
    %30 = tpu.matmul %29, %14, %cst_11 {dimension_numbers = #tpu.dot_dimension_numbers<[1], [0], [0], [1], [0, 0, 1, 1], [], []>} : vector<16x16xbf16>, vector<16x16xbf16>, vector<16x16xf32> -> vector<16x16xf32>
    %31 = arith.truncf %30 : vector<16x16xf32> to vector<16x16xbf16>
    %c0_12 = arith.constant 0 : index
    %c0_13 = arith.constant 0 : index
    %c0_14 = arith.constant 0 : index
    %32 = vector.load %arg4[%c0_12, %c0_13, %c0_14] : memref<8x16x128xbf16, #tpu.memory_space<vmem>>, vector<1x16x128xbf16>
    %33 = vector.shape_cast %32 : vector<1x16x128xbf16> to vector<16x128xbf16>
    %cst_15 = arith.constant dense<0.000000e+00> : vector<16x128xf32>
    %34 = tpu.matmul %31, %33, %cst_15 {dimension_numbers = #tpu.dot_dimension_numbers<[1], [0], [0], [1], [0, 0, 1, 1], [], []>} : vector<16x16xbf16>, vector<16x128xbf16>, vector<16x128xf32> -> vector<16x128xf32>
    %35 = arith.addf %8, %34 : vector<16x128xf32>
    %36 = vector.extract_strided_slice %7 {offsets = [0, 16], sizes = [16, 16], strides = [1, 1]} : vector<16x384xf32> to vector<16x16xf32>
    %37 = arith.truncf %36 : vector<16x16xf32> to vector<16x16xbf16>
    %38 = vector.extract_strided_slice %7 {offsets = [0, 144], sizes = [16, 16], strides = [1, 1]} : vector<16x384xf32> to vector<16x16xf32>
    %39 = arith.truncf %38 : vector<16x16xf32> to vector<16x16xbf16>
    %40 = vector.extract_strided_slice %7 {offsets = [0, 272], sizes = [16, 16], strides = [1, 1]} : vector<16x384xf32> to vector<16x16xf32>
    %41 = arith.truncf %40 : vector<16x16xf32> to vector<16x16xbf16>
    %42 = tpu.transpose %39, [1, 0] : vector<16x16xbf16> -> vector<16x16xbf16>
    %cst_16 = arith.constant dense<0.000000e+00> : vector<16x16xf32>
    %43 = tpu.matmul %37, %42, %cst_16 {dimension_numbers = #tpu.dot_dimension_numbers<[1], [0], [0], [1], [0, 0, 1, 1], [], []>} : vector<16x16xbf16>, vector<16x16xbf16>, vector<16x16xf32> -> vector<16x16xf32>
    %cst_17 = arith.constant 2.500000e-01 : f32
    %44 = vector.broadcast %cst_17 : f32 to vector<16x16xf32>
    %45 = arith.mulf %43, %44 : vector<16x16xf32>
    %cst_18 = arith.constant dense<0xFF800000> : vector<16xf32>
    %46 = vector.multi_reduction <maximumf>, %45, %cst_18 [1] : vector<16x16xf32> to vector<16xf32>
    %47 = vector.shape_cast %46 : vector<16xf32> to vector<16x1xf32>
    %48 = vector.broadcast %47 : vector<16x1xf32> to vector<16x16xf32>
    %49 = arith.subf %45, %48 : vector<16x16xf32>
    %50 = math.exp %49 : vector<16x16xf32>
    %cst_19 = arith.constant dense<0.000000e+00> : vector<16xf32>
    %51 = vector.multi_reduction <add>, %50, %cst_19 [1] : vector<16x16xf32> to vector<16xf32>
    %52 = vector.shape_cast %51 : vector<16xf32> to vector<16x1xf32>
    %53 = tpu.reciprocal %52 {approx = true} : vector<16x1xf32> -> vector<16x1xf32>
    %54 = vector.broadcast %53 : vector<16x1xf32> to vector<16x16xf32>
    %55 = arith.mulf %50, %54 : vector<16x16xf32>
    %56 = arith.truncf %55 : vector<16x16xf32> to vector<16x16xbf16>
    %cst_20 = arith.constant dense<0.000000e+00> : vector<16x16xf32>
    %57 = tpu.matmul %56, %41, %cst_20 {dimension_numbers = #tpu.dot_dimension_numbers<[1], [0], [0], [1], [0, 0, 1, 1], [], []>} : vector<16x16xbf16>, vector<16x16xbf16>, vector<16x16xf32> -> vector<16x16xf32>
    %58 = arith.truncf %57 : vector<16x16xf32> to vector<16x16xbf16>
    %c1 = arith.constant 1 : index
    %c0_21 = arith.constant 0 : index
    %c0_22 = arith.constant 0 : index
    %59 = vector.load %arg4[%c1, %c0_21, %c0_22] : memref<8x16x128xbf16, #tpu.memory_space<vmem>>, vector<1x16x128xbf16>
    %60 = vector.shape_cast %59 : vector<1x16x128xbf16> to vector<16x128xbf16>
    %cst_23 = arith.constant dense<0.000000e+00> : vector<16x128xf32>
    %61 = tpu.matmul %58, %60, %cst_23 {dimension_numbers = #tpu.dot_dimension_numbers<[1], [0], [0], [1], [0, 0, 1, 1], [], []>} : vector<16x16xbf16>, vector<16x128xbf16>, vector<16x128xf32> -> vector<16x128xf32>
    %62 = arith.addf %35, %61 : vector<16x128xf32>
    %63 = vector.extract_strided_slice %7 {offsets = [0, 32], sizes = [16, 16], strides = [1, 1]} : vector<16x384xf32> to vector<16x16xf32>
    %64 = arith.truncf %63 : vector<16x16xf32> to vector<16x16xbf16>
    %65 = vector.extract_strided_slice %7 {offsets = [0, 160], sizes = [16, 16], strides = [1, 1]} : vector<16x384xf32> to vector<16x16xf32>
    %66 = arith.truncf %65 : vector<16x16xf32> to vector<16x16xbf16>
    %67 = vector.extract_strided_slice %7 {offsets = [0, 288], sizes = [16, 16], strides = [1, 1]} : vector<16x384xf32> to vector<16x16xf32>
    %68 = arith.truncf %67 : vector<16x16xf32> to vector<16x16xbf16>
    %69 = tpu.transpose %66, [1, 0] : vector<16x16xbf16> -> vector<16x16xbf16>
    %cst_24 = arith.constant dense<0.000000e+00> : vector<16x16xf32>
    %70 = tpu.matmul %64, %69, %cst_24 {dimension_numbers = #tpu.dot_dimension_numbers<[1], [0], [0], [1], [0, 0, 1, 1], [], []>} : vector<16x16xbf16>, vector<16x16xbf16>, vector<16x16xf32> -> vector<16x16xf32>
    %cst_25 = arith.constant 2.500000e-01 : f32
    %71 = vector.broadcast %cst_25 : f32 to vector<16x16xf32>
    %72 = arith.mulf %70, %71 : vector<16x16xf32>
    %cst_26 = arith.constant dense<0xFF800000> : vector<16xf32>
    %73 = vector.multi_reduction <maximumf>, %72, %cst_26 [1] : vector<16x16xf32> to vector<16xf32>
    %74 = vector.shape_cast %73 : vector<16xf32> to vector<16x1xf32>
    %75 = vector.broadcast %74 : vector<16x1xf32> to vector<16x16xf32>
    %76 = arith.subf %72, %75 : vector<16x16xf32>
    %77 = math.exp %76 : vector<16x16xf32>
    %cst_27 = arith.constant dense<0.000000e+00> : vector<16xf32>
    %78 = vector.multi_reduction <add>, %77, %cst_27 [1] : vector<16x16xf32> to vector<16xf32>
    %79 = vector.shape_cast %78 : vector<16xf32> to vector<16x1xf32>
    %80 = tpu.reciprocal %79 {approx = true} : vector<16x1xf32> -> vector<16x1xf32>
    %81 = vector.broadcast %80 : vector<16x1xf32> to vector<16x16xf32>
    %82 = arith.mulf %77, %81 : vector<16x16xf32>
    %83 = arith.truncf %82 : vector<16x16xf32> to vector<16x16xbf16>
    %cst_28 = arith.constant dense<0.000000e+00> : vector<16x16xf32>
    %84 = tpu.matmul %83, %68, %cst_28 {dimension_numbers = #tpu.dot_dimension_numbers<[1], [0], [0], [1], [0, 0, 1, 1], [], []>} : vector<16x16xbf16>, vector<16x16xbf16>, vector<16x16xf32> -> vector<16x16xf32>
    %85 = arith.truncf %84 : vector<16x16xf32> to vector<16x16xbf16>
    %c2 = arith.constant 2 : index
    %c0_29 = arith.constant 0 : index
    %c0_30 = arith.constant 0 : index
    %86 = vector.load %arg4[%c2, %c0_29, %c0_30] : memref<8x16x128xbf16, #tpu.memory_space<vmem>>, vector<1x16x128xbf16>
    %87 = vector.shape_cast %86 : vector<1x16x128xbf16> to vector<16x128xbf16>
    %cst_31 = arith.constant dense<0.000000e+00> : vector<16x128xf32>
    %88 = tpu.matmul %85, %87, %cst_31 {dimension_numbers = #tpu.dot_dimension_numbers<[1], [0], [0], [1], [0, 0, 1, 1], [], []>} : vector<16x16xbf16>, vector<16x128xbf16>, vector<16x128xf32> -> vector<16x128xf32>
    %89 = arith.addf %62, %88 : vector<16x128xf32>
    %90 = vector.extract_strided_slice %7 {offsets = [0, 48], sizes = [16, 16], strides = [1, 1]} : vector<16x384xf32> to vector<16x16xf32>
    %91 = arith.truncf %90 : vector<16x16xf32> to vector<16x16xbf16>
    %92 = vector.extract_strided_slice %7 {offsets = [0, 176], sizes = [16, 16], strides = [1, 1]} : vector<16x384xf32> to vector<16x16xf32>
    %93 = arith.truncf %92 : vector<16x16xf32> to vector<16x16xbf16>
    %94 = vector.extract_strided_slice %7 {offsets = [0, 304], sizes = [16, 16], strides = [1, 1]} : vector<16x384xf32> to vector<16x16xf32>
    %95 = arith.truncf %94 : vector<16x16xf32> to vector<16x16xbf16>
    %96 = tpu.transpose %93, [1, 0] : vector<16x16xbf16> -> vector<16x16xbf16>
    %cst_32 = arith.constant dense<0.000000e+00> : vector<16x16xf32>
    %97 = tpu.matmul %91, %96, %cst_32 {dimension_numbers = #tpu.dot_dimension_numbers<[1], [0], [0], [1], [0, 0, 1, 1], [], []>} : vector<16x16xbf16>, vector<16x16xbf16>, vector<16x16xf32> -> vector<16x16xf32>
    %cst_33 = arith.constant 2.500000e-01 : f32
    %98 = vector.broadcast %cst_33 : f32 to vector<16x16xf32>
    %99 = arith.mulf %97, %98 : vector<16x16xf32>
    %cst_34 = arith.constant dense<0xFF800000> : vector<16xf32>
    %100 = vector.multi_reduction <maximumf>, %99, %cst_34 [1] : vector<16x16xf32> to vector<16xf32>
    %101 = vector.shape_cast %100 : vector<16xf32> to vector<16x1xf32>
    %102 = vector.broadcast %101 : vector<16x1xf32> to vector<16x16xf32>
    %103 = arith.subf %99, %102 : vector<16x16xf32>
    %104 = math.exp %103 : vector<16x16xf32>
    %cst_35 = arith.constant dense<0.000000e+00> : vector<16xf32>
    %105 = vector.multi_reduction <add>, %104, %cst_35 [1] : vector<16x16xf32> to vector<16xf32>
    %106 = vector.shape_cast %105 : vector<16xf32> to vector<16x1xf32>
    %107 = tpu.reciprocal %106 {approx = true} : vector<16x1xf32> -> vector<16x1xf32>
    %108 = vector.broadcast %107 : vector<16x1xf32> to vector<16x16xf32>
    %109 = arith.mulf %104, %108 : vector<16x16xf32>
    %110 = arith.truncf %109 : vector<16x16xf32> to vector<16x16xbf16>
    %cst_36 = arith.constant dense<0.000000e+00> : vector<16x16xf32>
    %111 = tpu.matmul %110, %95, %cst_36 {dimension_numbers = #tpu.dot_dimension_numbers<[1], [0], [0], [1], [0, 0, 1, 1], [], []>} : vector<16x16xbf16>, vector<16x16xbf16>, vector<16x16xf32> -> vector<16x16xf32>
    %112 = arith.truncf %111 : vector<16x16xf32> to vector<16x16xbf16>
    %c3 = arith.constant 3 : index
    %c0_37 = arith.constant 0 : index
    %c0_38 = arith.constant 0 : index
    %113 = vector.load %arg4[%c3, %c0_37, %c0_38] : memref<8x16x128xbf16, #tpu.memory_space<vmem>>, vector<1x16x128xbf16>
    %114 = vector.shape_cast %113 : vector<1x16x128xbf16> to vector<16x128xbf16>
    %cst_39 = arith.constant dense<0.000000e+00> : vector<16x128xf32>
    %115 = tpu.matmul %112, %114, %cst_39 {dimension_numbers = #tpu.dot_dimension_numbers<[1], [0], [0], [1], [0, 0, 1, 1], [], []>} : vector<16x16xbf16>, vector<16x128xbf16>, vector<16x128xf32> -> vector<16x128xf32>
    %116 = arith.addf %89, %115 : vector<16x128xf32>
    %117 = vector.extract_strided_slice %7 {offsets = [0, 64], sizes = [16, 16], strides = [1, 1]} : vector<16x384xf32> to vector<16x16xf32>
    %118 = arith.truncf %117 : vector<16x16xf32> to vector<16x16xbf16>
    %119 = vector.extract_strided_slice %7 {offsets = [0, 192], sizes = [16, 16], strides = [1, 1]} : vector<16x384xf32> to vector<16x16xf32>
    %120 = arith.truncf %119 : vector<16x16xf32> to vector<16x16xbf16>
    %121 = vector.extract_strided_slice %7 {offsets = [0, 320], sizes = [16, 16], strides = [1, 1]} : vector<16x384xf32> to vector<16x16xf32>
    %122 = arith.truncf %121 : vector<16x16xf32> to vector<16x16xbf16>
    %123 = tpu.transpose %120, [1, 0] : vector<16x16xbf16> -> vector<16x16xbf16>
    %cst_40 = arith.constant dense<0.000000e+00> : vector<16x16xf32>
    %124 = tpu.matmul %118, %123, %cst_40 {dimension_numbers = #tpu.dot_dimension_numbers<[1], [0], [0], [1], [0, 0, 1, 1], [], []>} : vector<16x16xbf16>, vector<16x16xbf16>, vector<16x16xf32> -> vector<16x16xf32>
    %cst_41 = arith.constant 2.500000e-01 : f32
    %125 = vector.broadcast %cst_41 : f32 to vector<16x16xf32>
    %126 = arith.mulf %124, %125 : vector<16x16xf32>
    %cst_42 = arith.constant dense<0xFF800000> : vector<16xf32>
    %127 = vector.multi_reduction <maximumf>, %126, %cst_42 [1] : vector<16x16xf32> to vector<16xf32>
    %128 = vector.shape_cast %127 : vector<16xf32> to vector<16x1xf32>
    %129 = vector.broadcast %128 : vector<16x1xf32> to vector<16x16xf32>
    %130 = arith.subf %126, %129 : vector<16x16xf32>
    %131 = math.exp %130 : vector<16x16xf32>
    %cst_43 = arith.constant dense<0.000000e+00> : vector<16xf32>
    %132 = vector.multi_reduction <add>, %131, %cst_43 [1] : vector<16x16xf32> to vector<16xf32>
    %133 = vector.shape_cast %132 : vector<16xf32> to vector<16x1xf32>
    %134 = tpu.reciprocal %133 {approx = true} : vector<16x1xf32> -> vector<16x1xf32>
    %135 = vector.broadcast %134 : vector<16x1xf32> to vector<16x16xf32>
    %136 = arith.mulf %131, %135 : vector<16x16xf32>
    %137 = arith.truncf %136 : vector<16x16xf32> to vector<16x16xbf16>
    %cst_44 = arith.constant dense<0.000000e+00> : vector<16x16xf32>
    %138 = tpu.matmul %137, %122, %cst_44 {dimension_numbers = #tpu.dot_dimension_numbers<[1], [0], [0], [1], [0, 0, 1, 1], [], []>} : vector<16x16xbf16>, vector<16x16xbf16>, vector<16x16xf32> -> vector<16x16xf32>
    %139 = arith.truncf %138 : vector<16x16xf32> to vector<16x16xbf16>
    %c4 = arith.constant 4 : index
    %c0_45 = arith.constant 0 : index
    %c0_46 = arith.constant 0 : index
    %140 = vector.load %arg4[%c4, %c0_45, %c0_46] : memref<8x16x128xbf16, #tpu.memory_space<vmem>>, vector<1x16x128xbf16>
    %141 = vector.shape_cast %140 : vector<1x16x128xbf16> to vector<16x128xbf16>
    %cst_47 = arith.constant dense<0.000000e+00> : vector<16x128xf32>
    %142 = tpu.matmul %139, %141, %cst_47 {dimension_numbers = #tpu.dot_dimension_numbers<[1], [0], [0], [1], [0, 0, 1, 1], [], []>} : vector<16x16xbf16>, vector<16x128xbf16>, vector<16x128xf32> -> vector<16x128xf32>
    %143 = arith.addf %116, %142 : vector<16x128xf32>
    %144 = vector.extract_strided_slice %7 {offsets = [0, 80], sizes = [16, 16], strides = [1, 1]} : vector<16x384xf32> to vector<16x16xf32>
    %145 = arith.truncf %144 : vector<16x16xf32> to vector<16x16xbf16>
    %146 = vector.extract_strided_slice %7 {offsets = [0, 208], sizes = [16, 16], strides = [1, 1]} : vector<16x384xf32> to vector<16x16xf32>
    %147 = arith.truncf %146 : vector<16x16xf32> to vector<16x16xbf16>
    %148 = vector.extract_strided_slice %7 {offsets = [0, 336], sizes = [16, 16], strides = [1, 1]} : vector<16x384xf32> to vector<16x16xf32>
    %149 = arith.truncf %148 : vector<16x16xf32> to vector<16x16xbf16>
    %150 = tpu.transpose %147, [1, 0] : vector<16x16xbf16> -> vector<16x16xbf16>
    %cst_48 = arith.constant dense<0.000000e+00> : vector<16x16xf32>
    %151 = tpu.matmul %145, %150, %cst_48 {dimension_numbers = #tpu.dot_dimension_numbers<[1], [0], [0], [1], [0, 0, 1, 1], [], []>} : vector<16x16xbf16>, vector<16x16xbf16>, vector<16x16xf32> -> vector<16x16xf32>
    %cst_49 = arith.constant 2.500000e-01 : f32
    %152 = vector.broadcast %cst_49 : f32 to vector<16x16xf32>
    %153 = arith.mulf %151, %152 : vector<16x16xf32>
    %cst_50 = arith.constant dense<0xFF800000> : vector<16xf32>
    %154 = vector.multi_reduction <maximumf>, %153, %cst_50 [1] : vector<16x16xf32> to vector<16xf32>
    %155 = vector.shape_cast %154 : vector<16xf32> to vector<16x1xf32>
    %156 = vector.broadcast %155 : vector<16x1xf32> to vector<16x16xf32>
    %157 = arith.subf %153, %156 : vector<16x16xf32>
    %158 = math.exp %157 : vector<16x16xf32>
    %cst_51 = arith.constant dense<0.000000e+00> : vector<16xf32>
    %159 = vector.multi_reduction <add>, %158, %cst_51 [1] : vector<16x16xf32> to vector<16xf32>
    %160 = vector.shape_cast %159 : vector<16xf32> to vector<16x1xf32>
    %161 = tpu.reciprocal %160 {approx = true} : vector<16x1xf32> -> vector<16x1xf32>
    %162 = vector.broadcast %161 : vector<16x1xf32> to vector<16x16xf32>
    %163 = arith.mulf %158, %162 : vector<16x16xf32>
    %164 = arith.truncf %163 : vector<16x16xf32> to vector<16x16xbf16>
    %cst_52 = arith.constant dense<0.000000e+00> : vector<16x16xf32>
    %165 = tpu.matmul %164, %149, %cst_52 {dimension_numbers = #tpu.dot_dimension_numbers<[1], [0], [0], [1], [0, 0, 1, 1], [], []>} : vector<16x16xbf16>, vector<16x16xbf16>, vector<16x16xf32> -> vector<16x16xf32>
    %166 = arith.truncf %165 : vector<16x16xf32> to vector<16x16xbf16>
    %c5 = arith.constant 5 : index
    %c0_53 = arith.constant 0 : index
    %c0_54 = arith.constant 0 : index
    %167 = vector.load %arg4[%c5, %c0_53, %c0_54] : memref<8x16x128xbf16, #tpu.memory_space<vmem>>, vector<1x16x128xbf16>
    %168 = vector.shape_cast %167 : vector<1x16x128xbf16> to vector<16x128xbf16>
    %cst_55 = arith.constant dense<0.000000e+00> : vector<16x128xf32>
    %169 = tpu.matmul %166, %168, %cst_55 {dimension_numbers = #tpu.dot_dimension_numbers<[1], [0], [0], [1], [0, 0, 1, 1], [], []>} : vector<16x16xbf16>, vector<16x128xbf16>, vector<16x128xf32> -> vector<16x128xf32>
    %170 = arith.addf %143, %169 : vector<16x128xf32>
    %171 = vector.extract_strided_slice %7 {offsets = [0, 96], sizes = [16, 16], strides = [1, 1]} : vector<16x384xf32> to vector<16x16xf32>
    %172 = arith.truncf %171 : vector<16x16xf32> to vector<16x16xbf16>
    %173 = vector.extract_strided_slice %7 {offsets = [0, 224], sizes = [16, 16], strides = [1, 1]} : vector<16x384xf32> to vector<16x16xf32>
    %174 = arith.truncf %173 : vector<16x16xf32> to vector<16x16xbf16>
    %175 = vector.extract_strided_slice %7 {offsets = [0, 352], sizes = [16, 16], strides = [1, 1]} : vector<16x384xf32> to vector<16x16xf32>
    %176 = arith.truncf %175 : vector<16x16xf32> to vector<16x16xbf16>
    %177 = tpu.transpose %174, [1, 0] : vector<16x16xbf16> -> vector<16x16xbf16>
    %cst_56 = arith.constant dense<0.000000e+00> : vector<16x16xf32>
    %178 = tpu.matmul %172, %177, %cst_56 {dimension_numbers = #tpu.dot_dimension_numbers<[1], [0], [0], [1], [0, 0, 1, 1], [], []>} : vector<16x16xbf16>, vector<16x16xbf16>, vector<16x16xf32> -> vector<16x16xf32>
    %cst_57 = arith.constant 2.500000e-01 : f32
    %179 = vector.broadcast %cst_57 : f32 to vector<16x16xf32>
    %180 = arith.mulf %178, %179 : vector<16x16xf32>
    %cst_58 = arith.constant dense<0xFF800000> : vector<16xf32>
    %181 = vector.multi_reduction <maximumf>, %180, %cst_58 [1] : vector<16x16xf32> to vector<16xf32>
    %182 = vector.shape_cast %181 : vector<16xf32> to vector<16x1xf32>
    %183 = vector.broadcast %182 : vector<16x1xf32> to vector<16x16xf32>
    %184 = arith.subf %180, %183 : vector<16x16xf32>
    %185 = math.exp %184 : vector<16x16xf32>
    %cst_59 = arith.constant dense<0.000000e+00> : vector<16xf32>
    %186 = vector.multi_reduction <add>, %185, %cst_59 [1] : vector<16x16xf32> to vector<16xf32>
    %187 = vector.shape_cast %186 : vector<16xf32> to vector<16x1xf32>
    %188 = tpu.reciprocal %187 {approx = true} : vector<16x1xf32> -> vector<16x1xf32>
    %189 = vector.broadcast %188 : vector<16x1xf32> to vector<16x16xf32>
    %190 = arith.mulf %185, %189 : vector<16x16xf32>
    %191 = arith.truncf %190 : vector<16x16xf32> to vector<16x16xbf16>
    %cst_60 = arith.constant dense<0.000000e+00> : vector<16x16xf32>
    %192 = tpu.matmul %191, %176, %cst_60 {dimension_numbers = #tpu.dot_dimension_numbers<[1], [0], [0], [1], [0, 0, 1, 1], [], []>} : vector<16x16xbf16>, vector<16x16xbf16>, vector<16x16xf32> -> vector<16x16xf32>
    %193 = arith.truncf %192 : vector<16x16xf32> to vector<16x16xbf16>
    %c6 = arith.constant 6 : index
    %c0_61 = arith.constant 0 : index
    %c0_62 = arith.constant 0 : index
    %194 = vector.load %arg4[%c6, %c0_61, %c0_62] : memref<8x16x128xbf16, #tpu.memory_space<vmem>>, vector<1x16x128xbf16>
    %195 = vector.shape_cast %194 : vector<1x16x128xbf16> to vector<16x128xbf16>
    %cst_63 = arith.constant dense<0.000000e+00> : vector<16x128xf32>
    %196 = tpu.matmul %193, %195, %cst_63 {dimension_numbers = #tpu.dot_dimension_numbers<[1], [0], [0], [1], [0, 0, 1, 1], [], []>} : vector<16x16xbf16>, vector<16x128xbf16>, vector<16x128xf32> -> vector<16x128xf32>
    %197 = arith.addf %170, %196 : vector<16x128xf32>
    %198 = vector.extract_strided_slice %7 {offsets = [0, 112], sizes = [16, 16], strides = [1, 1]} : vector<16x384xf32> to vector<16x16xf32>
    %199 = arith.truncf %198 : vector<16x16xf32> to vector<16x16xbf16>
    %200 = vector.extract_strided_slice %7 {offsets = [0, 240], sizes = [16, 16], strides = [1, 1]} : vector<16x384xf32> to vector<16x16xf32>
    %201 = arith.truncf %200 : vector<16x16xf32> to vector<16x16xbf16>
    %202 = vector.extract_strided_slice %7 {offsets = [0, 368], sizes = [16, 16], strides = [1, 1]} : vector<16x384xf32> to vector<16x16xf32>
    %203 = arith.truncf %202 : vector<16x16xf32> to vector<16x16xbf16>
    %204 = tpu.transpose %201, [1, 0] : vector<16x16xbf16> -> vector<16x16xbf16>
    %cst_64 = arith.constant dense<0.000000e+00> : vector<16x16xf32>
    %205 = tpu.matmul %199, %204, %cst_64 {dimension_numbers = #tpu.dot_dimension_numbers<[1], [0], [0], [1], [0, 0, 1, 1], [], []>} : vector<16x16xbf16>, vector<16x16xbf16>, vector<16x16xf32> -> vector<16x16xf32>
    %cst_65 = arith.constant 2.500000e-01 : f32
    %206 = vector.broadcast %cst_65 : f32 to vector<16x16xf32>
    %207 = arith.mulf %205, %206 : vector<16x16xf32>
    %cst_66 = arith.constant dense<0xFF800000> : vector<16xf32>
    %208 = vector.multi_reduction <maximumf>, %207, %cst_66 [1] : vector<16x16xf32> to vector<16xf32>
    %209 = vector.shape_cast %208 : vector<16xf32> to vector<16x1xf32>
    %210 = vector.broadcast %209 : vector<16x1xf32> to vector<16x16xf32>
    %211 = arith.subf %207, %210 : vector<16x16xf32>
    %212 = math.exp %211 : vector<16x16xf32>
    %cst_67 = arith.constant dense<0.000000e+00> : vector<16xf32>
    %213 = vector.multi_reduction <add>, %212, %cst_67 [1] : vector<16x16xf32> to vector<16xf32>
    %214 = vector.shape_cast %213 : vector<16xf32> to vector<16x1xf32>
    %215 = tpu.reciprocal %214 {approx = true} : vector<16x1xf32> -> vector<16x1xf32>
    %216 = vector.broadcast %215 : vector<16x1xf32> to vector<16x16xf32>
    %217 = arith.mulf %212, %216 : vector<16x16xf32>
    %218 = arith.truncf %217 : vector<16x16xf32> to vector<16x16xbf16>
    %cst_68 = arith.constant dense<0.000000e+00> : vector<16x16xf32>
    %219 = tpu.matmul %218, %203, %cst_68 {dimension_numbers = #tpu.dot_dimension_numbers<[1], [0], [0], [1], [0, 0, 1, 1], [], []>} : vector<16x16xbf16>, vector<16x16xbf16>, vector<16x16xf32> -> vector<16x16xf32>
    %220 = arith.truncf %219 : vector<16x16xf32> to vector<16x16xbf16>
    %c7 = arith.constant 7 : index
    %c0_69 = arith.constant 0 : index
    %c0_70 = arith.constant 0 : index
    %221 = vector.load %arg4[%c7, %c0_69, %c0_70] : memref<8x16x128xbf16, #tpu.memory_space<vmem>>, vector<1x16x128xbf16>
    %222 = vector.shape_cast %221 : vector<1x16x128xbf16> to vector<16x128xbf16>
    %cst_71 = arith.constant dense<0.000000e+00> : vector<16x128xf32>
    %223 = tpu.matmul %220, %222, %cst_71 {dimension_numbers = #tpu.dot_dimension_numbers<[1], [0], [0], [1], [0, 0, 1, 1], [], []>} : vector<16x16xbf16>, vector<16x128xbf16>, vector<16x128xf32> -> vector<16x128xf32>
    %224 = arith.addf %197, %223 : vector<16x128xf32>
    %c0_72 = arith.constant 0 : index
    %c0_73 = arith.constant 0 : index
    %225 = vector.load %arg5[%c0_72, %c0_73] : memref<1x128xf32, #tpu.memory_space<vmem>>, vector<1x128xf32>
    %226 = vector.broadcast %225 : vector<1x128xf32> to vector<16x128xf32>
    %227 = arith.addf %224, %226 : vector<16x128xf32>
    %228 = arith.addf %1, %227 : vector<16x128xf32>
    %c0_74 = arith.constant 0 : index
    %c0_75 = arith.constant 0 : index
    %229 = vector.load %arg10[%c0_74, %c0_75] : memref<1x128xf32, #tpu.memory_space<vmem>>, vector<1x128xf32>
    %c0_76 = arith.constant 0 : index
    %c0_77 = arith.constant 0 : index
    %230 = vector.load %arg11[%c0_76, %c0_77] : memref<1x128xf32, #tpu.memory_space<vmem>>, vector<1x128xf32>
    %cst_78 = arith.constant dense<0.000000e+00> : vector<16xf32>
    %231 = vector.multi_reduction <add>, %228, %cst_78 [1] : vector<16x128xf32> to vector<16xf32>
    %232 = vector.shape_cast %231 : vector<16xf32> to vector<16x1xf32>
    %cst_79 = arith.constant 1.280000e+02 : f32
    %233 = vector.broadcast %cst_79 : f32 to vector<16x1xf32>
    %234 = arith.divf %232, %233 : vector<16x1xf32>
    %235 = vector.broadcast %234 : vector<16x1xf32> to vector<16x128xf32>
    %236 = arith.subf %228, %235 : vector<16x128xf32>
    %237 = vector.broadcast %234 : vector<16x1xf32> to vector<16x128xf32>
    %238 = arith.subf %228, %237 : vector<16x128xf32>
    %239 = arith.mulf %236, %238 : vector<16x128xf32>
    %cst_80 = arith.constant dense<0.000000e+00> : vector<16xf32>
    %240 = vector.multi_reduction <add>, %239, %cst_80 [1] : vector<16x128xf32> to vector<16xf32>
    %241 = vector.shape_cast %240 : vector<16xf32> to vector<16x1xf32>
    %cst_81 = arith.constant 1.280000e+02 : f32
    %242 = vector.broadcast %cst_81 : f32 to vector<16x1xf32>
    %243 = arith.divf %241, %242 : vector<16x1xf32>
    %244 = vector.broadcast %234 : vector<16x1xf32> to vector<16x128xf32>
    %245 = arith.subf %228, %244 : vector<16x128xf32>
    %cst_82 = arith.constant 9.99999974E-6 : f32
    %246 = vector.broadcast %cst_82 : f32 to vector<16x1xf32>
    %247 = arith.addf %243, %246 : vector<16x1xf32>
    %248 = math.rsqrt %247 : vector<16x1xf32>
    %249 = vector.broadcast %248 : vector<16x1xf32> to vector<16x128xf32>
    %250 = arith.mulf %245, %249 : vector<16x128xf32>
    %251 = vector.broadcast %229 : vector<1x128xf32> to vector<16x128xf32>
    %252 = arith.mulf %250, %251 : vector<16x128xf32>
    %253 = vector.broadcast %230 : vector<1x128xf32> to vector<16x128xf32>
    %254 = arith.addf %252, %253 : vector<16x128xf32>
    %255 = arith.truncf %254 : vector<16x128xf32> to vector<16x128xbf16>
    %c0_83 = arith.constant 0 : index
    %c0_84 = arith.constant 0 : index
    %256 = vector.load %arg6[%c0_83, %c0_84] : memref<128x2048xbf16, #tpu.memory_space<vmem>>, vector<128x2048xbf16>
    %cst_85 = arith.constant dense<0.000000e+00> : vector<16x2048xf32>
    %257 = tpu.matmul %255, %256, %cst_85 {dimension_numbers = #tpu.dot_dimension_numbers<[1], [0], [0], [1], [0, 0, 1, 1], [], []>} : vector<16x128xbf16>, vector<128x2048xbf16>, vector<16x2048xf32> -> vector<16x2048xf32>
    %c0_86 = arith.constant 0 : index
    %c0_87 = arith.constant 0 : index
    %258 = vector.load %arg7[%c0_86, %c0_87] : memref<1x2048xf32, #tpu.memory_space<vmem>>, vector<1x2048xf32>
    %259 = vector.broadcast %258 : vector<1x2048xf32> to vector<16x2048xf32>
    %260 = arith.addf %257, %259 : vector<16x2048xf32>
    %cst_88 = arith.constant 0.000000e+00 : f32
    %261 = vector.broadcast %cst_88 : f32 to vector<16x2048xf32>
    %262 = arith.maximumf %260, %261 : vector<16x2048xf32>
    %263 = arith.truncf %262 : vector<16x2048xf32> to vector<16x2048xbf16>
    %c0_89 = arith.constant 0 : index
    %c0_90 = arith.constant 0 : index
    %264 = vector.load %arg8[%c0_89, %c0_90] : memref<2048x128xbf16, #tpu.memory_space<vmem>>, vector<2048x128xbf16>
    %cst_91 = arith.constant dense<0.000000e+00> : vector<16x128xf32>
    %265 = tpu.matmul %263, %264, %cst_91 {dimension_numbers = #tpu.dot_dimension_numbers<[1], [0], [0], [1], [0, 0, 1, 1], [], []>} : vector<16x2048xbf16>, vector<2048x128xbf16>, vector<16x128xf32> -> vector<16x128xf32>
    %c0_92 = arith.constant 0 : index
    %c0_93 = arith.constant 0 : index
    %266 = vector.load %arg9[%c0_92, %c0_93] : memref<1x128xf32, #tpu.memory_space<vmem>>, vector<1x128xf32>
    %267 = vector.broadcast %266 : vector<1x128xf32> to vector<16x128xf32>
    %268 = arith.addf %265, %267 : vector<16x128xf32>
    %269 = arith.addf %254, %268 : vector<16x128xf32>
    %c0_94 = arith.constant 0 : index
    %c0_95 = arith.constant 0 : index
    %270 = vector.load %arg10[%c0_94, %c0_95] : memref<1x128xf32, #tpu.memory_space<vmem>>, vector<1x128xf32>
    %c0_96 = arith.constant 0 : index
    %c0_97 = arith.constant 0 : index
    %271 = vector.load %arg11[%c0_96, %c0_97] : memref<1x128xf32, #tpu.memory_space<vmem>>, vector<1x128xf32>
    %cst_98 = arith.constant dense<0.000000e+00> : vector<16xf32>
    %272 = vector.multi_reduction <add>, %269, %cst_98 [1] : vector<16x128xf32> to vector<16xf32>
    %273 = vector.shape_cast %272 : vector<16xf32> to vector<16x1xf32>
    %cst_99 = arith.constant 1.280000e+02 : f32
    %274 = vector.broadcast %cst_99 : f32 to vector<16x1xf32>
    %275 = arith.divf %273, %274 : vector<16x1xf32>
    %276 = vector.broadcast %275 : vector<16x1xf32> to vector<16x128xf32>
    %277 = arith.subf %269, %276 : vector<16x128xf32>
    %278 = vector.broadcast %275 : vector<16x1xf32> to vector<16x128xf32>
    %279 = arith.subf %269, %278 : vector<16x128xf32>
    %280 = arith.mulf %277, %279 : vector<16x128xf32>
    %cst_100 = arith.constant dense<0.000000e+00> : vector<16xf32>
    %281 = vector.multi_reduction <add>, %280, %cst_100 [1] : vector<16x128xf32> to vector<16xf32>
    %282 = vector.shape_cast %281 : vector<16xf32> to vector<16x1xf32>
    %cst_101 = arith.constant 1.280000e+02 : f32
    %283 = vector.broadcast %cst_101 : f32 to vector<16x1xf32>
    %284 = arith.divf %282, %283 : vector<16x1xf32>
    %285 = vector.broadcast %275 : vector<16x1xf32> to vector<16x128xf32>
    %286 = arith.subf %269, %285 : vector<16x128xf32>
    %cst_102 = arith.constant 9.99999974E-6 : f32
    %287 = vector.broadcast %cst_102 : f32 to vector<16x1xf32>
    %288 = arith.addf %284, %287 : vector<16x1xf32>
    %289 = math.rsqrt %288 : vector<16x1xf32>
    %290 = vector.broadcast %289 : vector<16x1xf32> to vector<16x128xf32>
    %291 = arith.mulf %286, %290 : vector<16x128xf32>
    %292 = vector.broadcast %270 : vector<1x128xf32> to vector<16x128xf32>
    %293 = arith.mulf %291, %292 : vector<16x128xf32>
    %294 = vector.broadcast %271 : vector<1x128xf32> to vector<16x128xf32>
    %295 = arith.addf %293, %294 : vector<16x128xf32>
    %c0_103 = arith.constant 0 : index
    %c0_104 = arith.constant 0 : index
    %c0_105 = arith.constant 0 : index
    %296 = vector.load %arg12[%c0_103, %c0_104, %c0_105] : memref<1x16x128xf32, #tpu.memory_space<vmem>>, vector<1x16x128xf32>
    %297 = vector.shape_cast %296 : vector<1x16x128xf32> to vector<16x128xf32>
    %298 = vector.shape_cast %295 : vector<16x128xf32> to vector<1x16x128xf32>
    tpu.vector_store %arg12[%c0_103, %c0_104, %c0_105], %298 {strides = array<i32>} : memref<1x16x128xf32, #tpu.memory_space<vmem>>, vector<1x16x128xf32>,
    return
  }
  func.func @transform_0(%arg0: i32) -> (i32, i32, i32) {
    %c0_i32 = arith.constant 0 : i32
    %c0_i32_0 = arith.constant 0 : i32
    %c0_i32_1 = arith.constant 0 : i32
    return %arg0, %c0_i32, %c0_i32_0 : i32, i32, i32
  }
  func.func @transform_1(%arg0: i32) -> (i32, i32) {
    %c0_i32 = arith.constant 0 : i32
    %c0_i32_0 = arith.constant 0 : i32
    %c0_i32_1 = arith.constant 0 : i32
    return %c0_i32, %c0_i32_0 : i32, i32
  }
  func.func @transform_2(%arg0: i32) -> (i32, i32) {
    %c0_i32 = arith.constant 0 : i32
    %c0_i32_0 = arith.constant 0 : i32
    %c0_i32_1 = arith.constant 0 : i32
    return %c0_i32, %c0_i32_0 : i32, i32
  }
  func.func @transform_3(%arg0: i32) -> (i32, i32, i32) {
    %c0_i32 = arith.constant 0 : i32
    %c0_i32_0 = arith.constant 0 : i32
    %c0_i32_1 = arith.constant 0 : i32
    %c0_i32_2 = arith.constant 0 : i32
    return %c0_i32, %c0_i32_0, %c0_i32_1 : i32, i32, i32
  }
  func.func @transform_4(%arg0: i32) -> (i32, i32) {
    %c0_i32 = arith.constant 0 : i32
    %c0_i32_0 = arith.constant 0 : i32
    %c0_i32_1 = arith.constant 0 : i32
    return %c0_i32, %c0_i32_0 : i32, i32
  }
  func.func @transform_5(%arg0: i32) -> (i32, i32) {
    %c0_i32 = arith.constant 0 : i32
    %c0_i32_0 = arith.constant 0 : i32
    %c0_i32_1 = arith.constant 0 : i32
    return %c0_i32, %c0_i32_0 : i32, i32
  }
  func.func @transform_6(%arg0: i32) -> (i32, i32) {
    %c0_i32 = arith.constant 0 : i32
    %c0_i32_0 = arith.constant 0 : i32
    %c0_i32_1 = arith.constant 0 : i32
    return %c0_i32, %c0_i32_0 : i32, i32
  }
  func.func @transform_7(%arg0: i32) -> (i32, i32) {
    %c0_i32 = arith.constant 0 : i32
    %c0_i32_0 = arith.constant 0 : i32
    %c0_i32_1 = arith.constant 0 : i32
    return %c0_i32, %c0_i32_0 : i32, i32
  }
  func.func @transform_8(%arg0: i32) -> (i32, i32) {
    %c0_i32 = arith.constant 0 : i32
    %c0_i32_0 = arith.constant 0 : i32
    %c0_i32_1 = arith.constant 0 : i32
    return %c0_i32, %c0_i32_0 : i32, i32
  }
  func.func @transform_9(%arg0: i32) -> (i32, i32) {
    %c0_i32 = arith.constant 0 : i32
    %c0_i32_0 = arith.constant 0 : i32
    %c0_i32_1 = arith.constant 0 : i32
    return %c0_i32, %c0_i32_0 : i32, i32
  }
  func.func @transform_10(%arg0: i32) -> (i32, i32) {
    %c0_i32 = arith.constant 0 : i32
    %c0_i32_0 = arith.constant 0 : i32
    %c0_i32_1 = arith.constant 0 : i32
    return %c0_i32, %c0_i32_0 : i32, i32
  }
  func.func @transform_11(%arg0: i32) -> (i32, i32, i32) {
    %c0_i32 = arith.constant 0 : i32
    %c0_i32_0 = arith.constant 0 : i32
    %c0_i32_1 = arith.constant 0 : i32
    return %arg0, %c0_i32, %c0_i32_0 : i32, i32, i32
  }
}

</mosaic_0001>

<bundles_post_ra>
// kernel: encoder_forward.1
= control target key start
LH: loop header
LB: loop body
LE: loop exit
PB: predicated region body
PF: predicated region fallthrough
CT: control target
= control target key end

     0   :  { %s7012_s0 = inlined_call_operand.hbm [shape: f32[2,16,128], index: 0, kind: input, shape index: {}]   ;;  %s7013_s1 = inlined_call_operand.hbm [shape: bf16[128,384], index: 1, kind: input, shape index: {}]   ;;  %s7014_s2 = inlined_call_operand.vmem [shape: f32[1,384], index: 2, kind: input, shape index: {}]   ;;  %s7015_s3 = inlined_call_operand.hbm [shape: bf16[8,16,128], index: 3, kind: input, shape index: {}]   ;;  %s7016_s4 = inlined_call_operand.vmem [shape: f32[1,128], index: 4, kind: input, shape index: {}]   ;;  %s7017_s5 = inlined_call_operand.hbm [shape: bf16[128,2048], index: 5, kind: input, shape index: {}]   ;;  %s7018_s6 = inlined_call_operand.hbm [shape: f32[1,2048], index: 6, kind: input, shape index: {}]   ;;  %s7019_s7 = inlined_call_operand.hbm [shape: bf16[2048,128], index: 7, kind: input, shape index: {}]   ;;  %s7020_s8 = inlined_call_operand.vmem [shape: f32[1,128], index: 8, kind: input, shape index: {}]   ;;  %s7021_s9 = inlined_call_operand.vmem [shape: f32[1,128], index: 9, kind: input, shape index: {}]   ;;  %s7022_s10 = inlined_call_operand.vmem [shape: f32[1,128], index: 10, kind: input, shape index: {}]   ;;  %s7023_s11 = inlined_call_operand.hbm [shape: f32[2,16,128], index: 11, kind: output, shape index: {}]  }
   0x1   :  { %7028 = sst [smem:[#allocation19_spill]] %s7013_s1 }
   0x2   :  { %7029 = sst [smem:[#allocation20_spill]] %s7015_s3 }
   0x3   :  { %7030 = sst [smem:[#allocation21_spill]] %s7017_s5 }
   0x4   :  { %7031 = sst [smem:[#allocation22_spill]] %s7018_s6 }
   0x5   :  { %7032 = sst [smem:[#allocation23_spill]] %s7019_s7 }
   0x6   :  { %16 = vsyncpa [#allocation3], 0 }
   0x7   :  { %18 = vsyncpa [#allocation3 + $0x1], 0 }
   0x8   :  { %19 = vsyncpa [#allocation6], 0 }
   0x9   :  { %20 = vsyncpa [#allocation9], 0 }
   0xa   :  { %21 = vsyncpa [#allocation12], 0 }
   0xb   :  { %22 = vsyncpa [#allocation4], 0 }
   0xc   :  { %24 = vsyncpa [#allocation4 + $0x1], 0  ;;  %s6410_s17 = smov 0   ;;  %s6412_s18 = smov 0  }
   0xd   :  { %s6414_s19 = smov 0   ;;  %s6416_s20 = smov 0  }
   0xe LB: > { %s6324_s21 = smov [#allocation5]   ;;  %s6431_s23 = sadd.s32 4294967295, %s6322_s20   ;;  %s6322_s20 = sphi %s6416_s20, %s7061_s20   ;;  %s6318_s19 = sphi %s6414_s19, %s7060_s19   ;;  %s6314_s18 = sphi %s6412_s18, %s7059_s18   ;;  %s6310_s17 = sphi %s6410_s17, %s7058_s17  }
   0xf   : > { %s309_s22 = sshll.u32 %s6324_s21, 4  ;;  %p4990_p0 = scmp.ge.s32.totalorder %s6322_s20, 1  ;;  %s310_s22 = int_to_ptr.vmem [resolvable:$true] %s309_s22 }
  0x10   : > { %p7024_p1 = scmp.eq.s32.totalorder %s6431_s23, 0  ;;  %p297_p2 = scmp.lt.s32.totalorder %s6322_s20, 3 }
  0x11   : > { %s6325_s26 = smov [#allocation8]   ;;  %s6326_s28 = smov [#allocation7]  }
  0x12   : > { %p6436_p3 = pnand %p4990_p0, %p297_p2  ;;  %s341_s27 = sshll.u32 %s6325_s26, 4  ;;  %s6449_s27 = int_to_ptr.vmem [resolvable:$true] %s341_s27 }
  0x13   : > { %s6451_s29 = sshll.u32 %s6326_s28, 4  ;;  %s6099_s12 = scalar_lea.vmem %s310_s22, 3072  ;;  %s326_s29 = int_to_ptr.vmem [resolvable:$true] %s6451_s29 }
  0x14   : > { %s7033_s24 = scalar_select %p6436_p3, 1, 0 }
  0x15   : > { %p5752_p5 = pneg %p6436_p3  ;;  %p6100_p8 = scmp.ne.s32.totalorder %s310_s22, %s6099_s12 }
  0x16   : > { %p6107_p11 = scmp.lt.s32.totalorder %s310_s22, %s310_s22  ;;  %p6108_p12 = scmp.lt.s32.totalorder %s6099_s12, %s6099_s12 }
  0x17   : > { %p6445_p6 = pnand %p5752_p5, %p7024_p1 }
  0x18   : > { %p6109_p13 = por %p6108_p12, %p6107_p11 }
  0x19   : > { %p6455_p7 = pneg %p6445_p6 }
  0x1b   : > { %p6102_p9 = pnand %p6100_p8, %p6455_p7 }
  0x1d   : > { %p6103_p10 = pneg %p6102_p9 }
  0x1f   : > { %p6110_p0 = pnand %p6109_p13, %p6103_p10 }
  0x21   : > { %6113 = shalt.err (!%p6110_p0)
}
  0x22   : > { %s6327_s13 = smov 192   ;;  %s6328_s14 = smov 12  }
  0x23   : > { %s7036_s1 = sld [smem:[#allocation19_spill]]  ;;  %s6125_s21 = scalar_lea.vmem %s6449_s27, 16384 }
  0x24   : > { %p6126_p2 = scmp.ne.s32.totalorder %s6449_s27, %s6125_s21  ;;  %p6133_p9 = scmp.lt.s32.totalorder %s6449_s27, %s6449_s27 }
  0x25   : > { %p6134_p10 = scmp.lt.s32.totalorder %s6125_s21, %s6125_s21 }
  0x26   : > { %p6128_p5 = pnand %p6126_p2, %p6455_p7 }
  0x27   : > { %p6135_p11 = por %p6134_p10, %p6133_p9 }
  0x28   : > { %p6129_p8 = pneg %p6128_p5 }
  0x29   : > { %5755 = dma.hbm_to_vmem [thread:$0]  (!%p6445_p6), %s7036_s1, 3072, %s310_s22, [#allocation6], %s6327_s13, %s6327_s13, %s6328_s14  }
  0x2a   : > { %p6136_p12 = pnand %p6135_p11, %p6129_p8 }
  0x2c   : > { %6139 = shalt.err (!%p6136_p12)
}
  0x2d   : > { %s6329_s26 = smov 1024   ;;  %s6330_s28 = smov 64  }
  0x2e   : > { %s7037_s5 = sld [smem:[#allocation21_spill]]  ;;  %s6151_s13 = scalar_lea.vmem %s326_s29, 1024 }
  0x2f   : > { %p6152_p13 = scmp.ne.s32.totalorder %s326_s29, %s6151_s13  ;;  %p6159_p5 = scmp.lt.s32.totalorder %s326_s29, %s326_s29 }
  0x30   : > { %p6160_p8 = scmp.lt.s32.totalorder %s6151_s13, %s6151_s13 }
  0x31   : > { %p6154_p0 = pnand %p6152_p13, %p6455_p7 }
  0x32   : > { %p6161_p9 = por %p6160_p8, %p6159_p5 }
  0x33   : > { %p6155_p2 = pneg %p6154_p0 }
  0x34   : > { %5761 = dma.hbm_to_vmem [thread:$0]  (!%p6445_p6), %s7037_s5, 16384, %s6449_s27, [#allocation9], %s6329_s26, %s6329_s26, %s6330_s28  }
  0x35   : > { %p6162_p10 = pnand %p6161_p9, %p6155_p2 }
  0x37   : > { %6165 = shalt.err (!%p6162_p10)
}
  0x38   : > { %s6331_s14 = smov 4   ;;  %s7038_s3 = sld [smem:[#allocation20_spill]] }
  0x39   : > { %s6332_s27 = smov [#allocation10]   ;;  %s6333_s26 = smov [#allocation11]  }
  0x3a   : > { %s355_s21 = sshll.u32 %s6332_s27, 4  ;;  %s365_s22 = sshll.u32 %s6333_s26, 4  ;;  %s356_s21 = int_to_ptr.vmem [resolvable:$true] %s355_s21  ;;  %s366_s22 = int_to_ptr.vmem [resolvable:$true] %s365_s22 }
  0x3b   : > { %s6177_s12 = scalar_lea.vmem %s356_s21, 256  ;;  %p6185_p0 = scmp.lt.s32.totalorder %s356_s21, %s356_s21 }
  0x3c   : > { %p6178_p11 = scmp.ne.s32.totalorder %s356_s21, %s6177_s12  ;;  %p6186_p2 = scmp.lt.s32.totalorder %s6177_s12, %s6177_s12 }
  0x3e   : > { %5758 = dma.hbm_to_vmem [thread:$0]  (!%p6445_p6), %s7038_s3, 1024, %s326_s29, [#allocation6], %s6330_s28, %s6330_s28, %s6331_s14  }
  0x3f   : > { %p6180_p12 = pnand %p6178_p11, %p6455_p7  ;;  %p6187_p5 = por %p6186_p2, %p6185_p0 }
  0x41   : > { %p6181_p13 = pneg %p6180_p12 }
  0x43   : > { %p6188_p8 = pnand %p6187_p5, %p6181_p13 }
  0x45   : > { %6191 = shalt.err (!%p6188_p8)
}
  0x46   : > { %s7039_s6 = sld [smem:[#allocation22_spill]]  ;;  %s6203_s15 = scalar_lea.vmem %s366_s22, 16384 }
  0x47   : > { %p6204_p9 = scmp.ne.s32.totalorder %s366_s22, %s6203_s15  ;;  %p6211_p1 = scmp.lt.s32.totalorder %s366_s22, %s366_s22 }
  0x48   : > { %p6212_p11 = scmp.lt.s32.totalorder %s6203_s15, %s6203_s15 }
  0x49   : > { %p6206_p10 = pnand %p6204_p9, %p6455_p7 }
  0x4a   : > { %p6213_p12 = por %p6212_p11, %p6211_p1 }
  0x4b   : > { %p6207_p4 = pneg %p6206_p10 }
  0x4c   : > { %5764 = dma.hbm_to_vmem [thread:$0]  (!%p6445_p6), %s7039_s6, 256, %s356_s21, [#allocation9]  }
  0x4d   : > { %p6214_p3 = pnand %p6213_p12, %p6207_p4 }
  0x4f   : > { %6217 = shalt.err (!%p6214_p3)
}
  0x50   : > { %s7040_s7 = sld [smem:[#allocation23_spill]]  ;;  %s4989_s25 = sadd.s32 4294967294, %s6322_s20  }
  0x51   : > { %s6509_s30 = sadd.s32 1, %s6322_s20   ;;  %s37_s26 = sadd.s32 1, %s6318_s19 }
  0x52   : > { %s34_s21 = ssub.s32 %s6322_s20, %s6509_s30  ;;  %p44_p3 = scmp.ne.s32.totalorder %s6318_s19, %s6314_s18 }
  0x53   : > { %p35_p1 = scmp.eq.s32.totalorder %s34_s21, 0  ;;  %p45_p4 = scmp.eq.s32.totalorder %s6322_s20, 0 }
  0x54   : > { %p50_p7 = scmp.ne.s32.totalorder %s6314_s18, %s6310_s17  ;;  %p7042_p0 = scmp.eq.s32.totalorder %s6431_s23, 0 }
  0x55   : > { %s6520_s12 = scalar_select %p35_p1, %s6318_s19, %s37_s26  }
  0x56   : > { %5767 = dma.hbm_to_vmem [thread:$0]  (!%p6445_p6), %s7040_s7, 16384, %s366_s22, [#allocation12], %s6330_s28, %s6330_s28, %s6331_s14  }
  0x57   : > { %p6522_p13 = por %p45_p4, %p44_p3  ;;  %p6528_p6 = por %p7042_p0, %p50_p7 }
  0x58   : > { %p284_p2 = scmp.eq.s32.totalorder %s6431_s23, 1  ;;  %p290_p5 = scmp.eq.s32.totalorder %s4989_s25, 1 }
  0x59   : > { %s7043_s28 = scalar_select %p6528_p6, 1, 0 }
  0x5a   : > { %p5781_p8 = scmp.lt.s32.totalorder %s6322_s20, 2  ;;  %s388_s14 = sand.u32 1, %s6318_s19  }
  0x5b   : > { %p6535_p9 = por %p284_p2, %p44_p3  ;;  %p6539_p10 = por %p290_p5, %p50_p7 }
  0x5c   : > { %s4997_s15 = sshll.u32 %s388_s14, 4  ;;  %s5329_s16 = sshll.u32 %s6322_s20, 8 }
  0x5d   : > { %s7044_s22 = scalar_select %p6535_p9, 1, 0 }
  0x5e   : > { %s7045_s29 = scalar_select %p6539_p10, 1, 0 }
  0x5f   : > { %s6547_s26 = scalar_lea.hbm %s7012_s0, %s5329_s16  ;;  %s392_s25 = scalar_lea.vmem [#allocation2], %s4997_s15 }
  0x60   : > { %s399_s1 = sshll.u32 %s392_s25, 4  ;;  %p6553_p11 = pnand %p5781_p8, %p6522_p13  ;;  %s6549_s1 = int_to_ptr.vmem [resolvable:$true] %s399_s1 }
  0x61   : > { %s6557_s5 = scalar_lea.sflag [#allocation3], %s388_s14  ;;  %s6218_s6 = scalar_lea.hbm %s6547_s26, 256 }
  0x62   : > { %p6219_p12 = scmp.ne.s32.totalorder %s6547_s26, %s6218_s6  ;;  %p6220_p1 = pneg %p6553_p11 }
  0x63   : > { %s6223_s15 = scalar_lea.hbm %s7012_s0, 512  ;;  %p6224_p7 = scmp.lt.s32.totalorder %s6547_s26, %s7012_s0 }
  0x64   : > { %p6221_p3 = pnand %p6220_p1, %p6219_p12  ;;  %p6225_p13 = scmp.lt.s32.totalorder %s6223_s15, %s6218_s6 }
  0x66   : > { %p6222_p4 = pneg %p6221_p3  ;;  %p6226_p0 = por %p6225_p13, %p6224_p7 }
  0x68   : > { %p6227_p2 = pnand %p6226_p0, %p6222_p4 }
  0x6a   : > { %6230 = shalt.err (!%p6227_p2)
}
  0x6b   : > { %s6231_s13 = scalar_lea.vmem %s6549_s1, 256  ;;  %s6334_s14 = smov [#allocation2]  }
  0x6c   : > { %p6232_p5 = scmp.ne.s32.totalorder %s6549_s1, %s6231_s13  ;;  %s6236_s7 = sshll.u32 %s6334_s14, 4  ;;  %s6237_s7 = int_to_ptr.vmem [resolvable:$false] %s6236_s7 }
  0x6d   : > { %s6238_s16 = scalar_lea.vmem %s6237_s7, 512  ;;  %p6239_p3 = scmp.lt.s32.totalorder %s6549_s1, %s6237_s7 }
  0x6e   : > { %p6234_p8 = pnand %p6232_p5, %p6220_p1  ;;  %p6240_p10 = scmp.lt.s32.totalorder %s6238_s16, %s6231_s13 }
  0x70   : > { %p6235_p12 = pneg %p6234_p8  ;;  %p6241_p9 = por %p6240_p10, %p6239_p3 }
  0x72   : > { %p6242_p6 = pnand %p6241_p9, %p6235_p12 }
  0x74   : > { %6245 = shalt.err (!%p6242_p6)
}
  0x75   : > { %s6335_s6 = smov 128   ;;  %s6336_s27 = smov 8  }
  0x76   : > { %5771 = dma.hbm_to_vmem [thread:$0]  (!%p6553_p11), %s6547_s26, 256, %s6549_s1, %s6557_s5, %s6335_s6, %s6335_s6, %s6336_s27  }
  0x77   : > { %p7047_p1 = scmp.ne.s32.totalorder %s7033_s24, 0 }
  0x78   : > { %s6581_s15 = sand.u32 (!%p7047_p1), 1, %s6314_s18   ;;  %p7048_p6 = scmp.ne.s32.totalorder (!%p7047_p1), %s7043_s28, 0 }
  0x79   : > { %411 = sbr.rel (%p7047_p1) target bundleno = 5873 (0x16f1), region = 64  ;;  %s5001_s7 = sshll.u32 (!%p7047_p1), %s6581_s15, 4 }
  0x7a   : > { %s414_s21 = scalar_lea.sflag (!%p7047_p1), [#allocation3], %s6581_s15  ;;  %s6587_s25 = scalar_lea.vmem (!%p7047_p1), [#allocation2], %s5001_s7 }
  0x7e   : > { %6289 = dma.done.wait (%p7048_p6), %s414_s21, 256  }
  0x7f   : > { %6291 = vsyncadd (%p7048_p6), %s414_s21, 4294967040  ;;  %p7049_p9 = scmp.eq.s32.totalorder %s6431_s23, 0 }
  0x81   : > { %6293 = dma.done.wait (%p7049_p9), [#allocation6], 4096   ;;  %p7050_p10 = pmov %p7049_p9 }
  0x82   : > { %p7051_p11 = pmov %p7049_p9 }
  0x83   : > { %6295 = vsyncadd (%p7050_p10), [#allocation6], 4294963200 }
  0x84   : > { %6297 = dma.done.wait (%p7051_p11), [#allocation9], 16640   ;;  %p7052_p4 = pmov %p7049_p9 }
  0x86   : > { %6299 = vsyncadd (%p7052_p4), [#allocation9], 4294950656  ;;  %p7053_p7 = pmov %p7052_p4 }
  0x87   : > { %p7054_p13 = pmov %p7052_p4 }
  0x88   : > { %6301 = dma.done.wait (%p7053_p7), [#allocation12], 16384  }
  0x89   : > { %6303 = vsyncadd (%p7054_p13), [#allocation12], 4294950912  ;;  %v6337_v0 = vmov 0   ;;  %v5844_v1 = vld [vmem:[#allocation5 + $0xac] ss:$12 sps:$4 sm:$0xff]   ;;  %v477_v17 = vld [vmem:[%s6587_s25] sm:$0xff]  ;;  %v514_v21 = vlaneseq }
  0x8a   : > { %689 = vmatprep.mubr.bf16.mxu0 %v6337_v0  ;;  %v5846_v2 = vld [vmem:[#allocation5 + $0xa8] ss:$12 sps:$4 sm:$0xff]   ;;  %657 = vmatprep.subr.bf16.mxu0 %v5844_v1  ;;  %v5849_v4 = vld [vmem:[#allocation5 + $0x90] ss:$12 sps:$4 sm:$0xff]   ;;  %v5852_v6 = vld [vmem:[#allocation5 + $0x78] ss:$12 sps:$4 sm:$0xff]  }
  0x8b   : > { %v5847_v3 = vld [vmem:[#allocation5 + $0x94] ss:$12 sps:$4 sm:$0xff]   ;;  %658 = vmatpush1.bf16.msra.mxu0 %v5846_v2  ;;  %v5850_v5 = vld [vmem:[#allocation5 + $0x7c] ss:$12 sps:$4 sm:$0xff]   ;;  %v5853_v7 = vld [vmem:[#allocation5 + $0x64] ss:$12 sps:$4 sm:$0xff]  }
  0x8c   : > { %659 = vmatprep.subr.bf16.mxu0 %v5847_v3  ;;  %v5855_v8 = vld [vmem:[#allocation5 + $0x60] ss:$12 sps:$4 sm:$0xff]   ;;  %v5858_v10 = vld [vmem:[#allocation5 + $0x48] ss:$12 sps:$4 sm:$0xff]   ;;  %v5861_v12 = vld [vmem:[#allocation5 + $0x30] ss:$12 sps:$4 sm:$0xff]  }
  0x8d   : > { %v5856_v9 = vld [vmem:[#allocation5 + $0x4c] ss:$12 sps:$4 sm:$0xff]   ;;  %v5859_v11 = vld [vmem:[#allocation5 + $0x34] ss:$12 sps:$4 sm:$0xff]   ;;  %v5862_v13 = vld [vmem:[#allocation5 + $0x1c] ss:$12 sps:$4 sm:$0xff]  }
  0x8e   : > { %v5864_v14 = vld [vmem:[#allocation5 + $0x18] ss:$12 sps:$4 sm:$0xff]   ;;  %v5867_v16 = vld [vmem:[#allocation5] ss:$12 sps:$4 sm:$0xff]   ;;  %v6338_v20 = vmov 0.0   ;;  %vm6339_vm0 = vmmov 0  }
  0x8f   : > { %660 = vmatpush1.bf16.msra.mxu0 %v5849_v4  ;;  %v5865_v15 = vld [vmem:[#allocation5 + $0x4] ss:$12 sps:$4 sm:$0xff]   ;;  %v478_v18 = vld [vmem:[%s6587_s25 + $0x8] sm:$0xff]  ;;  %5564 = vmatprep.subr.bf16.mxu1 %v6338_v20  ;;  %v6614_v22 = vshrl.u32 %v514_v21, 7  ;;  %v6622_v25 = vld [vmem:[%s7014_s2] sm:$0x7] }
  0x90   : > { %661 = vmatprep.subr.bf16.mxu0 %v5850_v5  ;;  %v479_v19 = vpack.c.bf16 %v478_v18, %v477_v17  ;;  %5580 = vmatprep.mubr.msk.bf16.mxu1 %vm6339_vm0, %v6338_v20  ;;  %vm744_vm1 = vcmask 130048   ;;  %s6340_s5 = smov 112   ;;  %v5868_v39 = vld [vmem:[#allocation5 + $0xb0] ss:$12 sps:$4 sm:$0xff]   ;;  %v5869_v40 = vld [vmem:[#allocation5 + $0x98] ss:$12 sps:$4 sm:$0xff]  }
  0x91   : > { %v6617_v23 = vsub.s32 1, %v6614_v22  ;;  %v6625_v27 = vsub.s32 0, %v6614_v22  ;;  %5565 = vmatpush3.bf16.msra.mxu1 %v5868_v39  ;;  %v5870_v41 = vld [vmem:[#allocation5 + $0x80] ss:$12 sps:$4 sm:$0xff]   ;;  %v5871_v42 = vld [vmem:[#allocation5 + $0x68] ss:$12 sps:$4 sm:$0xff]  }
  0x92   : > { %5566 = vmatprep.subr.bf16.mxu1 %v6338_v20  ;;  %v5872_v43 = vld [vmem:[#allocation5 + $0x50] ss:$12 sps:$4 sm:$0xff]   ;;  %v5873_v44 = vld [vmem:[#allocation5 + $0x38] ss:$12 sps:$4 sm:$0xff]   ;;  %v5874_v45 = vld [vmem:[#allocation5 + $0x20] ss:$12 sps:$4 sm:$0xff]  }
  0x93   : > { %662 = vmatpush1.bf16.msra.mxu0 %v5852_v6  ;;  %v521_v28 = vrot.slane %v6622_v25, %v6617_v23  ;;  %v517_v31 = vrot.slane %v6622_v25, %v6625_v27  ;;  %v5875_v46 = vld [vmem:[#allocation5 + $0x8] ss:$12 sps:$4 sm:$0xff]   ;;  %s6341_s24 = smov 96   ;;  %s6342_s28 = smov 80  }
  0x94   : > { %663 = vmatprep.subr.bf16.mxu0 %v5853_v7  ;;  %s6343_s26 = smov 64   ;;  %s6344_s13 = smov 48  }
  0x95   : > { %5567 = vmatpush3.bf16.msra.mxu1 %v5869_v40  ;;  %s6345_s14 = smov 32   ;;  %s6346_s16 = smov 16  }
  0x96   : > { %5568 = vmatprep.subr.bf16.mxu1 %v6338_v20  ;;  %s475_s6 = scalar_lea.vmem [#allocation13], %s5001_s7  ;;  %s4855_s3 = scalar_lea.sflag [#allocation4], %s6581_s15 }
  0x97   : > { %664 = vmatpush1.bf16.msra.mxu0 %v5855_v8  ;;  %s4868_s27 = sshll.u32 %s475_s6, 4  ;;  %p7055_p2 = scmp.ne.s32.totalorder %s7044_s22, 0  ;;  %s6969_s27 = int_to_ptr.vmem [resolvable:$true] %s4868_s27 }
  0x98   : > { %665 = vmatprep.subr.bf16.mxu0 %v5856_v9  ;;  %v6668_v9 = vsub.s32 2, %v6614_v22 }
  0x99   : > { %5569 = vmatpush3.bf16.msra.mxu1 %v5870_v41 }
  0x9a   : > { %5570 = vmatprep.subr.bf16.mxu1 %v6338_v20 }
  0x9b   : > { %666 = vmatpush1.bf16.msra.mxu0 %v5858_v10 }
  0x9c   : > { %667 = vmatprep.subr.bf16.mxu0 %v5859_v11  ;;  %v525_v11 = vrot.slane %v6622_v25, %v6668_v9 }
  0x9d   : > { %5571 = vmatpush3.bf16.msra.mxu1 %v5871_v42 }
  0x9e   : > { %5572 = vmatprep.subr.bf16.mxu1 %v6338_v20 }
  0x9f   : > { %668 = vmatpush1.bf16.msra.mxu0 %v5861_v12 }
  0xa0   : > { %669 = vmatprep.subr.bf16.mxu0 %v5862_v13 }
  0xa1   : > { %5573 = vmatpush3.bf16.msra.mxu1 %v5872_v43 }
  0xa2   : > { %5574 = vmatprep.subr.bf16.mxu1 %v6338_v20 }
  0xa3   : > { %670 = vmatpush1.bf16.msra.mxu0 %v5864_v14 }
  0xa4   : > { %671 = vmatprep.subr.bf16.mxu0 %v5865_v15 }
  0xa5   : > { %5575 = vmatpush3.bf16.msra.mxu1 %v5873_v44 }
  0xa6   : > { %5576 = vmatprep.subr.bf16.mxu1 %v6338_v20 }
  0xa7   : > { %672 = vmatpush1.bf16.msra.mxu0 %v5867_v16 }
  0xa8   : > { %5584 = vmatprep.subr.bf16.mxu0 %v6338_v20 }
  0xa9   : > { %5577 = vmatpush3.bf16.msra.mxu1 %v5874_v45 }
  0xaa   : > { %690 = vmatmul.mubr.bf16.vlgmr.msra.gmra.mxu0 %v479_v19  ;;  %5578 = vmatprep.subr.bf16.mxu1 %v6338_v20 }
  0xab   : > { %5586 = vmatprep.mubr.msk.bf16.mxu0 %vm6339_vm0, %v6338_v20 }
  0xad   : > { %5579 = vmatpush3.bf16.msra.mxu1 %v5875_v46 }
  0xae   : > { %5590 = vmatprep.subr.bf16.mxu1 %v6338_v20 }
  0xb0   : > { %5581 = vmatmul.mubr.bf16.vlgmr.msra.gmra.mxu1 %v479_v19 }
  0xb1   : > { %5592 = vmatprep.mubr.msk.bf16.mxu1 %vm6339_vm0, %v6338_v20 }
 0x16a   : > { %v691_v24 = vpop.f32.mrf.mxu0 }
 0x16b   : > { %v692_v36 = vadd.f32 %v691_v24, %v517_v31 }
 0x16c   : > { %v693_v26 = vpop.f32.mrf.mxu0 }
 0x16d   : > { %v694_v32 = vadd.f32 %v693_v26, %v521_v28 }
 0x16e   : > { %v695_v29 = vpop.f32.mrf.mxu0 }
 0x16f   : > { %v696_v34 = vadd.f32 %v695_v29, %v517_v31 }
 0x170   : > { %v697_v30 = vpop.f32.mrf.mxu0  ;;  %v734_v10 = vpop.f32.mrf.mxu1 }
 0x171   : > { %v698_v33 = vadd.f32 %v697_v30, %v521_v28  ;;  %v6637_v38 = vpack.c.bf16 %v696_v34, %v692_v36  ;;  %v735_v13 = vadd.f32 %v734_v10, %v525_v11 }
 0x172   : > { %v5582_v12 = vpop.f32.mrf.mxu1 }
 0x173   : > { %v6631_v35 = vpack.c.bf16 %v698_v33, %v694_v32 }
 0x174   : > { %v737_v14 = vpop.f32.mrf.mxu1 }
 0x175   : > { %868 = vrot.lane.b32.xlu0 %v6631_v35, %s6340_s5  ;;  %v749_v37 = vsel %vm744_vm1, %v6631_v35, 0  ;;  %v738_v15 = vadd.f32 %v737_v14, %v525_v11 }
 0x176   : > { %5585 = vmatpush3.bf16.xpose.msra.mxu0 %v749_v37  ;;  %v5583_v16 = vpop.f32.mrf.mxu1 }
 0x177   : > { %5596 = vmatprep.subr.bf16.mxu0 %v6338_v20  ;;  %v6672_v18 = vpack.c.bf16 %v738_v15, %v735_v13 }
 0x179   : > { %865 = vrot.lane.b32.xlu0 %v6637_v38, %s6340_s5  ;;  %5591 = vmatpush3.bf16.msra.mxu1 %v6672_v18 }
 0x17a   : > { %5602 = vmatprep.subr.bf16.mxu1 %v6338_v20 }
 0x17d   : > { %5587 = vmatmul.mubr.msk.bf16.vlgmr.msra.gmra.mxu0 %vm744_vm1, %v6637_v38 }
 0x17e   : > { %5598 = vmatprep.mubr.msk.bf16.mxu0 %vm6339_vm0, %v6338_v20 }
 0x1e7   : > { %v869_v47 = vpop.permute.xlu0 %868 }
 0x1e8   : > { %v874_v48 = vsel %vm744_vm1, %v869_v47, 0 }
 0x1e9   : > { %5597 = vmatpush3.bf16.xpose.msra.mxu0 %v874_v48 }
 0x1ea   : > { %5608 = vmatprep.subr.bf16.mxu0 %v6338_v20 }
 0x1eb   : > { %v866_v49 = vpop.permute.xlu0 %865 }
 0x1f0   : > { %5599 = vmatmul.mubr.msk.bf16.vlgmr.msra.gmra.mxu0 %vm744_vm1, %v866_v49 }
 0x1f1   : > { %5610 = vmatprep.mubr.msk.bf16.mxu0 %vm6339_vm0, %v6338_v20 }
 0x23d   : > { %v785_v50 = vpop.f32.mrf.mxu0 }
 0x23e   : > { %v792_v51 = vmul.f32 0.25, %v785_v50 }
 0x23f   : > { %v5588_v52 = vpop.f32.mrf.mxu0 }
 0x240   : > { %v794_v53 = vsel %vm744_vm1, %v792_v51, -inf  ;;  %v5876_v52 = vld [vmem:[#allocation7] sm:$0xff]  }
 0x241   : > { %795 = vmax.xlane.f32.xlu1 %v794_v53  ;;  %v788_v54 = vpop.f32.mrf.mxu0 }
 0x242   : > { %v793_v55 = vmul.f32 0.25, %v788_v54  ;;  %v5877_v54 = vld [vmem:[#allocation7 + $0x8] sm:$0xff]  }
 0x243   : > { %v5589_v56 = vpop.f32.mrf.mxu0  ;;  %5609 = vmatpush3.bf16.msra.mxu0 %v5877_v54 }
 0x244   : > { %v797_v57 = vsel %vm744_vm1, %v793_v55, -inf  ;;  %5620 = vmatprep.subr.bf16.mxu0 %v6338_v20 }
 0x245   : > { %798 = vmax.xlane.f32.xlu1 %v797_v57 }
 0x2b0   : > { %v910_v58 = vpop.f32.mrf.mxu0 }
 0x2b1   : > { %v917_v59 = vmul.f32 0.25, %v910_v58 }
 0x2b2   : > { %v5600_v60 = vpop.f32.mrf.mxu0 }
 0x2b3   : > { %v919_v61 = vsel %vm744_vm1, %v917_v59, -inf }
 0x2b4   : > { %920 = vmax.xlane.f32.xlu0 %v919_v61  ;;  %v913_v62 = vpop.f32.mrf.mxu0 }
 0x2b5   : > { %v918_v63 = vmul.f32 0.25, %v913_v62 }
 0x2b6   : > { %v5601_v1 = vpop.f32.mrf.mxu0 }
 0x2b7   : > { %v922_v2 = vsel %vm744_vm1, %v918_v63, -inf }
 0x2b8   : > { %923 = vmax.xlane.f32.xlu1 %v922_v2 }
 0x2ca   : > { %v796_v3 = vpop.xlane.xlu1 %795  ;;  %1096 = vrot.lane.b32.xlu0 %v6631_v35, %s6341_s24 }
 0x2cb   : > { %v800_v4 = vsub.f32 %v792_v51, %v796_v3 }
 0x2cd   : > { %v802_v5 = vmul.f32 1.442695, %v800_v4 }
 0x2ce   : > { %v799_v6 = vpop.xlane.xlu1 %798 }
 0x2cf   : > { %6012 = vpow2.f32 %v802_v5  ;;  %v801_v7 = vsub.f32 %v793_v55, %v799_v6 }
 0x2d1   : > { %v804_v8 = vmul.f32 1.442695, %v801_v7 }
 0x2d3   : > { %6014 = vpow2.f32 %v804_v8 }
 0x2dc   : > { %v6013_v17 = vpop.eup %6012 }
 0x2dd   : > { %v806_v19 = vsel %vm744_vm1, %v6013_v17, 0.0 }
 0x2de   : > { %807 = vadd.xlane.f32.xlu1 %v806_v19 }
 0x2e0   : > { %v6015_v21 = vpop.eup %6014 }
 0x2e1   : > { %v809_v24 = vsel %vm744_vm1, %v6015_v21, 0.0 }
 0x2e2   : > { %810 = vadd.xlane.f32.xlu1 %v809_v24 }
 0x33d   : > { %v921_v25 = vpop.xlane.xlu0 %920 }
 0x33e   : > { %v925_v26 = vsub.f32 %v917_v59, %v921_v25 }
 0x340   : > { %v927_v28 = vmul.f32 1.442695, %v925_v26 }
 0x341   : > { %v924_v29 = vpop.xlane.xlu1 %923  ;;  %v1097_v62 = vpop.permute.xlu0 %1096 }
 0x342   : > { %6016 = vpow2.f32 %v927_v28  ;;  %v926_v30 = vsub.f32 %v918_v63, %v924_v29  ;;  %v1102_v3 = vsel %vm744_vm1, %v1097_v62, 0 }
 0x344   : > { %v929_v31 = vmul.f32 1.442695, %v926_v30 }
 0x346   : > { %6018 = vpow2.f32 %v929_v31 }
 0x34f   : > { %v6017_v32 = vpop.eup %6016 }
 0x350   : > { %v931_v33 = vsel %vm744_vm1, %v6017_v32, 0.0 }
 0x351   : > { %932 = vadd.xlane.f32.xlu1 %v931_v33 }
 0x353   : > { %v6019_v34 = vpop.eup %6018 }
 0x354   : > { %v934_v36 = vsel %vm744_vm1, %v6019_v34, 0.0 }
 0x355   : > { %935 = vadd.xlane.f32.xlu1 %v934_v36 }
 0x366   : > { %943 = vrot.lane.b32.xlu1 %v6672_v18, %s6340_s5  ;;  %s6246_s5 = scalar_lea.vmem %s6969_s27, 256 }
 0x367   : > { %v808_v37 = vpop.xlane.xlu1 %807  ;;  %p6247_p0 = scmp.ne.s32.totalorder %s6969_s27, %s6246_s5 }
 0x368   : > { %6020 = vrcp.f32 %v808_v37 }
 0x369   : > { %p6248_p5 = pnand %p6247_p0, %p7055_p2 }
 0x36a   : > { %1094 = vrot.lane.b32.xlu1 %v6637_v38, %s6341_s24 }
 0x36b   : > { %v811_v39 = vpop.xlane.xlu1 %810  ;;  %p6249_p8 = pneg %p6248_p5 }
 0x36c   : > { %6022 = vrcp.f32 %v811_v39 }
 0x375   : > { %v6021_v40 = vpop.eup %6020 }
 0x376   : > { %v814_v42 = vmul.f32 %v6021_v40, %v6013_v17 }
 0x379   : > { %v6023_v41 = vpop.eup %6022 }
 0x37a   : > { %v815_v43 = vmul.f32 %v6023_v41, %v6015_v21 }
 0x37c   : > { %v816_v44 = vpack.c.bf16 %v815_v43, %v814_v42 }
 0x37e   : > { %5593 = vmatmul.mubr.msk.bf16.vlgmr.msra.gmra.mxu1 %vm744_vm1, %v816_v44 }
 0x37f   : > { %5604 = vmatprep.mubr.msk.bf16.mxu1 %vm6339_vm0, %v6338_v20 }
 0x3da   : > { %v933_v45 = vpop.xlane.xlu1 %932 }
 0x3db   : > { %6024 = vrcp.f32 %v933_v45 }
 0x3de   : > { %v936_v46 = vpop.xlane.xlu1 %935 }
 0x3df   : > { %6026 = vrcp.f32 %v936_v46 }
 0x3e2   : > { %v944_v47 = vpop.permute.xlu1 %943 }
 0x3e3   : > { %5603 = vmatpush3.bf16.msra.mxu1 %v944_v47 }
 0x3e4   : > { %5614 = vmatprep.subr.bf16.mxu1 %v6338_v20 }
 0x3e6   : > { %v1095_v4 = vpop.permute.xlu1 %1094 }
 0x3e8   : > { %v6025_v48 = vpop.eup %6024 }
 0x3e9   : > { %v939_v50 = vmul.f32 %v6025_v48, %v6017_v32 }
 0x3ec   : > { %v6027_v49 = vpop.eup %6026 }
 0x3ed   : > { %v940_v51 = vmul.f32 %v6027_v49, %v6019_v34 }
 0x3ef   : > { %v941_v53 = vpack.c.bf16 %v940_v51, %v939_v50  ;;  %v5878_v50 = vld [vmem:[#allocation7 + $0x10] sm:$0xff]  }
 0x3f1   : > { %5605 = vmatmul.mubr.msk.bf16.vlgmr.msra.gmra.mxu1 %vm744_vm1, %v941_v53 }
 0x3f2   : > { %5615 = vmatpush3.bf16.msra.mxu1 %v5876_v52  ;;  %5616 = vmatprep.mubr.msk.bf16.mxu1 %vm6339_vm0, %v6338_v20 }
 0x3f3   : > { %5626 = vmatprep.subr.bf16.mxu1 %v6338_v20 }
 0x43e   : > { %v854_v55 = vpop.f32.mrf.mxu1 }
 0x440   : > { %v5594_v56 = vpop.f32.mrf.mxu1 }
 0x442   : > { %v857_v57 = vpop.f32.mrf.mxu1 }
 0x443   : > { %v861_v58 = vpack.c.bf16 %v857_v57, %v854_v55 }
 0x444   : > { %v5595_v59 = vpop.f32.mrf.mxu1 }
 0x445   : > { %5617 = vmatmul.mubr.msk.bf16.vlgmr.msra.gmra.mxu1 %vm744_vm1, %v861_v58 }
 0x446   : > { %5628 = vmatprep.mubr.msk.bf16.mxu1 %vm6339_vm0, %v6338_v20 }
 0x4b1   : > { %v983_v60 = vpop.f32.mrf.mxu1 }
 0x4b3   : > { %v5606_v61 = vpop.f32.mrf.mxu1 }
 0x4b5   : > { %v986_v63 = vpop.f32.mrf.mxu1 }
 0x4b6   : > { %v990_v1 = vpack.c.bf16 %v986_v63, %v983_v60 }
 0x4b7   : > { %v5607_v2 = vpop.f32.mrf.mxu1 }
 0x4b8   : > { %5611 = vmatmul.mubr.msk.bf16.vlgmr.msra.gmra.mxu0 %vm744_vm1, %v990_v1 }
 0x4b9   : > { %5621 = vmatpush3.bf16.xpose.msra.mxu0 %v1102_v3  ;;  %5622 = vmatprep.mubr.msk.bf16.mxu0 %vm6339_vm0, %v6338_v20 }
 0x4ba   : > { %5632 = vmatprep.subr.bf16.mxu0 %v6338_v20 }
 0x4c0   : > { %5623 = vmatmul.mubr.msk.bf16.vlgmr.msra.gmra.mxu0 %vm744_vm1, %v1095_v4 }
 0x4c1   : > { %5634 = vmatprep.mubr.msk.bf16.mxu0 %vm6339_vm0, %v6338_v20  ;;  %5633 = vmatpush3.bf16.msra.mxu0 %v5878_v50 }
 0x4c2   : > { %5644 = vmatprep.subr.bf16.mxu0 %v6338_v20 }
 0x505   : > { %v6704_v5 = vpop.f32.mrf.mxu1 }
 0x507   : > { %v5618_v6 = vpop.f32.mrf.mxu1 }
 0x509   : > { %v6706_v7 = vpop.f32.mrf.mxu1 }
 0x50b   : > { %v5619_v8 = vpop.f32.mrf.mxu1 }
 0x578   : > { %v6708_v10 = vpop.f32.mrf.mxu0 }
 0x57a   : > { %v5612_v11 = vpop.f32.mrf.mxu0 }
 0x57c   : > { %v6710_v12 = vpop.f32.mrf.mxu0 }
 0x57e   : > { %v5613_v13 = vpop.f32.mrf.mxu0 }
 0x580   : > { %v1138_v14 = vpop.f32.mrf.mxu0 }
 0x581   : > { %v1145_v15 = vmul.f32 0.25, %v1138_v14 }
 0x582   : > { %v5624_v16 = vpop.f32.mrf.mxu0 }
 0x583   : > { %v1147_v17 = vsel %vm744_vm1, %v1145_v15, -inf }
 0x584   : > { %1148 = vmax.xlane.f32.xlu1 %v1147_v17  ;;  %v1141_v19 = vpop.f32.mrf.mxu0  ;;  %v1088_v17 = vadd.f32 %v6704_v5, %v6708_v10 }
 0x585   : > { %v1146_v21 = vmul.f32 0.25, %v1141_v19 }
 0x586   : > { %v5625_v24 = vpop.f32.mrf.mxu0 }
 0x587   : > { %v1150_v25 = vsel %vm744_vm1, %v1146_v21, -inf }
 0x588   : > { %1151 = vmax.xlane.f32.xlu0 %v1150_v25  ;;  %v1091_v25 = vadd.f32 %v6706_v7, %v6710_v12  ;;  %v5879_v12 = vld [vmem:[#allocation7 + $0x18] sm:$0xff]  }
 0x59e   : > { %1170 = vrot.lane.b32.xlu0 %v6672_v18, %s6341_s24 }
 0x60d   : > { %v1149_v26 = vpop.xlane.xlu1 %1148 }
 0x60e   : > { %v1153_v28 = vsub.f32 %v1145_v15, %v1149_v26 }
 0x610   : > { %v1155_v29 = vmul.f32 1.442695, %v1153_v28 }
 0x611   : > { %v1152_v30 = vpop.xlane.xlu0 %1151 }
 0x612   : > { %6028 = vpow2.f32 %v1155_v29  ;;  %v1154_v31 = vsub.f32 %v1146_v21, %v1152_v30 }
 0x614   : > { %v1157_v32 = vmul.f32 1.442695, %v1154_v31 }
 0x615   : > { %v1171_v33 = vpop.permute.xlu0 %1170 }
 0x616   : > { %6030 = vpow2.f32 %v1157_v32  ;;  %5627 = vmatpush3.bf16.msra.mxu1 %v1171_v33 }
 0x617   : > { %5638 = vmatprep.subr.bf16.mxu1 %v6338_v20 }
 0x61f   : > { %v6029_v34 = vpop.eup %6028 }
 0x620   : > { %v1159_v36 = vsel %vm744_vm1, %v6029_v34, 0.0 }
 0x621   : > { %1160 = vadd.xlane.f32.xlu1 %v1159_v36 }
 0x623   : > { %v6031_v37 = vpop.eup %6030 }
 0x624   : > { %v1162_v39 = vsel %vm744_vm1, %v6031_v37, 0.0 }
 0x625   : > { %1163 = vadd.xlane.f32.xlu1 %v1162_v39 }
 0x636   : > { %1275 = vrot.lane.b32.xlu1 %v6631_v35, %s6342_s28 }
 0x63a   : > { %1273 = vrot.lane.b32.xlu1 %v6637_v38, %s6342_s28 }
 0x6aa   : > { %v1161_v40 = vpop.xlane.xlu1 %1160 }
 0x6ab   : > { %6032 = vrcp.f32 %v1161_v40 }
 0x6ae   : > { %v1164_v41 = vpop.xlane.xlu1 %1163 }
 0x6af   : > { %6034 = vrcp.f32 %v1164_v41 }
 0x6b2   : > { %v1276_v46 = vpop.permute.xlu1 %1275 }
 0x6b3   : > { %v1281_v48 = vsel %vm744_vm1, %v1276_v46, 0 }
 0x6b6   : > { %v1274_v49 = vpop.permute.xlu1 %1273 }
 0x6b8   : > { %v6033_v42 = vpop.eup %6032 }
 0x6b9   : > { %v1167_v44 = vmul.f32 %v6033_v42, %v6029_v34 }
 0x6bc   : > { %v6035_v43 = vpop.eup %6034 }
 0x6bd   : > { %v1168_v45 = vmul.f32 %v6035_v43, %v6031_v37 }
 0x6bf   : > { %v1169_v47 = vpack.c.bf16 %v1168_v45, %v1167_v44 }
 0x6c1   : > { %5629 = vmatmul.mubr.msk.bf16.vlgmr.msra.gmra.mxu1 %vm744_vm1, %v1169_v47 }
 0x6c2   : > { %5639 = vmatpush3.bf16.xpose.msra.mxu1 %v1281_v48  ;;  %5640 = vmatprep.mubr.msk.bf16.mxu1 %vm6339_vm0, %v6338_v20 }
 0x6c3   : > { %5650 = vmatprep.subr.bf16.mxu1 %v6338_v20 }
 0x6c9   : > { %5641 = vmatmul.mubr.msk.bf16.vlgmr.msra.gmra.mxu1 %vm744_vm1, %v1274_v49 }
 0x6ca   : > { %5652 = vmatprep.mubr.msk.bf16.mxu1 %vm6339_vm0, %v6338_v20  ;;  %5651 = vmatpush3.bf16.msra.mxu1 %v5879_v12 }
 0x6cb   : > { %5662 = vmatprep.subr.bf16.mxu1 %v6338_v20 }
 0x781   : > { %v1210_v51 = vpop.f32.mrf.mxu1 }
 0x783   : > { %v5630_v52 = vpop.f32.mrf.mxu1 }
 0x785   : > { %v1213_v53 = vpop.f32.mrf.mxu1 }
 0x786   : > { %v1217_v54 = vpack.c.bf16 %v1213_v53, %v1210_v51 }
 0x787   : > { %v5631_v55 = vpop.f32.mrf.mxu1 }
 0x788   : > { %5635 = vmatmul.mubr.msk.bf16.vlgmr.msra.gmra.mxu0 %vm744_vm1, %v1217_v54 }
 0x789   : > { %v1317_v56 = vpop.f32.mrf.mxu1  ;;  %5646 = vmatprep.mubr.msk.bf16.mxu0 %vm6339_vm0, %v6338_v20 }
 0x78a   : > { %v1324_v57 = vmul.f32 0.25, %v1317_v56 }
 0x78b   : > { %v5642_v58 = vpop.f32.mrf.mxu1 }
 0x78c   : > { %v1326_v59 = vsel %vm744_vm1, %v1324_v57, -inf }
 0x78d   : > { %1327 = vmax.xlane.f32.xlu0 %v1326_v59  ;;  %v1320_v60 = vpop.f32.mrf.mxu1 }
 0x78e   : > { %v1325_v61 = vmul.f32 0.25, %v1320_v60 }
 0x78f   : > { %v5643_v62 = vpop.f32.mrf.mxu1 }
 0x790   : > { %v1329_v63 = vsel %vm744_vm1, %v1325_v61, -inf }
 0x791   : > { %1330 = vmax.xlane.f32.xlu1 %v1329_v63 }
 0x7a2   : > { %1349 = vrot.lane.b32.xlu1 %v6672_v18, %s6342_s28 }
 0x7a6   : > { %1452 = vrot.lane.b32.xlu1 %v6637_v38, %s6343_s26 }
 0x816   : > { %v1328_v1 = vpop.xlane.xlu0 %1327 }
 0x817   : > { %v1332_v2 = vsub.f32 %v1324_v57, %v1328_v1 }
 0x819   : > { %v1334_v3 = vmul.f32 1.442695, %v1332_v2 }
 0x81a   : > { %v1331_v4 = vpop.xlane.xlu1 %1330 }
 0x81b   : > { %6036 = vpow2.f32 %v1334_v3  ;;  %v1333_v6 = vsub.f32 %v1325_v61, %v1331_v4 }
 0x81d   : > { %v1336_v8 = vmul.f32 1.442695, %v1333_v6 }
 0x81e   : > { %v1350_v11 = vpop.permute.xlu1 %1349 }
 0x81f   : > { %6038 = vpow2.f32 %v1336_v8  ;;  %5645 = vmatpush3.bf16.msra.mxu0 %v1350_v11 }
 0x820   : > { %5656 = vmatprep.subr.bf16.mxu0 %v6338_v20 }
 0x822   : > { %v1453_v7 = vpop.permute.xlu1 %1452 }
 0x828   : > { %v6037_v13 = vpop.eup %6036 }
 0x829   : > { %v1338_v14 = vsel %vm744_vm1, %v6037_v13, 0.0 }
 0x82a   : > { %1339 = vadd.xlane.f32.xlu0 %v1338_v14 }
 0x82c   : > { %v6039_v15 = vpop.eup %6038 }
 0x82d   : > { %v1341_v16 = vsel %vm744_vm1, %v6039_v15, 0.0 }
 0x82e   : > { %1342 = vadd.xlane.f32.xlu0 %v1341_v16 }
 0x844   : > { %1454 = vrot.lane.b32.xlu0 %v6631_v35, %s6343_s26 }
 0x848   : > { %v1264_v19 = vpop.f32.mrf.mxu0 }
 0x849   : > { %v6748_v21 = vadd.f32 %v1264_v19, %v1088_v17 }
 0x84a   : > { %v5636_v24 = vpop.f32.mrf.mxu0 }
 0x84c   : > { %v1267_v26 = vpop.f32.mrf.mxu0 }
 0x84d   : > { %v1272_v28 = vadd.f32 %v1267_v26, %v1091_v25  ;;  %v5880_v25 = vld [vmem:[#allocation7 + $0x20] sm:$0xff]  }
 0x84e   : > { %v5637_v29 = vpop.f32.mrf.mxu0 }
 0x8b3   : > { %v1340_v30 = vpop.xlane.xlu0 %1339 }
 0x8b4   : > { %6040 = vrcp.f32 %v1340_v30 }
 0x8b7   : > { %v1343_v31 = vpop.xlane.xlu0 %1342 }
 0x8b8   : > { %6042 = vrcp.f32 %v1343_v31 }
 0x8bb   : > { %v1455_v37 = vpop.permute.xlu0 %1454 }
 0x8bc   : > { %v1460_v10 = vsel %vm744_vm1, %v1455_v37, 0 }
 0x8c1   : > { %v6041_v32 = vpop.eup %6040 }
 0x8c2   : > { %v1346_v34 = vmul.f32 %v6041_v32, %v6037_v13 }
 0x8c5   : > { %v6043_v33 = vpop.eup %6042 }
 0x8c6   : > { %v1347_v36 = vmul.f32 %v6043_v33, %v6039_v15 }
 0x8c8   : > { %v1348_v5 = vpack.c.bf16 %v1347_v36, %v1346_v34 }
 0x8ca   : > { %5647 = vmatmul.mubr.msk.bf16.vlgmr.msra.gmra.mxu0 %vm744_vm1, %v1348_v5 }
 0x8cb   : > { %5657 = vmatpush3.bf16.xpose.msra.mxu0 %v1460_v10  ;;  %5658 = vmatprep.mubr.msk.bf16.mxu0 %vm6339_vm0, %v6338_v20 }
 0x8cc   : > { %5668 = vmatprep.subr.bf16.mxu0 %v6338_v20 }
 0x8d2   : > { %5659 = vmatmul.mubr.msk.bf16.vlgmr.msra.gmra.mxu0 %vm744_vm1, %v1453_v7 }
 0x8d3   : > { %5670 = vmatprep.mubr.msk.bf16.mxu0 %vm6339_vm0, %v6338_v20  ;;  %5669 = vmatpush3.bf16.msra.mxu0 %v5880_v25 }
 0x8d4   : > { %5680 = vmatprep.subr.bf16.mxu0 %v6338_v20 }
 0x98a   : > { %v1389_v39 = vpop.f32.mrf.mxu0 }
 0x98c   : > { %v5648_v40 = vpop.f32.mrf.mxu0 }
 0x98e   : > { %v1392_v41 = vpop.f32.mrf.mxu0 }
 0x98f   : > { %v1396_v42 = vpack.c.bf16 %v1392_v41, %v1389_v39 }
 0x990   : > { %v5649_v43 = vpop.f32.mrf.mxu0 }
 0x991   : > { %5653 = vmatmul.mubr.msk.bf16.vlgmr.msra.gmra.mxu1 %vm744_vm1, %v1396_v42 }
 0x992   : > { %v1496_v44 = vpop.f32.mrf.mxu0  ;;  %5664 = vmatprep.mubr.msk.bf16.mxu1 %vm6339_vm0, %v6338_v20 }
 0x993   : > { %v1503_v45 = vmul.f32 0.25, %v1496_v44 }
 0x994   : > { %v5660_v46 = vpop.f32.mrf.mxu0 }
 0x995   : > { %v1505_v47 = vsel %vm744_vm1, %v1503_v45, -inf }
 0x996   : > { %1506 = vmax.xlane.f32.xlu1 %v1505_v47  ;;  %v1499_v48 = vpop.f32.mrf.mxu0 }
 0x997   : > { %v1504_v49 = vmul.f32 0.25, %v1499_v48 }
 0x998   : > { %v5661_v50 = vpop.f32.mrf.mxu0 }
 0x999   : > { %v1508_v51 = vsel %vm744_vm1, %v1504_v49, -inf }
 0x99a   : > { %1509 = vmax.xlane.f32.xlu0 %v1508_v51 }
 0xa1f   : > { %v1507_v52 = vpop.xlane.xlu1 %1506 }
 0xa20   : > { %v1511_v53 = vsub.f32 %v1503_v45, %v1507_v52 }
 0xa22   : > { %v1513_v54 = vmul.f32 1.442695, %v1511_v53 }
 0xa23   : > { %v1510_v55 = vpop.xlane.xlu0 %1509 }
 0xa24   : > { %6044 = vpow2.f32 %v1513_v54  ;;  %v1512_v56 = vsub.f32 %v1504_v49, %v1510_v55 }
 0xa26   : > { %v1515_v57 = vmul.f32 1.442695, %v1512_v56 }
 0xa28   : > { %6046 = vpow2.f32 %v1515_v57 }
 0xa31   : > { %v6045_v58 = vpop.eup %6044 }
 0xa32   : > { %v1517_v59 = vsel %vm744_vm1, %v6045_v58, 0.0 }
 0xa33   : > { %1518 = vadd.xlane.f32.xlu0 %v1517_v59 }
 0xa35   : > { %v6047_v60 = vpop.eup %6046 }
 0xa36   : > { %v1520_v61 = vsel %vm744_vm1, %v6047_v60, 0.0 }
 0xa37   : > { %1521 = vadd.xlane.f32.xlu1 %v1520_v61 }
 0xa48   : > { %1633 = vrot.lane.b32.xlu1 %v6631_v35, %s6344_s13 }
 0xa49   : > { %1528 = vrot.lane.b32.xlu0 %v6672_v18, %s6343_s26 }
 0xa4c   : > { %1631 = vrot.lane.b32.xlu1 %v6637_v38, %s6344_s13 }
 0xa51   : > { %v1443_v62 = vpop.f32.mrf.mxu1 }
 0xa52   : > { %v6775_v63 = vadd.f32 %v1443_v62, %v6748_v21 }
 0xa53   : > { %v5654_v1 = vpop.f32.mrf.mxu1 }
 0xa55   : > { %v1446_v2 = vpop.f32.mrf.mxu1 }
 0xa56   : > { %v6777_v3 = vadd.f32 %v1446_v2, %v1272_v28  ;;  %v5881_v2 = vld [vmem:[#allocation7 + $0x28] sm:$0xff]  }
 0xa57   : > { %v5655_v4 = vpop.f32.mrf.mxu1 }
 0xabc   : > { %v1519_v6 = vpop.xlane.xlu0 %1518 }
 0xabd   : > { %6048 = vrcp.f32 %v1519_v6 }
 0xac0   : > { %v1522_v8 = vpop.xlane.xlu1 %1521  ;;  %v1529_v11 = vpop.permute.xlu0 %1528 }
 0xac1   : > { %6050 = vrcp.f32 %v1522_v8  ;;  %5663 = vmatpush3.bf16.msra.mxu1 %v1529_v11 }
 0xac2   : > { %5674 = vmatprep.subr.bf16.mxu1 %v6338_v20 }
 0xac4   : > { %v1634_v17 = vpop.permute.xlu1 %1633 }
 0xac5   : > { %v1639_v21 = vsel %vm744_vm1, %v1634_v17, 0 }
 0xac8   : > { %v1632_v24 = vpop.permute.xlu1 %1631 }
 0xaca   : > { %v6049_v13 = vpop.eup %6048 }
 0xacb   : > { %v1525_v15 = vmul.f32 %v6049_v13, %v6045_v58 }
 0xace   : > { %v6051_v14 = vpop.eup %6050 }
 0xacf   : > { %v1526_v16 = vmul.f32 %v6051_v14, %v6047_v60 }
 0xad1   : > { %v1527_v19 = vpack.c.bf16 %v1526_v16, %v1525_v15 }
 0xad3   : > { %5665 = vmatmul.mubr.msk.bf16.vlgmr.msra.gmra.mxu1 %vm744_vm1, %v1527_v19 }
 0xad4   : > { %5675 = vmatpush3.bf16.xpose.msra.mxu1 %v1639_v21  ;;  %5676 = vmatprep.mubr.msk.bf16.mxu1 %vm6339_vm0, %v6338_v20 }
 0xad5   : > { %5686 = vmatprep.subr.bf16.mxu1 %v6338_v20 }
 0xadb   : > { %5677 = vmatmul.mubr.msk.bf16.vlgmr.msra.gmra.mxu1 %vm744_vm1, %v1632_v24 }
 0xadc   : > { %5688 = vmatprep.mubr.msk.bf16.mxu1 %vm6339_vm0, %v6338_v20  ;;  %5687 = vmatpush3.bf16.msra.mxu1 %v5881_v2 }
 0xadd   : > { %5698 = vmatprep.subr.bf16.mxu1 %v6338_v20 }
 0xb93   : > { %v1568_v26 = vpop.f32.mrf.mxu1 }
 0xb95   : > { %v5666_v28 = vpop.f32.mrf.mxu1 }
 0xb97   : > { %v1571_v29 = vpop.f32.mrf.mxu1 }
 0xb98   : > { %v1575_v30 = vpack.c.bf16 %v1571_v29, %v1568_v26 }
 0xb99   : > { %v5667_v31 = vpop.f32.mrf.mxu1 }
 0xb9a   : > { %5671 = vmatmul.mubr.msk.bf16.vlgmr.msra.gmra.mxu0 %vm744_vm1, %v1575_v30 }
 0xb9b   : > { %v1675_v32 = vpop.f32.mrf.mxu1  ;;  %5682 = vmatprep.mubr.msk.bf16.mxu0 %vm6339_vm0, %v6338_v20 }
 0xb9c   : > { %v1682_v33 = vmul.f32 0.25, %v1675_v32 }
 0xb9d   : > { %v5678_v34 = vpop.f32.mrf.mxu1 }
 0xb9e   : > { %v1684_v36 = vsel %vm744_vm1, %v1682_v33, -inf }
 0xb9f   : > { %1685 = vmax.xlane.f32.xlu0 %v1684_v36  ;;  %v1678_v37 = vpop.f32.mrf.mxu1 }
 0xba0   : > { %v1683_v5 = vmul.f32 0.25, %v1678_v37 }
 0xba1   : > { %v5679_v10 = vpop.f32.mrf.mxu1 }
 0xba2   : > { %v1687_v7 = vsel %vm744_vm1, %v1683_v5, -inf }
 0xba3   : > { %1688 = vmax.xlane.f32.xlu1 %v1687_v7 }
 0xbb4   : > { %1707 = vrot.lane.b32.xlu1 %v6672_v18, %s6344_s13 }
 0xbb8   : > { %1810 = vrot.lane.b32.xlu1 %v6637_v38, %s6345_s14 }
 0xc28   : > { %v1686_v12 = vpop.xlane.xlu0 %1685 }
 0xc29   : > { %v1690_v39 = vsub.f32 %v1682_v33, %v1686_v12 }
 0xc2b   : > { %v1692_v40 = vmul.f32 1.442695, %v1690_v39 }
 0xc2c   : > { %v1689_v41 = vpop.xlane.xlu1 %1688 }
 0xc2d   : > { %6052 = vpow2.f32 %v1692_v40  ;;  %v1691_v42 = vsub.f32 %v1683_v5, %v1689_v41 }
 0xc2f   : > { %v1694_v43 = vmul.f32 1.442695, %v1691_v42 }
 0xc30   : > { %v1708_v44 = vpop.permute.xlu1 %1707 }
 0xc31   : > { %6054 = vpow2.f32 %v1694_v43  ;;  %5681 = vmatpush3.bf16.msra.mxu0 %v1708_v44 }
 0xc32   : > { %5692 = vmatprep.subr.bf16.mxu0 %v6338_v20 }
 0xc3a   : > { %v6053_v45 = vpop.eup %6052 }
 0xc3b   : > { %v1696_v46 = vsel %vm744_vm1, %v6053_v45, 0.0 }
 0xc3c   : > { %1697 = vadd.xlane.f32.xlu0 %v1696_v46 }
 0xc3e   : > { %v6055_v47 = vpop.eup %6054 }
 0xc3f   : > { %v1699_v48 = vsel %vm744_vm1, %v6055_v47, 0.0 }
 0xc40   : > { %1700 = vadd.xlane.f32.xlu0 %v1699_v48 }
 0xc56   : > { %1812 = vrot.lane.b32.xlu0 %v6631_v35, %s6345_s14 }
 0xc5a   : > { %v1622_v49 = vpop.f32.mrf.mxu0 }
 0xc5b   : > { %v1629_v50 = vadd.f32 %v1622_v49, %v6775_v63  ;;  %v1811_v63 = vpop.permute.xlu1 %1810  ;;  %v5882_v49 = vld [vmem:[#allocation7 + $0x30] sm:$0xff]  }
 0xc5c   : > { %v5672_v51 = vpop.f32.mrf.mxu0 }
 0xc5e   : > { %v1625_v52 = vpop.f32.mrf.mxu0 }
 0xc5f   : > { %v1630_v53 = vadd.f32 %v1625_v52, %v6777_v3 }
 0xc60   : > { %v5673_v54 = vpop.f32.mrf.mxu0 }
 0xcc5   : > { %v1698_v55 = vpop.xlane.xlu0 %1697 }
 0xcc6   : > { %6056 = vrcp.f32 %v1698_v55 }
 0xcc9   : > { %v1701_v56 = vpop.xlane.xlu0 %1700 }
 0xcca   : > { %6058 = vrcp.f32 %v1701_v56 }
 0xccd   : > { %v1813_v61 = vpop.permute.xlu0 %1812 }
 0xcce   : > { %v1818_v1 = vsel %vm744_vm1, %v1813_v61, 0 }
 0xcd3   : > { %v6057_v57 = vpop.eup %6056 }
 0xcd4   : > { %v1704_v59 = vmul.f32 %v6057_v57, %v6053_v45 }
 0xcd7   : > { %v6059_v58 = vpop.eup %6058 }
 0xcd8   : > { %v1705_v60 = vmul.f32 %v6059_v58, %v6055_v47 }
 0xcda   : > { %v1706_v62 = vpack.c.bf16 %v1705_v60, %v1704_v59 }
 0xcdc   : > { %5683 = vmatmul.mubr.msk.bf16.vlgmr.msra.gmra.mxu0 %vm744_vm1, %v1706_v62 }
 0xcdd   : > { %5693 = vmatpush3.bf16.xpose.msra.mxu0 %v1818_v1  ;;  %5694 = vmatprep.mubr.msk.bf16.mxu0 %vm6339_vm0, %v6338_v20 }
 0xcde   : > { %5704 = vmatprep.subr.bf16.mxu0 %v6338_v20 }
 0xce4   : > { %5695 = vmatmul.mubr.msk.bf16.vlgmr.msra.gmra.mxu0 %vm744_vm1, %v1811_v63 }
 0xce5   : > { %5706 = vmatprep.mubr.msk.bf16.mxu0 %vm6339_vm0, %v6338_v20  ;;  %5705 = vmatpush3.bf16.msra.mxu0 %v5882_v49  ;;  %v2334_v49 = vld [vmem:[#allocation8 + $0x388] sm:$0xff] }
 0xce6   : > { %5716 = vmatprep.subr.bf16.mxu0 %v6338_v20 }
 0xd9c   : > { %v1747_v3 = vpop.f32.mrf.mxu0 }
 0xd9e   : > { %v5684_v4 = vpop.f32.mrf.mxu0 }
 0xda0   : > { %v1750_v6 = vpop.f32.mrf.mxu0 }
 0xda1   : > { %v1754_v8 = vpack.c.bf16 %v1750_v6, %v1747_v3 }
 0xda2   : > { %v5685_v11 = vpop.f32.mrf.mxu0 }
 0xda3   : > { %5689 = vmatmul.mubr.msk.bf16.vlgmr.msra.gmra.mxu1 %vm744_vm1, %v1754_v8 }
 0xda4   : > { %v1854_v13 = vpop.f32.mrf.mxu0  ;;  %5700 = vmatprep.mubr.msk.bf16.mxu1 %vm6339_vm0, %v6338_v20 }
 0xda5   : > { %v1861_v14 = vmul.f32 0.25, %v1854_v13 }
 0xda6   : > { %v5696_v15 = vpop.f32.mrf.mxu0 }
 0xda7   : > { %v1863_v16 = vsel %vm744_vm1, %v1861_v14, -inf }
 0xda8   : > { %1864 = vmax.xlane.f32.xlu1 %v1863_v16  ;;  %v1857_v17 = vpop.f32.mrf.mxu0 }
 0xda9   : > { %v1862_v19 = vmul.f32 0.25, %v1857_v17 }
 0xdaa   : > { %v5697_v21 = vpop.f32.mrf.mxu0 }
 0xdab   : > { %v1866_v24 = vsel %vm744_vm1, %v1862_v19, -inf }
 0xdac   : > { %1867 = vmax.xlane.f32.xlu0 %v1866_v24 }
 0xe31   : > { %v1865_v25 = vpop.xlane.xlu1 %1864 }
 0xe32   : > { %v1869_v26 = vsub.f32 %v1861_v14, %v1865_v25 }
 0xe34   : > { %v1871_v28 = vmul.f32 1.442695, %v1869_v26 }
 0xe35   : > { %v1868_v29 = vpop.xlane.xlu0 %1867 }
 0xe36   : > { %6060 = vpow2.f32 %v1871_v28  ;;  %v1870_v30 = vsub.f32 %v1862_v19, %v1868_v29 }
 0xe38   : > { %v1873_v31 = vmul.f32 1.442695, %v1870_v30 }
 0xe3a   : > { %6062 = vpow2.f32 %v1873_v31 }
 0xe43   : > { %v6061_v32 = vpop.eup %6060 }
 0xe44   : > { %v1875_v33 = vsel %vm744_vm1, %v6061_v32, 0.0 }
 0xe45   : > { %1876 = vadd.xlane.f32.xlu0 %v1875_v33 }
 0xe47   : > { %v6063_v34 = vpop.eup %6062 }
 0xe48   : > { %v1878_v36 = vsel %vm744_vm1, %v6063_v34, 0.0 }
 0xe49   : > { %1879 = vadd.xlane.f32.xlu1 %v1878_v36 }
 0xe5a   : > { %1991 = vrot.lane.b32.xlu1 %v6631_v35, %s6346_s16 }
 0xe5b   : > { %1886 = vrot.lane.b32.xlu0 %v6672_v18, %s6345_s14 }
 0xe5e   : > { %1989 = vrot.lane.b32.xlu1 %v6637_v38, %s6346_s16 }
 0xe63   : > { %v1801_v37 = vpop.f32.mrf.mxu1 }
 0xe64   : > { %v6827_v5 = vadd.f32 %v1801_v37, %v1629_v50 }
 0xe65   : > { %v5690_v10 = vpop.f32.mrf.mxu1 }
 0xe67   : > { %v1804_v7 = vpop.f32.mrf.mxu1 }
 0xe68   : > { %v6829_v12 = vadd.f32 %v1804_v7, %v1630_v53  ;;  %v5064_v7 = vld [vmem:[%s7016_s4] ss:$0 sm:$0xff] }
 0xe69   : > { %v5691_v39 = vpop.f32.mrf.mxu1 }
 0xece   : > { %v1877_v40 = vpop.xlane.xlu0 %1876 }
 0xecf   : > { %6064 = vrcp.f32 %v1877_v40 }
 0xed2   : > { %v1880_v41 = vpop.xlane.xlu1 %1879  ;;  %v1887_v42 = vpop.permute.xlu0 %1886 }
 0xed3   : > { %6066 = vrcp.f32 %v1880_v41  ;;  %5699 = vmatpush3.bf16.msra.mxu1 %v1887_v42 }
 0xed4   : > { %5710 = vmatprep.subr.bf16.mxu1 %v6338_v20 }
 0xed6   : > { %v1992_v45 = vpop.permute.xlu1 %1991 }
 0xed7   : > { %v1997_v47 = vsel %vm744_vm1, %v1992_v45, 0  ;;  %v6085_v45 = vld [vmem:[%s6587_s25 + $0x8] sm:$0xff] }
 0xeda   : > { %v1990_v48 = vpop.permute.xlu1 %1989 }
 0xedc   : > { %v6065_v35 = vpop.eup %6064 }
 0xedd   : > { %v1883_v44 = vmul.f32 %v6065_v35, %v6061_v32  ;;  %v5883_v32 = vld [vmem:[#allocation7 + $0x38] sm:$0xff]   ;;  %v6084_v35 = vld [vmem:[%s6587_s25] sm:$0xff] }
 0xee0   : > { %v6067_v43 = vpop.eup %6066 }
 0xee1   : > { %v1884_v38 = vmul.f32 %v6067_v43, %v6063_v34 }
 0xee3   : > { %v1885_v46 = vpack.c.bf16 %v1884_v38, %v1883_v44 }
 0xee5   : > { %5701 = vmatmul.mubr.msk.bf16.vlgmr.msra.gmra.mxu1 %vm744_vm1, %v1885_v46 }
 0xee6   : > { %5711 = vmatpush3.bf16.xpose.msra.mxu1 %v1997_v47  ;;  %5712 = vmatprep.mubr.msk.bf16.mxu1 %vm6339_vm0, %v6338_v20  ;;  %v2333_v47 = vld [vmem:[#allocation8 + $0x380] sm:$0xff] }
 0xee7   : > { %5722 = vmatprep.subr.bf16.mxu1 %v6338_v20 }
 0xeed   : > { %5713 = vmatmul.mubr.msk.bf16.vlgmr.msra.gmra.mxu1 %vm744_vm1, %v1990_v48  ;;  %v2341_v48 = vld [vmem:[#allocation8 + $0x3c0] sm:$0xff] }
 0xeee   : > { %5724 = vmatprep.mubr.msk.bf16.mxu1 %vm6339_vm0, %v6338_v20  ;;  %5723 = vmatpush3.bf16.msra.mxu1 %v5883_v32  ;;  %v2269_v32 = vld [vmem:[#allocation8 + $0x180] sm:$0xff] }
 0xfa5   : > { %v1926_v50 = vpop.f32.mrf.mxu1 }
 0xfa7   : > { %v5702_v51 = vpop.f32.mrf.mxu1 }
 0xfa8   : > { %v5180_v51 = vcombine.high %v2333_v47, %v2341_v48 }
 0xfa9   : > { %v1929_v52 = vpop.f32.mrf.mxu1 }
 0xfaa   : > { %v1933_v53 = vpack.c.bf16 %v1929_v52, %v1926_v50  ;;  %v5179_v50 = vcombine.low %v2333_v47, %v2341_v48  ;;  %v2342_v52 = vld [vmem:[#allocation8 + $0x3c8] sm:$0xff] }
 0xfab   : > { %v5703_v54 = vpop.f32.mrf.mxu1  ;;  %v2246_v48 = vld [vmem:[#allocation8 + $0xc8] sm:$0xff] }
 0xfac   : > { %5707 = vmatmul.mubr.msk.bf16.vlgmr.msra.gmra.mxu0 %vm744_vm1, %v1933_v53  ;;  %v5181_v53 = vcombine.low %v2334_v49, %v2342_v52  ;;  %v5182_v54 = vcombine.high %v2334_v49, %v2342_v52  ;;  %v2221_v52 = vld [vmem:[#allocation8] sm:$0xff] }
 0xfad   : > { %v2033_v55 = vpop.f32.mrf.mxu1  ;;  %5718 = vmatprep.mubr.msk.bf16.mxu0 %vm6339_vm0, %v6338_v20 }
 0xfae   : > { %v2040_v56 = vmul.f32 0.25, %v2033_v55  ;;  %3116 = vmatprep.subr.bf16.mxu1 %v5182_v54  ;;  %v2222_v54 = vld [vmem:[#allocation8 + $0x8] sm:$0xff] }
 0xfaf   : > { %v5714_v57 = vpop.f32.mrf.mxu1 }
 0xfb0   : > { %v2042_v58 = vsel %vm744_vm1, %v2040_v56, -inf }
 0xfb1   : > { %2043 = vmax.xlane.f32.xlu0 %v2042_v58  ;;  %v2036_v59 = vpop.f32.mrf.mxu1 }
 0xfb2   : > { %v2041_v60 = vmul.f32 0.25, %v2036_v59 }
 0xfb3   : > { %v5715_v61 = vpop.f32.mrf.mxu1 }
 0xfb4   : > { %v2045_v62 = vsel %vm744_vm1, %v2041_v60, -inf }
 0xfb5   : > { %2046 = vmax.xlane.f32.xlu1 %v2045_v62 }
 0xfc6   : > { %2065 = vrot.lane.b32.xlu1 %v6672_v18, %s6346_s16  ;;  %s5330_s16 = sshll.u32 %s6431_s23, 8  ;;  %s6347_s23 = smov [#allocation13]  }
 0xfc7   : > { %s6967_s1 = scalar_lea.hbm %s7023_s11, %s5330_s16  ;;  %s6250_s7 = sshll.u32 %s6347_s23, 4  ;;  %s6251_s7 = int_to_ptr.vmem [resolvable:$false] %s6250_s7 }
 0xfc8   : > { %s6252_s24 = scalar_lea.vmem %s6251_s7, 512  ;;  %p6253_p12 = scmp.lt.s32.totalorder %s6969_s27, %s6251_s7 }
 0xfc9   : > { %p6254_p3 = scmp.lt.s32.totalorder %s6252_s24, %s6246_s5 }
 0xfcb   : > { %p6255_p1 = por %p6254_p3, %p6253_p12 }
 0xfcd   : > { %p6256_p6 = pnand %p6255_p1, %p6249_p8 }
0x103a   : > { %v2044_v1 = vpop.xlane.xlu0 %2043 }
0x103b   : > { %v2048_v63 = vsub.f32 %v2040_v56, %v2044_v1  ;;  %v2317_v1 = vld [vmem:[#allocation8 + $0x300] sm:$0xff] }
0x103d   : > { %v2050_v2 = vmul.f32 1.442695, %v2048_v63  ;;  %v2325_v63 = vld [vmem:[#allocation8 + $0x340] sm:$0xff] }
0x103e   : > { %v2047_v3 = vpop.xlane.xlu1 %2046 }
0x103f   : > { %6068 = vpow2.f32 %v2050_v2  ;;  %v2049_v20 = vsub.f32 %v2041_v60, %v2047_v3  ;;  %v2318_v2 = vld [vmem:[#allocation8 + $0x308] sm:$0xff]  ;;  %v5164_v3 = vcombine.high %v2317_v1, %v2325_v63 }
0x1041   : > { %v2052_v4 = vmul.f32 1.442695, %v2049_v20  ;;  %v2326_v20 = vld [vmem:[#allocation8 + $0x348] sm:$0xff] }
0x1042   : > { %v2066_v6 = vpop.permute.xlu1 %2065 }
0x1043   : > { %6070 = vpow2.f32 %v2052_v4  ;;  %5717 = vmatpush3.bf16.msra.mxu0 %v2066_v6  ;;  %v5163_v4 = vcombine.low %v2317_v1, %v2325_v63  ;;  %v5165_v6 = vcombine.low %v2318_v2, %v2326_v20  ;;  %v2343_v1 = vld [vmem:[#allocation8 + $0x3d0] sm:$0xff]  ;;  %v2336_v63 = vld [vmem:[#allocation8 + $0x398] sm:$0xff] }
0x1044   : > { %3073 = vmatprep.subr.bf16.mxu0 %v5180_v51 }
0x104c   : > { %v6069_v8 = vpop.eup %6068 }
0x104d   : > { %v2054_v11 = vsel %vm744_vm1, %v6069_v8, 0.0 }
0x104e   : > { %2055 = vadd.xlane.f32.xlu0 %v2054_v11  ;;  %v2301_v11 = vld [vmem:[#allocation8 + $0x280] sm:$0xff] }
0x1050   : > { %v6071_v13 = vpop.eup %6070 }
0x1051   : > { %v2057_v14 = vsel %vm744_vm1, %v6071_v13, 0.0 }
0x1052   : > { %2058 = vadd.xlane.f32.xlu0 %v2057_v14  ;;  %v2302_v14 = vld [vmem:[#allocation8 + $0x288] sm:$0xff] }
0x106c   : > { %v1980_v15 = vpop.f32.mrf.mxu0 }
0x106d   : > { %v1987_v18 = vadd.f32 %v1980_v15, %v6827_v5 }
0x106e   : > { %v5708_v16 = vpop.f32.mrf.mxu0 }
0x1070   : > { %v1983_v17 = vpop.f32.mrf.mxu0 }
0x1071   : > { %v1988_v19 = vadd.f32 %v1983_v17, %v6829_v12 }
0x1072   : > { %v5709_v21 = vpop.f32.mrf.mxu0 }
0x1073   : > { %v2285_v21 = vld [vmem:[#allocation8 + $0x200] sm:$0xff] }
0x10d7   : > { %v2056_v24 = vpop.xlane.xlu0 %2055 }
0x10d8   : > { %6072 = vrcp.f32 %v2056_v24  ;;  %v2293_v24 = vld [vmem:[#allocation8 + $0x240] sm:$0xff] }
0x10db   : > { %v2059_v25 = vpop.xlane.xlu0 %2058 }
0x10dc   : > { %6074 = vrcp.f32 %v2059_v25  ;;  %v2286_v25 = vld [vmem:[#allocation8 + $0x208] sm:$0xff] }
0x10e5   : > { %v6073_v26 = vpop.eup %6072 }
0x10e6   : > { %v2062_v29 = vmul.f32 %v6073_v26, %v6069_v8  ;;  %v5166_v8 = vcombine.high %v2318_v2, %v2326_v20  ;;  %v5132_v26 = vcombine.high %v2285_v21, %v2293_v24  ;;  %v2344_v20 = vld [vmem:[#allocation8 + $0x3d8] sm:$0xff] }
0x10e9   : > { %v6075_v28 = vpop.eup %6074 }
0x10ea   : > { %v2063_v30 = vmul.f32 %v6075_v28, %v6071_v13  ;;  %v2309_v13 = vld [vmem:[#allocation8 + $0x2c0] sm:$0xff]  ;;  %v2294_v28 = vld [vmem:[#allocation8 + $0x248] sm:$0xff] }
0x10eb   : > { %v5148_v15 = vcombine.high %v2301_v11, %v2309_v13  ;;  %v5147_v16 = vcombine.low %v2301_v11, %v2309_v13 }
0x10ec   : > { %v2064_v31 = vpack.c.bf16 %v2063_v30, %v2062_v29  ;;  %v5131_v29 = vcombine.low %v2285_v21, %v2293_v24  ;;  %v5133_v30 = vcombine.low %v2286_v25, %v2294_v28 }
0x10ee   : > { %5719 = vmatmul.mubr.msk.bf16.vlgmr.msra.gmra.mxu0 %vm744_vm1, %v2064_v31  ;;  %v5134_v31 = vcombine.high %v2286_v25, %v2294_v28 }
0x10ef   : > { %3105 = vmatprep.mubr.bf16.mxu0 %v6337_v0  ;;  %3074 = vmatpush1.bf16.msra.mxu0 %v5179_v50 }
0x10f0   : > { %3075 = vmatprep.subr.bf16.mxu0 %v5164_v3 }
0x10f3   : > { %3076 = vmatpush1.bf16.msra.mxu0 %v5163_v4  ;;  %v5185_v4 = vcombine.low %v2336_v63, %v2344_v20 }
0x10f4   : > { %3077 = vmatprep.subr.bf16.mxu0 %v5148_v15 }
0x10f7   : > { %3078 = vmatpush1.bf16.msra.mxu0 %v5147_v16 }
0x10f8   : > { %3079 = vmatprep.subr.bf16.mxu0 %v5132_v26  ;;  %v5066_v26 = vld [vmem:[%s7022_s10] ss:$0 sm:$0xff] }
0x10fb   : > { %3080 = vmatpush1.bf16.msra.mxu0 %v5131_v29  ;;  %v2319_v29 = vld [vmem:[#allocation8 + $0x310] sm:$0xff] }
0x11ae   : > { %v2105_v33 = vpop.f32.mrf.mxu0 }
0x11b0   : > { %v5720_v34 = vpop.f32.mrf.mxu0 }
0x11b1   : > { %v2270_v34 = vld [vmem:[#allocation8 + $0x188] sm:$0xff] }
0x11b2   : > { %v2108_v36 = vpop.f32.mrf.mxu0 }
0x11b3   : > { %v2112_v37 = vpack.c.bf16 %v2108_v36, %v2105_v33  ;;  %v2277_v33 = vld [vmem:[#allocation8 + $0x1c0] sm:$0xff] }
0x11b4   : > { %v5721_v5 = vpop.f32.mrf.mxu0  ;;  %v5116_v36 = vcombine.high %v2269_v32, %v2277_v33 }
0x11b5   : > { %5725 = vmatmul.mubr.msk.bf16.vlgmr.msra.gmra.mxu1 %vm744_vm1, %v2112_v37  ;;  %v2278_v37 = vld [vmem:[#allocation8 + $0x1c8] sm:$0xff]  ;;  %v5115_v5 = vcombine.low %v2269_v32, %v2277_v33  ;;  %v2328_v32 = vld [vmem:[#allocation8 + $0x358] sm:$0xff] }
0x11b6   : > { %3148 = vmatprep.mubr.bf16.mxu1 %v6337_v0  ;;  %3117 = vmatpush1.bf16.msra.mxu1 %v5181_v53  ;;  %v2229_v53 = vld [vmem:[#allocation8 + $0x40] sm:$0xff] }
0x11b7   : > { %3118 = vmatprep.subr.bf16.mxu1 %v5166_v8  ;;  %3081 = vmatprep.subr.bf16.mxu0 %v5116_v36 }
0x11b8   : > { %3082 = vmatpush1.bf16.msra.mxu0 %v5115_v5  ;;  %v2311_v5 = vld [vmem:[#allocation8 + $0x2d0] sm:$0xff] }
0x11ba   : > { %3119 = vmatpush1.bf16.msra.mxu1 %v5165_v6  ;;  %v5186_v6 = vcombine.high %v2336_v63, %v2344_v20  ;;  %v2247_v20 = vld [vmem:[#allocation8 + $0xd0] sm:$0xff] }
0x1275   : > { %v2159_v10 = vpop.f32.mrf.mxu1 }
0x1276   : > { %v2166_v12 = vadd.f32 %v2159_v10, %v1987_v18  ;;  %v2310_v18 = vld [vmem:[#allocation8 + $0x2c8] sm:$0xff]  ;;  %v5117_v10 = vcombine.low %v2270_v34, %v2278_v37 }
0x1277   : > { %v5726_v39 = vpop.f32.mrf.mxu1  ;;  %v5149_v17 = vcombine.low %v2302_v14, %v2310_v18 }
0x1278   : > { %v2175_v40 = vadd.f32 %v5064_v7, %v2166_v12  ;;  %v2253_v12 = vld [vmem:[#allocation8 + $0x100] sm:$0xff] }
0x1279   : > { %v2162_v41 = vpop.f32.mrf.mxu1  ;;  %v2261_v39 = vld [vmem:[#allocation8 + $0x140] sm:$0xff] }
0x127a   : > { %v2167_v42 = vadd.f32 %v2162_v41, %v1988_v19  ;;  %v2177_v43 = vadd.f32 %v6084_v35, %v2175_v40  ;;  %v5150_v19 = vcombine.high %v2302_v14, %v2310_v18  ;;  %v2254_v40 = vld [vmem:[#allocation8 + $0x108] sm:$0xff]  ;;  %v5100_v41 = vcombine.high %v2253_v12, %v2261_v39 }
0x127b   : > { %v5727_v44 = vpop.f32.mrf.mxu1  ;;  %v5099_v35 = vcombine.low %v2253_v12, %v2261_v39 }
0x127c   : > { %v2176_v38 = vadd.f32 %v5064_v7, %v2167_v42  ;;  %2181 = vadd.xlane.f32.xlu0 %v2177_v43  ;;  %3120 = vmatprep.subr.bf16.mxu1 %v5150_v19  ;;  %v5118_v7 = vcombine.high %v2270_v34, %v2278_v37  ;;  %v2262_v42 = vld [vmem:[#allocation8 + $0x148] sm:$0xff]  ;;  %v5065_v19 = vld [vmem:[%s7021_s9] ss:$0 sm:$0xff] }
0x127d   : > { %3121 = vmatpush1.bf16.msra.mxu1 %v5149_v17  ;;  %v5102_v44 = vcombine.high %v2254_v40, %v2262_v42  ;;  %3083 = vmatprep.subr.bf16.mxu0 %v5100_v41 }
0x127e   : > { %v2178_v46 = vadd.f32 %v6085_v45, %v2176_v38  ;;  %3122 = vmatprep.subr.bf16.mxu1 %v5134_v31  ;;  %3084 = vmatpush1.bf16.msra.mxu0 %v5099_v35  ;;  %v2237_v38 = vld [vmem:[#allocation8 + $0x80] sm:$0xff]  ;;  %v2320_v31 = vld [vmem:[#allocation8 + $0x318] sm:$0xff]  ;;  %v2295_v35 = vld [vmem:[#allocation8 + $0x250] sm:$0xff] }
0x127f   : > { %v2245_v45 = vld [vmem:[#allocation8 + $0xc0] sm:$0xff]  ;;  %v5170_v37 = vcombine.high %v2320_v31, %v2328_v32  ;;  %v5169_v39 = vcombine.low %v2320_v31, %v2328_v32 }
0x1280   : > { %2183 = vadd.xlane.f32.xlu0 %v2178_v46  ;;  %v5084_v47 = vcombine.high %v2237_v38, %v2245_v45  ;;  %v5083_v49 = vcombine.low %v2237_v38, %v2245_v45 }
0x1281   : > { %3123 = vmatpush1.bf16.msra.mxu1 %v5133_v30  ;;  %v2327_v30 = vld [vmem:[#allocation8 + $0x350] sm:$0xff] }
0x1282   : > { %3124 = vmatprep.subr.bf16.mxu1 %v5118_v7  ;;  %3085 = vmatprep.subr.bf16.mxu0 %v5084_v47  ;;  %v5168_v36 = vcombine.high %v2319_v29, %v2327_v30  ;;  %v2312_v7 = vld [vmem:[#allocation8 + $0x2d8] sm:$0xff]  ;;  %v5167_v12 = vcombine.low %v2319_v29, %v2327_v30  ;;  %v2338_v29 = vld [vmem:[#allocation8 + $0x3a8] sm:$0xff] }
0x1283   : > { %3086 = vmatpush1.bf16.msra.mxu0 %v5083_v49  ;;  %v2279_v49 = vld [vmem:[#allocation8 + $0x1d0] sm:$0xff]  ;;  %v2346_v30 = vld [vmem:[#allocation8 + $0x3e8] sm:$0xff] }
0x1285   : > { %3125 = vmatpush1.bf16.msra.mxu1 %v5117_v10  ;;  %v2304_v10 = vld [vmem:[#allocation8 + $0x298] sm:$0xff] }
0x1286   : > { %3126 = vmatprep.subr.bf16.mxu1 %v5102_v44  ;;  %v5154_v41 = vcombine.high %v2304_v10, %v2312_v7  ;;  %v2296_v44 = vld [vmem:[#allocation8 + $0x258] sm:$0xff]  ;;  %v5153_v45 = vcombine.low %v2304_v10, %v2312_v7  ;;  %v2322_v10 = vld [vmem:[#allocation8 + $0x328] sm:$0xff] }
0x1287   : > { %v2330_v7 = vld [vmem:[#allocation8 + $0x368] sm:$0xff] }
0x1305   : > { %v2182_v55 = vpop.xlane.xlu0 %2181 }
0x1306   : > { %v2186_v56 = vmul.f32 0.0078125, %v2182_v55  ;;  %v5068_v55 = vcombine.high %v2221_v52, %v2229_v53 }
0x1308   : > { %v6861_v57 = vsub.f32 %v2177_v43, %v2186_v56  ;;  %v5101_v43 = vcombine.low %v2254_v40, %v2262_v42  ;;  %v2230_v56 = vld [vmem:[#allocation8 + $0x48] sm:$0xff]  ;;  %3087 = vmatprep.subr.bf16.mxu0 %v5068_v55  ;;  %v2287_v42 = vld [vmem:[#allocation8 + $0x210] sm:$0xff] }
0x1309   : > { %v2184_v58 = vpop.xlane.xlu0 %2183 }
0x130a   : > { %v2187_v59 = vmul.f32 0.0078125, %v2184_v58  ;;  %v2190_v60 = vmul.f32 %v6861_v57, %v6861_v57  ;;  %3127 = vmatpush1.bf16.msra.mxu1 %v5101_v43  ;;  %v5067_v58 = vcombine.low %v2221_v52, %v2229_v53  ;;  %v2288_v43 = vld [vmem:[#allocation8 + $0x218] sm:$0xff]  ;;  %v5135_v52 = vcombine.low %v2287_v42, %v2295_v35 }
0x130b   : > { %v5138_v47 = vcombine.high %v2288_v43, %v2296_v44  ;;  %v5137_v53 = vcombine.low %v2288_v43, %v2296_v44  ;;  %v2306_v43 = vld [vmem:[#allocation8 + $0x2a8] sm:$0xff] }
0x130c   : > { %v6865_v61 = vsub.f32 %v2178_v46, %v2187_v59  ;;  %2192 = vadd.xlane.f32.xlu0 %v2190_v60  ;;  %v2238_v46 = vld [vmem:[#allocation8 + $0x88] sm:$0xff]  ;;  %v5069_v59 = vcombine.low %v2222_v54, %v2230_v56  ;;  %v5070_v60 = vcombine.high %v2222_v54, %v2230_v56  ;;  %3088 = vmatpush1.bf16.msra.mxu0 %v5067_v58  ;;  %v2255_v56 = vld [vmem:[#allocation8 + $0x110] sm:$0xff] }
0x130d   : > { %v5085_v50 = vcombine.low %v2238_v46, %v2246_v48  ;;  %v5086_v51 = vcombine.high %v2238_v46, %v2246_v48  ;;  %v5136_v46 = vcombine.high %v2287_v42, %v2295_v35  ;;  %v2271_v48 = vld [vmem:[#allocation8 + $0x190] sm:$0xff]  ;;  %v2305_v42 = vld [vmem:[#allocation8 + $0x2a0] sm:$0xff]  ;;  %v2314_v44 = vld [vmem:[#allocation8 + $0x2e8] sm:$0xff] }
0x130e   : > { %v2191_v62 = vmul.f32 %v6865_v61, %v6865_v61  ;;  %v5120_v54 = vcombine.high %v2271_v48, %v2279_v49  ;;  %v2263_v58 = vld [vmem:[#allocation8 + $0x150] sm:$0xff]  ;;  %v2313_v35 = vld [vmem:[#allocation8 + $0x2e0] sm:$0xff] }
0x130f   : > { %3128 = vmatprep.subr.bf16.mxu1 %v5086_v51  ;;  %v2280_v51 = vld [vmem:[#allocation8 + $0x1d8] sm:$0xff]  ;;  %v5104_v63 = vcombine.high %v2255_v56, %v2263_v58 }
0x1310   : > { %2194 = vadd.xlane.f32.xlu0 %v2191_v62  ;;  %3129 = vmatpush1.bf16.msra.mxu1 %v5085_v50  ;;  %v2335_v62 = vld [vmem:[#allocation8 + $0x390] sm:$0xff]  ;;  %v2272_v50 = vld [vmem:[#allocation8 + $0x198] sm:$0xff] }
0x1311   : > { %3130 = vmatprep.subr.bf16.mxu1 %v5070_v60  ;;  %v5183_v2 = vcombine.low %v2335_v62, %v2343_v1  ;;  %v5184_v3 = vcombine.high %v2335_v62, %v2343_v1  ;;  %v5122_v55 = vcombine.high %v2272_v50, %v2280_v51  ;;  %v2264_v60 = vld [vmem:[#allocation8 + $0x158] sm:$0xff]  ;;  %v5119_v62 = vcombine.low %v2271_v48, %v2279_v49  ;;  %v2289_v48 = vld [vmem:[#allocation8 + $0x220] sm:$0xff] }
0x1312   : > { %v5121_v1 = vcombine.low %v2272_v50, %v2280_v51  ;;  %v2297_v49 = vld [vmem:[#allocation8 + $0x260] sm:$0xff]  ;;  %v2290_v50 = vld [vmem:[#allocation8 + $0x228] sm:$0xff] }
0x1313   : > { %3159 = vmatprep.subr.bf16.mxu0 %v5184_v3  ;;  %v2239_v3 = vld [vmem:[#allocation8 + $0x90] sm:$0xff]  ;;  %v2298_v51 = vld [vmem:[#allocation8 + $0x268] sm:$0xff] }
0x1314   : > { %3131 = vmatpush1.bf16.msra.mxu1 %v5069_v59  ;;  %v2256_v59 = vld [vmem:[#allocation8 + $0x118] sm:$0xff] }
0x1315   : > { %3202 = vmatprep.subr.bf16.mxu1 %v5186_v6  ;;  %v2248_v6 = vld [vmem:[#allocation8 + $0xd8] sm:$0xff] }
0x1395   : > { %v2193_v8 = vpop.xlane.xlu0 %2192 }
0x1396   : > { %v2196_v11 = vmul.f32 0.0078125, %v2193_v8  ;;  %v5103_v8 = vcombine.low %v2255_v56, %v2263_v58  ;;  %v2273_v56 = vld [vmem:[#allocation8 + $0x1a0] sm:$0xff] }
0x1397   : > { %v2281_v58 = vld [vmem:[#allocation8 + $0x1e0] sm:$0xff] }
0x1398   : > { %v2198_v13 = vadd.f32 1e-05, %v2196_v11  ;;  %v5105_v11 = vcombine.low %v2256_v59, %v2264_v60 }
0x1399   : > { %v2195_v14 = vpop.xlane.xlu0 %2194 }
0x139a   : > { %6076 = vrsqrt.f32 %v2198_v13  ;;  %v2197_v15 = vmul.f32 0.0078125, %v2195_v14  ;;  %v5088_v13 = vcombine.high %v2239_v3, %v2247_v20 }
0x139c   : > { %v2199_v18 = vadd.f32 1e-05, %v2197_v15  ;;  %v2223_v15 = vld [vmem:[#allocation8 + $0x10] sm:$0xff] }
0x139e   : > { %6078 = vrsqrt.f32 %v2199_v18  ;;  %v2231_v18 = vld [vmem:[#allocation8 + $0x50] sm:$0xff] }
0x139f   : > { %v5071_v31 = vcombine.low %v2223_v15, %v2231_v18 }
0x13a7   : > { %v6077_v16 = vpop.eup %6076 }
0x13a8   : > { %v2202_v17 = vmul.f32 %v6077_v16, %v6861_v57  ;;  %v2224_v16 = vld [vmem:[#allocation8 + $0x18] sm:$0xff] }
0x13aa   : > { %v2210_v24 = vmul.f32 %v5065_v19, %v2202_v17  ;;  %v2232_v17 = vld [vmem:[#allocation8 + $0x58] sm:$0xff] }
0x13ab   : > { %v6079_v21 = vpop.eup %6078  ;;  %v5073_v32 = vcombine.low %v2224_v16, %v2232_v17 }
0x13ac   : > { %v2203_v25 = vmul.f32 %v6079_v21, %v6865_v61  ;;  %v6877_v33 = vadd.f32 %v5066_v26, %v2210_v24  ;;  %v2303_v61 = vld [vmem:[#allocation8 + $0x290] sm:$0xff]  ;;  %v5072_v24 = vcombine.high %v2223_v15, %v2231_v18  ;;  %v2241_v15 = vld [vmem:[#allocation8 + $0xa0] sm:$0xff] }
0x13ad   : > { %v5152_v40 = vcombine.high %v2303_v61, %v2311_v5  ;;  %v5151_v38 = vcombine.low %v2303_v61, %v2311_v5  ;;  %v2321_v61 = vld [vmem:[#allocation8 + $0x320] sm:$0xff] }
0x13ae   : > { %v2211_v28 = vmul.f32 %v5065_v19, %v2203_v25  ;;  %v5087_v19 = vcombine.low %v2239_v3, %v2247_v20  ;;  %v5074_v25 = vcombine.high %v2224_v16, %v2232_v17  ;;  %v2329_v5 = vld [vmem:[#allocation8 + $0x360] sm:$0xff]  ;;  %v2242_v16 = vld [vmem:[#allocation8 + $0xa8] sm:$0xff] }
0x13af   : > { %v2257_v3 = vld [vmem:[#allocation8 + $0x120] sm:$0xff]  ;;  %v2250_v17 = vld [vmem:[#allocation8 + $0xe8] sm:$0xff] }
0x13b0   : > { %v6879_v57 = vadd.f32 %v5066_v26, %v2211_v28  ;;  %v2337_v26 = vld [vmem:[#allocation8 + $0x3a0] sm:$0xff] }
0x13b1   : > { %v2345_v28 = vld [vmem:[#allocation8 + $0x3e0] sm:$0xff] }
0x13b2   : > { %v6883_v34 = vpack.c.bf16 %v6879_v57, %v6877_v33  ;;  %v2265_v20 = vld [vmem:[#allocation8 + $0x160] sm:$0xff] }
0x13b3   : > { %v2249_v18 = vld [vmem:[#allocation8 + $0xe0] sm:$0xff] }
0x13b4   : > { %3106 = vmatmul.mubr.bf16.vlgmr.msra.gmra.mxu0 %v6883_v34  ;;  %3149 = vmatmul.mubr.bf16.vlgmr.msra.gmra.mxu1 %v6883_v34 }
0x13b5   : > { %3160 = vmatpush1.bf16.msra.mxu0 %v5183_v2  ;;  %3203 = vmatpush1.bf16.msra.mxu1 %v5185_v4  ;;  %v5106_v2 = vcombine.high %v2256_v59, %v2264_v60  ;;  %v2240_v4 = vld [vmem:[#allocation8 + $0x98] sm:$0xff]  ;;  %v2274_v59 = vld [vmem:[#allocation8 + $0x1a8] sm:$0xff] }
0x13b6   : > { %3161 = vmatprep.subr.bf16.mxu0 %v5168_v36  ;;  %3204 = vmatprep.subr.bf16.mxu1 %v5170_v37  ;;  %v5090_v14 = vcombine.high %v2240_v4, %v2248_v6  ;;  %v5089_v21 = vcombine.low %v2240_v4, %v2248_v6  ;;  %v5188_v36 = vcombine.high %v2337_v26, %v2345_v28  ;;  %v2282_v60 = vld [vmem:[#allocation8 + $0x1e8] sm:$0xff] }
0x13b7   : > { %3191 = vmatprep.mubr.bf16.mxu0 %v6337_v0  ;;  %3234 = vmatprep.mubr.bf16.mxu1 %v6337_v0  ;;  %v5190_v37 = vcombine.high %v2338_v29, %v2346_v30  ;;  %v2258_v4 = vld [vmem:[#allocation8 + $0x128] sm:$0xff] }
0x13b8   : > { %v2266_v6 = vld [vmem:[#allocation8 + $0x168] sm:$0xff] }
0x13b9   : > { %3162 = vmatpush1.bf16.msra.mxu0 %v5167_v12  ;;  %3205 = vmatpush1.bf16.msra.mxu1 %v5169_v39  ;;  %v5187_v12 = vcombine.low %v2337_v26, %v2345_v28  ;;  %v5189_v39 = vcombine.low %v2338_v29, %v2346_v30  ;;  %v2225_v26 = vld [vmem:[#allocation8 + $0x20] sm:$0xff]  ;;  %v2226_v29 = vld [vmem:[#allocation8 + $0x28] sm:$0xff] }
0x13ba   : > { %3163 = vmatprep.subr.bf16.mxu0 %v5152_v40  ;;  %3206 = vmatprep.subr.bf16.mxu1 %v5154_v41  ;;  %v5172_v40 = vcombine.high %v2321_v61, %v2329_v5  ;;  %v5174_v41 = vcombine.high %v2322_v10, %v2330_v7  ;;  %v2233_v28 = vld [vmem:[#allocation8 + $0x60] sm:$0xff]  ;;  %v2234_v30 = vld [vmem:[#allocation8 + $0x68] sm:$0xff] }
0x13bd   : > { %3164 = vmatpush1.bf16.msra.mxu0 %v5151_v38  ;;  %3207 = vmatpush1.bf16.msra.mxu1 %v5153_v45  ;;  %v5171_v38 = vcombine.low %v2321_v61, %v2329_v5  ;;  %v5173_v45 = vcombine.low %v2322_v10, %v2330_v7  ;;  %v2339_v61 = vld [vmem:[#allocation8 + $0x3b0] sm:$0xff]  ;;  %v2340_v10 = vld [vmem:[#allocation8 + $0x3b8] sm:$0xff] }
0x13be   : > { %3165 = vmatprep.subr.bf16.mxu0 %v5136_v46  ;;  %3208 = vmatprep.subr.bf16.mxu1 %v5138_v47  ;;  %v5156_v46 = vcombine.high %v2305_v42, %v2313_v35  ;;  %v5158_v47 = vcombine.high %v2306_v43, %v2314_v44  ;;  %v2347_v5 = vld [vmem:[#allocation8 + $0x3f0] sm:$0xff]  ;;  %v2348_v7 = vld [vmem:[#allocation8 + $0x3f8] sm:$0xff] }
0x13c1   : > { %3166 = vmatpush1.bf16.msra.mxu0 %v5135_v52  ;;  %3209 = vmatpush1.bf16.msra.mxu1 %v5137_v53  ;;  %v5155_v52 = vcombine.low %v2305_v42, %v2313_v35  ;;  %v5157_v53 = vcombine.low %v2306_v43, %v2314_v44  ;;  %v2323_v42 = vld [vmem:[#allocation8 + $0x330] sm:$0xff]  ;;  %v2324_v43 = vld [vmem:[#allocation8 + $0x338] sm:$0xff] }
0x13c2   : > { %3167 = vmatprep.subr.bf16.mxu0 %v5120_v54  ;;  %3210 = vmatprep.subr.bf16.mxu1 %v5122_v55  ;;  %v5140_v54 = vcombine.high %v2289_v48, %v2297_v49  ;;  %v5142_v55 = vcombine.high %v2290_v50, %v2298_v51  ;;  %v2331_v35 = vld [vmem:[#allocation8 + $0x370] sm:$0xff]  ;;  %v2332_v44 = vld [vmem:[#allocation8 + $0x378] sm:$0xff] }
0x13c5   : > { %3168 = vmatpush1.bf16.msra.mxu0 %v5119_v62  ;;  %3211 = vmatpush1.bf16.msra.mxu1 %v5121_v1  ;;  %v5139_v62 = vcombine.low %v2289_v48, %v2297_v49  ;;  %v5141_v1 = vcombine.low %v2290_v50, %v2298_v51  ;;  %v2307_v48 = vld [vmem:[#allocation8 + $0x2b0] sm:$0xff]  ;;  %v2308_v50 = vld [vmem:[#allocation8 + $0x2b8] sm:$0xff] }
0x13c6   : > { %3169 = vmatprep.subr.bf16.mxu0 %v5104_v63  ;;  %3212 = vmatprep.subr.bf16.mxu1 %v5106_v2  ;;  %v5124_v63 = vcombine.high %v2273_v56, %v2281_v58  ;;  %v5126_v2 = vcombine.high %v2274_v59, %v2282_v60  ;;  %v2315_v49 = vld [vmem:[#allocation8 + $0x2f0] sm:$0xff]  ;;  %v2316_v51 = vld [vmem:[#allocation8 + $0x2f8] sm:$0xff] }
0x13c9   : > { %3170 = vmatpush1.bf16.msra.mxu0 %v5103_v8  ;;  %3213 = vmatpush1.bf16.msra.mxu1 %v5105_v11  ;;  %v5123_v8 = vcombine.low %v2273_v56, %v2281_v58  ;;  %v5125_v11 = vcombine.low %v2274_v59, %v2282_v60  ;;  %v2291_v56 = vld [vmem:[#allocation8 + $0x230] sm:$0xff]  ;;  %v2292_v59 = vld [vmem:[#allocation8 + $0x238] sm:$0xff] }
0x13ca   : > { %3171 = vmatprep.subr.bf16.mxu0 %v5088_v13  ;;  %3214 = vmatprep.subr.bf16.mxu1 %v5090_v14  ;;  %v5108_v13 = vcombine.high %v2257_v3, %v2265_v20  ;;  %v5110_v14 = vcombine.high %v2258_v4, %v2266_v6  ;;  %v2299_v58 = vld [vmem:[#allocation8 + $0x270] sm:$0xff]  ;;  %v2300_v60 = vld [vmem:[#allocation8 + $0x278] sm:$0xff] }
0x13cd   : > { %3172 = vmatpush1.bf16.msra.mxu0 %v5087_v19  ;;  %3215 = vmatpush1.bf16.msra.mxu1 %v5089_v21  ;;  %v5107_v19 = vcombine.low %v2257_v3, %v2265_v20  ;;  %v5109_v21 = vcombine.low %v2258_v4, %v2266_v6  ;;  %v2275_v3 = vld [vmem:[#allocation8 + $0x1b0] sm:$0xff]  ;;  %v2276_v4 = vld [vmem:[#allocation8 + $0x1b8] sm:$0xff] }
0x13ce   : > { %3173 = vmatprep.subr.bf16.mxu0 %v5072_v24  ;;  %3216 = vmatprep.subr.bf16.mxu1 %v5074_v25  ;;  %v5092_v24 = vcombine.high %v2241_v15, %v2249_v18  ;;  %v5094_v25 = vcombine.high %v2242_v16, %v2250_v17  ;;  %v2283_v20 = vld [vmem:[#allocation8 + $0x1f0] sm:$0xff]  ;;  %v2284_v6 = vld [vmem:[#allocation8 + $0x1f8] sm:$0xff] }
0x13d1   : > { %3174 = vmatpush1.bf16.msra.mxu0 %v5071_v31  ;;  %3217 = vmatpush1.bf16.msra.mxu1 %v5073_v32  ;;  %v5091_v31 = vcombine.low %v2241_v15, %v2249_v18  ;;  %v5093_v32 = vcombine.low %v2242_v16, %v2250_v17  ;;  %v2267_v15 = vld [vmem:[#allocation8 + $0x170] sm:$0xff]  ;;  %v2260_v18 = vld [vmem:[#allocation8 + $0x138] sm:$0xff]  ;;  %v5127_v17 = vcombine.low %v2275_v3, %v2283_v20 }
0x13d2   : > { %3245 = vmatprep.subr.bf16.mxu0 %v5188_v36  ;;  %3288 = vmatprep.subr.bf16.mxu1 %v5190_v37  ;;  %v5076_v36 = vcombine.high %v2225_v26, %v2233_v28  ;;  %v5078_v37 = vcombine.high %v2226_v29, %v2234_v30  ;;  %v2268_v16 = vld [vmem:[#allocation8 + $0x178] sm:$0xff] }
0x13d4   : > { %3192 = vmatmul.mubr.bf16.vlgmr.msra.gmra.mxu0 %v6883_v34  ;;  %3235 = vmatmul.mubr.bf16.vlgmr.msra.gmra.mxu1 %v6883_v34 }
0x13d5   : > { %3246 = vmatpush1.bf16.msra.mxu0 %v5187_v12  ;;  %3289 = vmatpush1.bf16.msra.mxu1 %v5189_v39  ;;  %v5075_v12 = vcombine.low %v2225_v26, %v2233_v28  ;;  %v5077_v39 = vcombine.low %v2226_v29, %v2234_v30  ;;  %v2251_v26 = vld [vmem:[#allocation8 + $0xf0] sm:$0xff]  ;;  %v2244_v28 = vld [vmem:[#allocation8 + $0xb8] sm:$0xff] }
0x13d6   : > { %3247 = vmatprep.subr.bf16.mxu0 %v5172_v40  ;;  %3290 = vmatprep.subr.bf16.mxu1 %v5174_v41  ;;  %v5192_v40 = vcombine.high %v2339_v61, %v2347_v5  ;;  %v5194_v41 = vcombine.high %v2340_v10, %v2348_v7  ;;  %v2252_v29 = vld [vmem:[#allocation8 + $0xf8] sm:$0xff] }
0x13d7   : > { %3277 = vmatprep.mubr.bf16.mxu0 %v6337_v0  ;;  %3320 = vmatprep.mubr.bf16.mxu1 %v6337_v0 }
0x13d9   : > { %3248 = vmatpush1.bf16.msra.mxu0 %v5171_v38  ;;  %3291 = vmatpush1.bf16.msra.mxu1 %v5173_v45  ;;  %v5191_v38 = vcombine.low %v2339_v61, %v2347_v5  ;;  %v5193_v45 = vcombine.low %v2340_v10, %v2348_v7  ;;  %v2235_v61 = vld [vmem:[#allocation8 + $0x70] sm:$0xff]  ;;  %v2228_v5 = vld [vmem:[#allocation8 + $0x38] sm:$0xff] }
0x13da   : > { %3249 = vmatprep.subr.bf16.mxu0 %v5156_v46  ;;  %3292 = vmatprep.subr.bf16.mxu1 %v5158_v47  ;;  %v5176_v46 = vcombine.high %v2323_v42, %v2331_v35  ;;  %v5178_v47 = vcombine.high %v2324_v43, %v2332_v44  ;;  %v2236_v10 = vld [vmem:[#allocation8 + $0x78] sm:$0xff] }
0x13dd   : > { %3250 = vmatpush1.bf16.msra.mxu0 %v5155_v52  ;;  %3293 = vmatpush1.bf16.msra.mxu1 %v5157_v53  ;;  %v5175_v52 = vcombine.low %v2323_v42, %v2331_v35  ;;  %v5177_v53 = vcombine.low %v2324_v43, %v2332_v44  ;;  %v5081_v42 = vcombine.low %v2228_v5, %v2236_v10  ;;  %v5884_v35 = vld [vmem:[#allocation11 + $0x78] sm:$0xff]  }
0x13de   : > { %3251 = vmatprep.subr.bf16.mxu0 %v5140_v54  ;;  %3294 = vmatprep.subr.bf16.mxu1 %v5142_v55  ;;  %v5160_v54 = vcombine.high %v2307_v48, %v2315_v49  ;;  %v5162_v55 = vcombine.high %v2308_v50, %v2316_v51  ;;  %v5885_v43 = vld [vmem:[#allocation11 + $0xf8] sm:$0xff]  }
0x13df   : > { %v5886_v44 = vld [vmem:[#allocation11 + $0x38] sm:$0xff]  }
0x13e1   : > { %3252 = vmatpush1.bf16.msra.mxu0 %v5139_v62  ;;  %3295 = vmatpush1.bf16.msra.mxu1 %v5141_v1  ;;  %v5159_v62 = vcombine.low %v2307_v48, %v2315_v49  ;;  %v5161_v1 = vcombine.low %v2308_v50, %v2316_v51  ;;  %v5891_v48 = vld [vmem:[#allocation11 + $0xb0] sm:$0xff]   ;;  %v5892_v49 = vld [vmem:[#allocation11 + $0x68] sm:$0xff]  }
0x13e2   : > { %3253 = vmatprep.subr.bf16.mxu0 %v5124_v63  ;;  %3296 = vmatprep.subr.bf16.mxu1 %v5126_v2  ;;  %v5144_v63 = vcombine.high %v2291_v56, %v2299_v58  ;;  %v5146_v2 = vcombine.high %v2292_v59, %v2300_v60  ;;  %v5893_v50 = vld [vmem:[#allocation11 + $0xe8] sm:$0xff]  }
0x13e3   : > { %v5894_v51 = vld [vmem:[#allocation11 + $0x28] sm:$0xff]  }
0x13e5   : > { %3254 = vmatpush1.bf16.msra.mxu0 %v5123_v8  ;;  %3297 = vmatpush1.bf16.msra.mxu1 %v5125_v11  ;;  %v5143_v8 = vcombine.low %v2291_v56, %v2299_v58  ;;  %v5145_v11 = vcombine.low %v2292_v59, %v2300_v60  ;;  %v5900_v56 = vld [vmem:[#allocation11 + $0x58] sm:$0xff]  }
0x13e6   : > { %3255 = vmatprep.subr.bf16.mxu0 %v5108_v13  ;;  %3298 = vmatprep.subr.bf16.mxu1 %v5110_v14  ;;  %v5128_v13 = vcombine.high %v2275_v3, %v2283_v20  ;;  %v2259_v14 = vld [vmem:[#allocation8 + $0x130] sm:$0xff]  ;;  %v5901_v58 = vld [vmem:[#allocation11 + $0xd8] sm:$0xff]   ;;  %v5908_v3 = vld [vmem:[#allocation11 + $0x48] sm:$0xff]  }
0x13e7   : > { %v5111_v30 = vcombine.low %v2259_v14, %v2267_v15  ;;  %v5902_v59 = vld [vmem:[#allocation11 + $0x18] sm:$0xff]   ;;  %v5909_v20 = vld [vmem:[#allocation11 + $0xc8] sm:$0xff]  }
0x13e8   : > { %v5903_v60 = vld [vmem:[#allocation11 + $0x98] sm:$0xff]  }
0x13e9   : > { %3256 = vmatpush1.bf16.msra.mxu0 %v5107_v19  ;;  %3299 = vmatpush1.bf16.msra.mxu1 %v5109_v21  ;;  %v5129_v19 = vcombine.low %v2276_v4, %v2284_v6  ;;  %v5112_v21 = vcombine.high %v2259_v14, %v2267_v15  ;;  %v5916_v14 = vld [vmem:[#allocation11 + $0x178] sm:$0xff]  }
0x13ea   : > { %3257 = vmatprep.subr.bf16.mxu0 %v5092_v24  ;;  %3300 = vmatprep.subr.bf16.mxu1 %v5094_v25  ;;  %v5114_v24 = vcombine.high %v2260_v18, %v2268_v16  ;;  %v2243_v25 = vld [vmem:[#allocation8 + $0xb0] sm:$0xff]  ;;  %v5917_v15 = vld [vmem:[#allocation11 + $0x1f8] sm:$0xff]  }
0x13eb   : > { %v5095_v7 = vcombine.low %v2243_v25, %v2251_v26 }
0x13ed   : > { %3258 = vmatpush1.bf16.msra.mxu0 %v5091_v31  ;;  %3301 = vmatpush1.bf16.msra.mxu1 %v5093_v32  ;;  %v5113_v31 = vcombine.low %v2260_v18, %v2268_v16  ;;  %v5096_v32 = vcombine.high %v2243_v25, %v2251_v26  ;;  %v2367_v18 = vsub.s32 3, %v6614_v22  ;;  %v6900_v16 = vld [vmem:[#allocation10] sm:$0xff] }
0x13ee   : > { %3259 = vmatprep.subr.bf16.mxu0 %v5076_v36  ;;  %3302 = vmatprep.subr.bf16.mxu1 %v5078_v37  ;;  %v5098_v36 = vcombine.high %v2244_v28, %v2252_v29  ;;  %v2227_v37 = vld [vmem:[#allocation8 + $0x30] sm:$0xff]  ;;  %v2356_v25 = vrot.slane %v6900_v16, %v6625_v27  ;;  %v2364_v26 = vrot.slane %v6900_v16, %v6668_v9 }
0x13f1   : > { %3260 = vmatpush1.bf16.msra.mxu0 %v5075_v12  ;;  %3303 = vmatpush1.bf16.msra.mxu1 %v5077_v39  ;;  %v5097_v12 = vcombine.low %v2244_v28, %v2252_v29  ;;  %v5080_v39 = vcombine.high %v2227_v37, %v2235_v61 }
0x13f2   : > { %3331 = vmatprep.subr.bf16.mxu0 %v5192_v40  ;;  %3374 = vmatprep.subr.bf16.mxu1 %v5194_v41  ;;  %v5082_v40 = vcombine.high %v2228_v5, %v2236_v10  ;;  %v5079_v41 = vcombine.low %v2227_v37, %v2235_v61 }
0x13f4   : > { %3278 = vmatmul.mubr.bf16.vlgmr.msra.gmra.mxu0 %v6883_v34  ;;  %3321 = vmatmul.mubr.bf16.vlgmr.msra.gmra.mxu1 %v6883_v34 }
0x13f5   : > { %3332 = vmatpush1.bf16.msra.mxu0 %v5191_v38  ;;  %3375 = vmatpush1.bf16.msra.mxu1 %v5193_v45  ;;  %v5887_v38 = vld [vmem:[#allocation11 + $0xb8] sm:$0xff]   ;;  %v5888_v45 = vld [vmem:[#allocation11 + $0x70] sm:$0xff]  }
0x13f6   : > { %3333 = vmatprep.subr.bf16.mxu0 %v5176_v46  ;;  %3376 = vmatprep.subr.bf16.mxu1 %v5178_v47  ;;  %v5889_v46 = vld [vmem:[#allocation11 + $0xf0] sm:$0xff]  }
0x13f7   : > { %3363 = vmatprep.mubr.bf16.mxu0 %v6337_v0  ;;  %3406 = vmatprep.mubr.bf16.mxu1 %v6337_v0  ;;  %v5130_v0 = vcombine.high %v2276_v4, %v2284_v6  ;;  %v5890_v47 = vld [vmem:[#allocation11 + $0x30] sm:$0xff]   ;;  %v5910_v4 = vld [vmem:[#allocation11 + $0x8] sm:$0xff]  }
0x13f8   : > { %v5911_v6 = vld [vmem:[#allocation11 + $0x88] sm:$0xff]  }
0x13f9   : > { %3334 = vmatpush1.bf16.msra.mxu0 %v5175_v52  ;;  %3377 = vmatpush1.bf16.msra.mxu1 %v5177_v53  ;;  %v5895_v52 = vld [vmem:[#allocation11 + $0xa8] sm:$0xff]   ;;  %v5896_v53 = vld [vmem:[#allocation11 + $0x60] sm:$0xff]  }
0x13fa   : > { %3335 = vmatprep.subr.bf16.mxu0 %v5160_v54  ;;  %3378 = vmatprep.subr.bf16.mxu1 %v5162_v55  ;;  %v5897_v54 = vld [vmem:[#allocation11 + $0xe0] sm:$0xff]  }
0x13fb   : > { %v5898_v55 = vld [vmem:[#allocation11 + $0x20] sm:$0xff]  }
0x13fd   : > { %3336 = vmatpush1.bf16.msra.mxu0 %v5159_v62  ;;  %3379 = vmatpush1.bf16.msra.mxu1 %v5161_v1  ;;  %v5904_v62 = vld [vmem:[#allocation11 + $0x50] sm:$0xff]  }
0x13fe   : > { %3337 = vmatprep.subr.bf16.mxu0 %v5144_v63  ;;  %3380 = vmatprep.subr.bf16.mxu1 %v5146_v2  ;;  %v5905_v1 = vld [vmem:[#allocation11 + $0xd0] sm:$0xff]  }
0x13ff   : > { %v5906_v63 = vld [vmem:[#allocation11 + $0x10] sm:$0xff]  }
0x1400   : > { %v5907_v2 = vld [vmem:[#allocation11 + $0x90] sm:$0xff]  }
0x1401   : > { %3338 = vmatpush1.bf16.msra.mxu0 %v5143_v8  ;;  %3381 = vmatpush1.bf16.msra.mxu1 %v5145_v11  ;;  %v5912_v8 = vld [vmem:[#allocation11 + $0x40] sm:$0xff]  }
0x1402   : > { %3339 = vmatprep.subr.bf16.mxu0 %v5128_v13  ;;  %3382 = vmatprep.subr.bf16.mxu1 %v5130_v0  ;;  %v5913_v11 = vld [vmem:[#allocation11 + $0xc0] sm:$0xff]  }
0x1403   : > { %v5914_v13 = vld [vmem:[#allocation11] sm:$0xff]  }
0x1404   : > { %v5915_v0 = vld [vmem:[#allocation11 + $0x80] sm:$0xff]  }
0x1405   : > { %3340 = vmatpush1.bf16.msra.mxu0 %v5127_v17  ;;  %3383 = vmatpush1.bf16.msra.mxu1 %v5129_v19 }
0x1406   : > { %3341 = vmatprep.subr.bf16.mxu0 %v5112_v21  ;;  %3384 = vmatprep.subr.bf16.mxu1 %v5114_v24  ;;  %v2360_v21 = vrot.slane %v6900_v16, %v6617_v23  ;;  %v2368_v24 = vrot.slane %v6900_v16, %v2367_v18 }
0x1409   : > { %3342 = vmatpush1.bf16.msra.mxu0 %v5111_v30  ;;  %3385 = vmatpush1.bf16.msra.mxu1 %v5113_v31 }
0x140a   : > { %3343 = vmatprep.subr.bf16.mxu0 %v5096_v32  ;;  %3386 = vmatprep.subr.bf16.mxu1 %v5098_v36 }
0x140d   : > { %3344 = vmatpush1.bf16.msra.mxu0 %v5095_v7  ;;  %3387 = vmatpush1.bf16.msra.mxu1 %v5097_v12 }
0x140e   : > { %3345 = vmatprep.subr.bf16.mxu0 %v5080_v39  ;;  %3388 = vmatprep.subr.bf16.mxu1 %v5082_v40 }
0x1411   : > { %3346 = vmatpush1.bf16.msra.mxu0 %v5079_v41  ;;  %3389 = vmatpush1.bf16.msra.mxu1 %v5081_v42 }
0x1412   : > { %5388 = vmatprep.subr.bf16.mxu0 %v5884_v35  ;;  %5410 = vmatprep.subr.bf16.mxu1 %v5885_v43 }
0x1414   : > { %3364 = vmatmul.mubr.bf16.vlgmr.msra.gmra.mxu0 %v6883_v34  ;;  %3407 = vmatmul.mubr.bf16.vlgmr.msra.gmra.mxu1 %v6883_v34  ;;  %v5899_v34 = vld [vmem:[#allocation11 + $0xa0] sm:$0xff]  }
0x1415   : > { %5389 = vmatpush3.bf16.msra.mxu0 %v5886_v44  ;;  %5411 = vmatpush3.bf16.msra.mxu1 %v5887_v38 }
0x1416   : > { %5390 = vmatprep.subr.bf16.mxu0 %v5888_v45  ;;  %5412 = vmatprep.subr.bf16.mxu1 %v5889_v46 }
0x1419   : > { %5391 = vmatpush3.bf16.msra.mxu0 %v5890_v47  ;;  %5413 = vmatpush3.bf16.msra.mxu1 %v5891_v48 }
0x141a   : > { %5392 = vmatprep.subr.bf16.mxu0 %v5892_v49  ;;  %5414 = vmatprep.subr.bf16.mxu1 %v5893_v50  ;;  %v5918_v49 = vld [vmem:[#allocation11 + $0x138] sm:$0xff]  }
0x141b   : > { %v5919_v50 = vld [vmem:[#allocation11 + $0x1b8] sm:$0xff]  }
0x141d   : > { %5393 = vmatpush3.bf16.msra.mxu0 %v5894_v51  ;;  %5415 = vmatpush3.bf16.msra.mxu1 %v5895_v52 }
0x141e   : > { %5394 = vmatprep.subr.bf16.mxu0 %v5896_v53  ;;  %5416 = vmatprep.subr.bf16.mxu1 %v5897_v54  ;;  %v5920_v53 = vld [vmem:[#allocation11 + $0x170] sm:$0xff]  }
0x141f   : > { %v5921_v54 = vld [vmem:[#allocation11 + $0x1f0] sm:$0xff]  }
0x1421   : > { %5395 = vmatpush3.bf16.msra.mxu0 %v5898_v55  ;;  %5417 = vmatpush3.bf16.msra.mxu1 %v5899_v34  ;;  %v5922_v55 = vld [vmem:[#allocation11 + $0x130] sm:$0xff]  }
0x1422   : > { %5396 = vmatprep.subr.bf16.mxu0 %v5900_v56  ;;  %5418 = vmatprep.subr.bf16.mxu1 %v5901_v58  ;;  %v5923_v34 = vld [vmem:[#allocation11 + $0x1b0] sm:$0xff]   ;;  %v5924_v56 = vld [vmem:[#allocation11 + $0x168] sm:$0xff]  }
0x1423   : > { %v5925_v58 = vld [vmem:[#allocation11 + $0x1e8] sm:$0xff]  }
0x1425   : > { %5397 = vmatpush3.bf16.msra.mxu0 %v5902_v59  ;;  %5419 = vmatpush3.bf16.msra.mxu1 %v5903_v60  ;;  %v5926_v59 = vld [vmem:[#allocation11 + $0x128] sm:$0xff]  }
0x1426   : > { %5398 = vmatprep.subr.bf16.mxu0 %v5904_v62  ;;  %5420 = vmatprep.subr.bf16.mxu1 %v5905_v1  ;;  %v5927_v60 = vld [vmem:[#allocation11 + $0x1a8] sm:$0xff]   ;;  %v5928_v62 = vld [vmem:[#allocation11 + $0x160] sm:$0xff]  }
0x1427   : > { %v5929_v1 = vld [vmem:[#allocation11 + $0x1e0] sm:$0xff]  }
0x1429   : > { %5399 = vmatpush3.bf16.msra.mxu0 %v5906_v63  ;;  %5421 = vmatpush3.bf16.msra.mxu1 %v5907_v2  ;;  %v5930_v63 = vld [vmem:[#allocation11 + $0x120] sm:$0xff]  }
0x142a   : > { %5400 = vmatprep.subr.bf16.mxu0 %v5908_v3  ;;  %5422 = vmatprep.subr.bf16.mxu1 %v5909_v20  ;;  %v5931_v2 = vld [vmem:[#allocation11 + $0x1a0] sm:$0xff]   ;;  %v5932_v3 = vld [vmem:[#allocation11 + $0x158] sm:$0xff]  }
0x142b   : > { %v5933_v20 = vld [vmem:[#allocation11 + $0x1d8] sm:$0xff]  }
0x142d   : > { %5401 = vmatpush3.bf16.msra.mxu0 %v5910_v4  ;;  %5423 = vmatpush3.bf16.msra.mxu1 %v5911_v6  ;;  %v5934_v4 = vld [vmem:[#allocation11 + $0x118] sm:$0xff]  }
0x142e   : > { %5402 = vmatprep.subr.bf16.mxu0 %v5912_v8  ;;  %5424 = vmatprep.subr.bf16.mxu1 %v5913_v11  ;;  %v5935_v6 = vld [vmem:[#allocation11 + $0x198] sm:$0xff]   ;;  %v5936_v8 = vld [vmem:[#allocation11 + $0x150] sm:$0xff]  }
0x142f   : > { %v5937_v11 = vld [vmem:[#allocation11 + $0x1d0] sm:$0xff]  }
0x1431   : > { %5403 = vmatpush3.bf16.msra.mxu0 %v5914_v13  ;;  %5425 = vmatpush3.bf16.msra.mxu1 %v5915_v0  ;;  %v2375_v13 = vsub.s32 5, %v6614_v22  ;;  %v2383_v0 = vsub.s32 7, %v6614_v22 }
0x1432   : > { %5432 = vmatprep.subr.bf16.mxu0 %v5916_v14  ;;  %5454 = vmatprep.subr.bf16.mxu1 %v5917_v15  ;;  %v2371_v14 = vsub.s32 4, %v6614_v22  ;;  %v2379_v15 = vsub.s32 6, %v6614_v22 }
0x1474   : > { %v3107_v17 = vpop.f32.mrf.mxu0  ;;  %v3150_v19 = vpop.f32.mrf.mxu1 }
0x1475   : > { %v3108_v5 = vadd.f32 %v3107_v17, %v2356_v25  ;;  %v3151_v10 = vadd.f32 %v3150_v19, %v2364_v26  ;;  %v5938_v17 = vld [vmem:[#allocation11 + $0x110] sm:$0xff]  }
0x1476   : > { %v3109_v28 = vpop.f32.mrf.mxu0  ;;  %v3152_v29 = vpop.f32.mrf.mxu1  ;;  %v5939_v19 = vld [vmem:[#allocation11 + $0x190] sm:$0xff]  }
0x1477   : > { %v3110_v32 = vadd.f32 %v3109_v28, %v2360_v21  ;;  %v3153_v36 = vadd.f32 %v3152_v29, %v2368_v24  ;;  %v3417_v45 = vmax.f32 %v3108_v5, 0.0  ;;  %v3419_v46 = vmax.f32 %v3151_v10, 0.0 }
0x1478   : > { %v3111_v30 = vpop.f32.mrf.mxu0  ;;  %v3154_v31 = vpop.f32.mrf.mxu1  ;;  %v2376_v28 = vrot.slane %v6900_v16, %v2375_v13  ;;  %v2384_v29 = vrot.slane %v6900_v16, %v2383_v0 }
0x1479   : > { %v3112_v37 = vadd.f32 %v3111_v30, %v2356_v25  ;;  %v3155_v61 = vadd.f32 %v3154_v31, %v2364_v26  ;;  %v3418_v35 = vmax.f32 %v3110_v32, 0.0  ;;  %v3420_v43 = vmax.f32 %v3153_v36, 0.0  ;;  %v5940_v25 = vld [vmem:[#allocation11 + $0x148] sm:$0xff]  }
0x147a   : > { %v3113_v7 = vpop.f32.mrf.mxu0  ;;  %v3156_v12 = vpop.f32.mrf.mxu1  ;;  %v5941_v26 = vld [vmem:[#allocation11 + $0x1c8] sm:$0xff]   ;;  %v2372_v30 = vrot.slane %v6900_v16, %v2371_v14  ;;  %v2380_v31 = vrot.slane %v6900_v16, %v2379_v15 }
0x147b   : > { %v3114_v39 = vadd.f32 %v3113_v7, %v2360_v21  ;;  %v3157_v40 = vadd.f32 %v3156_v12, %v2368_v24  ;;  %v3433_v41 = vmax.f32 %v3112_v37, 0.0  ;;  %v3435_v42 = vmax.f32 %v3155_v61, 0.0  ;;  %v5942_v37 = vld [vmem:[#allocation11 + $0x108] sm:$0xff]   ;;  %v5944_v7 = vld [vmem:[#allocation11 + $0x140] sm:$0xff]  }
0x147c   : > { %v5943_v61 = vld [vmem:[#allocation11 + $0x188] sm:$0xff]   ;;  %v5945_v12 = vld [vmem:[#allocation11 + $0x1c0] sm:$0xff]  }
0x147d   : > { %v3434_v44 = vmax.f32 %v3114_v39, 0.0  ;;  %v3436_v38 = vmax.f32 %v3157_v40, 0.0  ;;  %v3449_v51 = vpack.c.bf16 %v3433_v41, %v3417_v45  ;;  %v3451_v52 = vpack.c.bf16 %v3435_v42, %v3419_v46  ;;  %v5946_v46 = vld [vmem:[#allocation11 + $0x100] sm:$0xff]  }
0x147f   : > { %v3450_v47 = vpack.c.bf16 %v3434_v44, %v3418_v35  ;;  %v3452_v48 = vpack.c.bf16 %v3436_v38, %v3420_v43 }
0x1481   : > { %4528 = vmatprep.mubr.bf16.mxu0 %v3450_v47  ;;  %4569 = vmatprep.mubr.bf16.mxu1 %v3452_v48  ;;  %v5947_v47 = vld [vmem:[#allocation11 + $0x180] sm:$0xff]  }
0x1482   : > { %4529 = vmatmul.mubr.bf16.vlgmr.msra.gmra.mxu0 %v3449_v51  ;;  %4570 = vmatmul.mubr.bf16.vlgmr.msra.gmra.mxu1 %v3451_v52  ;;  %v5949_v51 = vld [vmem:[#allocation11 + $0x2f8] sm:$0xff]  }
0x1483   : > { %5433 = vmatpush3.bf16.msra.mxu0 %v5918_v49  ;;  %5455 = vmatpush3.bf16.msra.mxu1 %v5919_v50  ;;  %v5948_v50 = vld [vmem:[#allocation11 + $0x278] sm:$0xff]  }
0x1484   : > { %5434 = vmatprep.subr.bf16.mxu0 %v5920_v53  ;;  %5456 = vmatprep.subr.bf16.mxu1 %v5921_v54 }
0x1487   : > { %5435 = vmatpush3.bf16.msra.mxu0 %v5922_v55  ;;  %5457 = vmatpush3.bf16.msra.mxu1 %v5923_v34 }
0x1488   : > { %5436 = vmatprep.subr.bf16.mxu0 %v5924_v56  ;;  %5458 = vmatprep.subr.bf16.mxu1 %v5925_v58 }
0x148b   : > { %5437 = vmatpush3.bf16.msra.mxu0 %v5926_v59  ;;  %5459 = vmatpush3.bf16.msra.mxu1 %v5927_v60  ;;  %v5950_v60 = vld [vmem:[#allocation11 + $0x238] sm:$0xff]  }
0x148c   : > { %5438 = vmatprep.subr.bf16.mxu0 %v5928_v62  ;;  %5460 = vmatprep.subr.bf16.mxu1 %v5929_v1  ;;  %v5951_v62 = vld [vmem:[#allocation11 + $0x2b8] sm:$0xff]  }
0x148f   : > { %5439 = vmatpush3.bf16.msra.mxu0 %v5930_v63  ;;  %5461 = vmatpush3.bf16.msra.mxu1 %v5931_v2  ;;  %v5952_v2 = vld [vmem:[#allocation11 + $0x270] sm:$0xff]  }
0x1490   : > { %5440 = vmatprep.subr.bf16.mxu0 %v5932_v3  ;;  %5462 = vmatprep.subr.bf16.mxu1 %v5933_v20  ;;  %v5953_v3 = vld [vmem:[#allocation11 + $0x2f0] sm:$0xff]  }
0x1491   : > { %v5954_v20 = vld [vmem:[#allocation11 + $0x230] sm:$0xff]  }
0x1493   : > { %5441 = vmatpush3.bf16.msra.mxu0 %v5934_v4  ;;  %5463 = vmatpush3.bf16.msra.mxu1 %v5935_v6  ;;  %v5955_v4 = vld [vmem:[#allocation11 + $0x2b0] sm:$0xff]   ;;  %v5956_v6 = vld [vmem:[#allocation11 + $0x268] sm:$0xff]  }
0x1494   : > { %v3193_v21 = vpop.f32.mrf.mxu0  ;;  %v3236_v24 = vpop.f32.mrf.mxu1  ;;  %5442 = vmatprep.subr.bf16.mxu0 %v5936_v8  ;;  %5464 = vmatprep.subr.bf16.mxu1 %v5937_v11  ;;  %v5957_v8 = vld [vmem:[#allocation11 + $0x2e8] sm:$0xff]  }
0x1495   : > { %v3194_v35 = vadd.f32 %v3193_v21, %v2372_v30  ;;  %v3237_v43 = vadd.f32 %v3236_v24, %v2380_v31  ;;  %v5958_v11 = vld [vmem:[#allocation11 + $0x228] sm:$0xff]   ;;  %v5961_v21 = vld [vmem:[#allocation11 + $0x2e0] sm:$0xff]  }
0x1496   : > { %v3195_v32 = vpop.f32.mrf.mxu0  ;;  %v3238_v36 = vpop.f32.mrf.mxu1  ;;  %v5962_v24 = vld [vmem:[#allocation11 + $0x220] sm:$0xff]  }
0x1497   : > { %5443 = vmatpush3.bf16.msra.mxu0 %v5938_v17  ;;  %5465 = vmatpush3.bf16.msra.mxu1 %v5939_v19  ;;  %v3196_v39 = vadd.f32 %v3195_v32, %v2376_v28  ;;  %v3239_v40 = vadd.f32 %v3238_v36, %v2384_v29  ;;  %v3421_v34 = vmax.f32 %v3194_v35, 0.0  ;;  %v3423_v56 = vmax.f32 %v3237_v43, 0.0  ;;  %v5959_v17 = vld [vmem:[#allocation11 + $0x2a8] sm:$0xff]   ;;  %v5960_v19 = vld [vmem:[#allocation11 + $0x260] sm:$0xff]   ;;  %v5969_v32 = vld [vmem:[#allocation11 + $0x2d0] sm:$0xff]  }
0x1498   : > { %v3197_v5 = vpop.f32.mrf.mxu0  ;;  %v3240_v10 = vpop.f32.mrf.mxu1  ;;  %5444 = vmatprep.subr.bf16.mxu0 %v5940_v25  ;;  %5466 = vmatprep.subr.bf16.mxu1 %v5941_v26  ;;  %v5963_v25 = vld [vmem:[#allocation11 + $0x2a0] sm:$0xff]   ;;  %v5964_v26 = vld [vmem:[#allocation11 + $0x258] sm:$0xff]  }
0x1499   : > { %v3198_v41 = vadd.f32 %v3197_v5, %v2372_v30  ;;  %v3241_v42 = vadd.f32 %v3240_v10, %v2380_v31  ;;  %v3422_v52 = vmax.f32 %v3196_v39, 0.0  ;;  %v3424_v53 = vmax.f32 %v3239_v40, 0.0  ;;  %v5967_v30 = vld [vmem:[#allocation11 + $0x298] sm:$0xff]   ;;  %v5968_v31 = vld [vmem:[#allocation11 + $0x250] sm:$0xff]  }
0x149a   : > { %v3199_v44 = vpop.f32.mrf.mxu0  ;;  %v3242_v16 = vpop.f32.mrf.mxu1  ;;  %v6927_v36 = vld [vmem:[#allocation10 + $0x8] sm:$0xff] }
0x149b   : > { %v3200_v38 = vadd.f32 %v3199_v44, %v2376_v28  ;;  %v3243_v45 = vadd.f32 %v3242_v16, %v2384_v29  ;;  %5445 = vmatpush3.bf16.msra.mxu0 %v5942_v37  ;;  %5467 = vmatpush3.bf16.msra.mxu1 %v5943_v61  ;;  %v3437_v48 = vmax.f32 %v3198_v41, 0.0  ;;  %v3439_v49 = vmax.f32 %v3241_v42, 0.0  ;;  %v5965_v28 = vld [vmem:[#allocation11 + $0x2d8] sm:$0xff]   ;;  %v5970_v37 = vld [vmem:[#allocation11 + $0x210] sm:$0xff]   ;;  %v5974_v44 = vld [vmem:[#allocation11 + $0x208] sm:$0xff]  }
0x149c   : > { %5446 = vmatprep.subr.bf16.mxu0 %v5944_v7  ;;  %5468 = vmatprep.subr.bf16.mxu1 %v5945_v12  ;;  %v5966_v29 = vld [vmem:[#allocation11 + $0x218] sm:$0xff]   ;;  %v5971_v61 = vld [vmem:[#allocation11 + $0x290] sm:$0xff]   ;;  %v5972_v7 = vld [vmem:[#allocation11 + $0x248] sm:$0xff]   ;;  %v2392_v39 = vrot.slane %v6927_v36, %v6617_v23  ;;  %v2400_v40 = vrot.slane %v6927_v36, %v2367_v18  ;;  %v2388_v41 = vrot.slane %v6927_v36, %v6625_v27 }
0x149d   : > { %v3438_v54 = vmax.f32 %v3200_v38, 0.0  ;;  %v3440_v55 = vmax.f32 %v3243_v45, 0.0  ;;  %v3453_v1 = vpack.c.bf16 %v3437_v48, %v3421_v34  ;;  %v3455_v63 = vpack.c.bf16 %v3439_v49, %v3423_v56  ;;  %v5973_v12 = vld [vmem:[#allocation11 + $0x2c8] sm:$0xff]   ;;  %v5976_v23 = vld [vmem:[#allocation11 + $0x240] sm:$0xff]  }
0x149e   : > { %v2396_v42 = vrot.slane %v6927_v36, %v6668_v9  ;;  %v5975_v16 = vld [vmem:[#allocation11 + $0x288] sm:$0xff]  }
0x149f   : > { %v3454_v58 = vpack.c.bf16 %v3438_v54, %v3422_v52  ;;  %v3456_v59 = vpack.c.bf16 %v3440_v55, %v3424_v53  ;;  %5447 = vmatpush3.bf16.msra.mxu0 %v5946_v46  ;;  %5469 = vmatpush3.bf16.msra.mxu1 %v5947_v47  ;;  %v5977_v46 = vld [vmem:[#allocation11 + $0x2c0] sm:$0xff]  }
0x14a0   : > { %5476 = vmatprep.subr.bf16.mxu0 %v5948_v50  ;;  %5498 = vmatprep.subr.bf16.mxu1 %v5949_v51  ;;  %v5978_v54 = vld [vmem:[#allocation11 + $0x200] sm:$0xff]  }
0x14a1   : > { %4610 = vmatprep.mubr.bf16.mxu0 %v3454_v58  ;;  %4651 = vmatprep.mubr.bf16.mxu1 %v3456_v59  ;;  %v5979_v55 = vld [vmem:[#allocation11 + $0x280] sm:$0xff]   ;;  %v5980_v58 = vld [vmem:[#allocation11 + $0x378] sm:$0xff]  }
0x14a2   : > { %4611 = vmatmul.mubr.bf16.vlgmr.msra.gmra.mxu0 %v3453_v1  ;;  %4652 = vmatmul.mubr.bf16.vlgmr.msra.gmra.mxu1 %v3455_v63  ;;  %v5981_v59 = vld [vmem:[#allocation11 + $0x3f8] sm:$0xff]  }
0x14a3   : > { %5477 = vmatpush3.bf16.msra.mxu0 %v5950_v60  ;;  %5499 = vmatpush3.bf16.msra.mxu1 %v5951_v62 }
0x14a4   : > { %5478 = vmatprep.subr.bf16.mxu0 %v5952_v2  ;;  %5500 = vmatprep.subr.bf16.mxu1 %v5953_v3 }
0x14a7   : > { %5479 = vmatpush3.bf16.msra.mxu0 %v5954_v20  ;;  %5501 = vmatpush3.bf16.msra.mxu1 %v5955_v4 }
0x14a8   : > { %5480 = vmatprep.subr.bf16.mxu0 %v5956_v6  ;;  %5502 = vmatprep.subr.bf16.mxu1 %v5957_v8  ;;  %v5982_v6 = vld [vmem:[#allocation11 + $0x338] sm:$0xff]  }
0x14a9   : > { %v5983_v8 = vld [vmem:[#allocation11 + $0x3b8] sm:$0xff]  }
0x14ab   : > { %5481 = vmatpush3.bf16.msra.mxu0 %v5958_v11  ;;  %5503 = vmatpush3.bf16.msra.mxu1 %v5959_v17 }
0x14ac   : > { %5482 = vmatprep.subr.bf16.mxu0 %v5960_v19  ;;  %5504 = vmatprep.subr.bf16.mxu1 %v5961_v21  ;;  %v5984_v19 = vld [vmem:[#allocation11 + $0x370] sm:$0xff]  }
0x14ad   : > { %v5985_v21 = vld [vmem:[#allocation11 + $0x3f0] sm:$0xff]  }
0x14af   : > { %5483 = vmatpush3.bf16.msra.mxu0 %v5962_v24  ;;  %5505 = vmatpush3.bf16.msra.mxu1 %v5963_v25  ;;  %v5986_v24 = vld [vmem:[#allocation11 + $0x330] sm:$0xff]  }
0x14b0   : > { %5484 = vmatprep.subr.bf16.mxu0 %v5964_v26  ;;  %5506 = vmatprep.subr.bf16.mxu1 %v5965_v28  ;;  %v5987_v25 = vld [vmem:[#allocation11 + $0x3b0] sm:$0xff]   ;;  %v5988_v26 = vld [vmem:[#allocation11 + $0x368] sm:$0xff]  }
0x14b1   : > { %v5989_v28 = vld [vmem:[#allocation11 + $0x3e8] sm:$0xff]  }
0x14b3   : > { %5485 = vmatpush3.bf16.msra.mxu0 %v5966_v29  ;;  %5507 = vmatpush3.bf16.msra.mxu1 %v5967_v30  ;;  %v5990_v29 = vld [vmem:[#allocation11 + $0x328] sm:$0xff]  }
0x14b4   : > { %v3279_v5 = vpop.f32.mrf.mxu0  ;;  %v3322_v10 = vpop.f32.mrf.mxu1  ;;  %5486 = vmatprep.subr.bf16.mxu0 %v5968_v31  ;;  %5508 = vmatprep.subr.bf16.mxu1 %v5969_v32  ;;  %v5991_v30 = vld [vmem:[#allocation11 + $0x3a8] sm:$0xff]   ;;  %v5992_v31 = vld [vmem:[#allocation11 + $0x360] sm:$0xff]  }
0x14b5   : > { %v3280_v27 = vadd.f32 %v3279_v5, %v2388_v41  ;;  %v3323_v50 = vadd.f32 %v3322_v10, %v2396_v42  ;;  %v5993_v32 = vld [vmem:[#allocation11 + $0x3e0] sm:$0xff]   ;;  %v5996_v5 = vld [vmem:[#allocation11 + $0x358] sm:$0xff]  }
0x14b6   : > { %v3281_v35 = vpop.f32.mrf.mxu0  ;;  %v3324_v43 = vpop.f32.mrf.mxu1  ;;  %v5997_v10 = vld [vmem:[#allocation11 + $0x3d8] sm:$0xff]  }
0x14b7   : > { %5487 = vmatpush3.bf16.msra.mxu0 %v5970_v37  ;;  %5509 = vmatpush3.bf16.msra.mxu1 %v5971_v61  ;;  %v3282_v47 = vadd.f32 %v3281_v35, %v2392_v39  ;;  %v3325_v18 = vadd.f32 %v3324_v43, %v2400_v40  ;;  %v3425_v2 = vmax.f32 %v3280_v27, 0.0  ;;  %v3427_v3 = vmax.f32 %v3323_v50, 0.0  ;;  %v5994_v37 = vld [vmem:[#allocation11 + $0x320] sm:$0xff]  }
0x14b8   : > { %v3283_v38 = vpop.f32.mrf.mxu0  ;;  %v3326_v45 = vpop.f32.mrf.mxu1  ;;  %5488 = vmatprep.subr.bf16.mxu0 %v5972_v7  ;;  %5510 = vmatprep.subr.bf16.mxu1 %v5973_v12  ;;  %v5995_v61 = vld [vmem:[#allocation11 + $0x3a0] sm:$0xff]   ;;  %v5998_v7 = vld [vmem:[#allocation11 + $0x318] sm:$0xff]  }
0x14b9   : > { %v3284_v48 = vadd.f32 %v3283_v38, %v2388_v41  ;;  %v3327_v49 = vadd.f32 %v3326_v45, %v2396_v42  ;;  %v3426_v60 = vmax.f32 %v3282_v47, 0.0  ;;  %v3428_v62 = vmax.f32 %v3325_v18, 0.0  ;;  %v5999_v12 = vld [vmem:[#allocation11 + $0x398] sm:$0xff]   ;;  %v6002_v41 = vld [vmem:[#allocation11 + $0x310] sm:$0xff]   ;;  %v6008_v50 = vld [vmem:[#allocation11 + $0x340] sm:$0xff]  }
0x14ba   : > { %v3285_v51 = vpop.f32.mrf.mxu0  ;;  %v3328_v9 = vpop.f32.mrf.mxu1  ;;  %v6003_v42 = vld [vmem:[#allocation11 + $0x390] sm:$0xff]   ;;  %v2408_v38 = vrot.slane %v6927_v36, %v2375_v13  ;;  %v2416_v45 = vrot.slane %v6927_v36, %v2383_v0  ;;  %v6009_v0 = vld [vmem:[#allocation11 + $0x3c0] sm:$0xff]  }
0x14bb   : > { %v3286_v52 = vadd.f32 %v3285_v51, %v2392_v39  ;;  %v3329_v53 = vadd.f32 %v3328_v9, %v2400_v40  ;;  %5489 = vmatpush3.bf16.msra.mxu0 %v5974_v44  ;;  %5511 = vmatpush3.bf16.msra.mxu1 %v5975_v16  ;;  %v3441_v34 = vmax.f32 %v3284_v48, 0.0  ;;  %v3443_v56 = vmax.f32 %v3327_v49, 0.0  ;;  %v6000_v39 = vld [vmem:[#allocation11 + $0x350] sm:$0xff]   ;;  %v6004_v44 = vld [vmem:[#allocation11 + $0x348] sm:$0xff]  }
0x14bc   : > { %5490 = vmatprep.subr.bf16.mxu0 %v5976_v23  ;;  %5512 = vmatprep.subr.bf16.mxu1 %v5977_v46  ;;  %v6001_v40 = vld [vmem:[#allocation11 + $0x3d0] sm:$0xff]   ;;  %v6005_v16 = vld [vmem:[#allocation11 + $0x3c8] sm:$0xff]   ;;  %v2404_v23 = vrot.slane %v6927_v36, %v2371_v14  ;;  %v2412_v46 = vrot.slane %v6927_v36, %v2379_v15 }
0x14bd   : > { %v3442_v1 = vmax.f32 %v3286_v52, 0.0  ;;  %v3444_v63 = vmax.f32 %v3329_v53, 0.0  ;;  %v3457_v11 = vpack.c.bf16 %v3441_v34, %v3425_v2  ;;  %v3459_v17 = vpack.c.bf16 %v3443_v56, %v3427_v3  ;;  %v6006_v48 = vld [vmem:[#allocation11 + $0x308] sm:$0xff]   ;;  %v6010_v34 = vld [vmem:[#allocation11 + $0x300] sm:$0xff]  }
0x14be   : > { %v6007_v49 = vld [vmem:[#allocation11 + $0x388] sm:$0xff]   ;;  %v6011_v56 = vld [vmem:[#allocation11 + $0x380] sm:$0xff]  }
0x14bf   : > { %v3458_v20 = vpack.c.bf16 %v3442_v1, %v3426_v60  ;;  %v3460_v4 = vpack.c.bf16 %v3444_v63, %v3428_v62  ;;  %5491 = vmatpush3.bf16.msra.mxu0 %v5978_v54  ;;  %5513 = vmatpush3.bf16.msra.mxu1 %v5979_v55 }
0x14c0   : > { %5520 = vmatprep.subr.bf16.mxu0 %v5980_v58  ;;  %5542 = vmatprep.subr.bf16.mxu1 %v5981_v59 }
0x14c1   : > { %4692 = vmatprep.mubr.bf16.mxu0 %v3458_v20  ;;  %4733 = vmatprep.mubr.bf16.mxu1 %v3460_v4 }
0x14c2   : > { %4693 = vmatmul.mubr.bf16.vlgmr.msra.gmra.mxu0 %v3457_v11  ;;  %4734 = vmatmul.mubr.bf16.vlgmr.msra.gmra.mxu1 %v3459_v17 }
0x14c3   : > { %5521 = vmatpush3.bf16.msra.mxu0 %v5982_v6  ;;  %5543 = vmatpush3.bf16.msra.mxu1 %v5983_v8 }
0x14c4   : > { %5522 = vmatprep.subr.bf16.mxu0 %v5984_v19  ;;  %5544 = vmatprep.subr.bf16.mxu1 %v5985_v21 }
0x14c7   : > { %5523 = vmatpush3.bf16.msra.mxu0 %v5986_v24  ;;  %5545 = vmatpush3.bf16.msra.mxu1 %v5987_v25 }
0x14c8   : > { %5524 = vmatprep.subr.bf16.mxu0 %v5988_v26  ;;  %5546 = vmatprep.subr.bf16.mxu1 %v5989_v28 }
0x14cb   : > { %5525 = vmatpush3.bf16.msra.mxu0 %v5990_v29  ;;  %5547 = vmatpush3.bf16.msra.mxu1 %v5991_v30 }
0x14cc   : > { %5526 = vmatprep.subr.bf16.mxu0 %v5992_v31  ;;  %5548 = vmatprep.subr.bf16.mxu1 %v5993_v32 }
0x14cf   : > { %5527 = vmatpush3.bf16.msra.mxu0 %v5994_v37  ;;  %5549 = vmatpush3.bf16.msra.mxu1 %v5995_v61 }
0x14d0   : > { %5528 = vmatprep.subr.bf16.mxu0 %v5996_v5  ;;  %5550 = vmatprep.subr.bf16.mxu1 %v5997_v10 }
0x14d3   : > { %5529 = vmatpush3.bf16.msra.mxu0 %v5998_v7  ;;  %5551 = vmatpush3.bf16.msra.mxu1 %v5999_v12  ;;  %v5195_v7 = vld [vmem:[%s7020_s8] ss:$0 sm:$0xff] }
0x14d4   : > { %v3365_v35 = vpop.f32.mrf.mxu0  ;;  %v3408_v43 = vpop.f32.mrf.mxu1  ;;  %5530 = vmatprep.subr.bf16.mxu0 %v6000_v39  ;;  %5552 = vmatprep.subr.bf16.mxu1 %v6001_v40 }
0x14d5   : > { %v3366_v53 = vadd.f32 %v3365_v35, %v2404_v23  ;;  %v3409_v22 = vadd.f32 %v3408_v43, %v2412_v46 }
0x14d6   : > { %v3367_v47 = vpop.f32.mrf.mxu0  ;;  %v3410_v18 = vpop.f32.mrf.mxu1 }
0x14d7   : > { %5531 = vmatpush3.bf16.msra.mxu0 %v6002_v41  ;;  %5553 = vmatpush3.bf16.msra.mxu1 %v6003_v42  ;;  %v3368_v51 = vadd.f32 %v3367_v47, %v2408_v38  ;;  %v3411_v9 = vadd.f32 %v3410_v18, %v2416_v45  ;;  %v3429_v2 = vmax.f32 %v3366_v53, 0.0  ;;  %v3431_v3 = vmax.f32 %v3409_v22, 0.0 }
0x14d8   : > { %v3369_v27 = vpop.f32.mrf.mxu0  ;;  %v3412_v13 = vpop.f32.mrf.mxu1  ;;  %5532 = vmatprep.subr.bf16.mxu0 %v6004_v44  ;;  %5554 = vmatprep.subr.bf16.mxu1 %v6005_v16 }
0x14d9   : > { %v3370_v52 = vadd.f32 %v3369_v27, %v2404_v23  ;;  %v3413_v14 = vadd.f32 %v3412_v13, %v2412_v46  ;;  %v3430_v60 = vmax.f32 %v3368_v51, 0.0  ;;  %v3432_v62 = vmax.f32 %v3411_v9, 0.0 }
0x14da   : > { %v3371_v54 = vpop.f32.mrf.mxu0  ;;  %v3414_v15 = vpop.f32.mrf.mxu1 }
0x14db   : > { %v3372_v36 = vadd.f32 %v3371_v54, %v2408_v38  ;;  %v3415_v55 = vadd.f32 %v3414_v15, %v2416_v45  ;;  %5533 = vmatpush3.bf16.msra.mxu0 %v6006_v48  ;;  %5555 = vmatpush3.bf16.msra.mxu1 %v6007_v49  ;;  %v3445_v58 = vmax.f32 %v3370_v52, 0.0  ;;  %v3447_v59 = vmax.f32 %v3413_v14, 0.0 }
0x14dc   : > { %5534 = vmatprep.subr.bf16.mxu0 %v6008_v50  ;;  %5556 = vmatprep.subr.bf16.mxu1 %v6009_v0 }
0x14dd   : > { %v3446_v1 = vmax.f32 %v3372_v36, 0.0  ;;  %v3448_v63 = vmax.f32 %v3415_v55, 0.0  ;;  %v3461_v6 = vpack.c.bf16 %v3445_v58, %v3429_v2  ;;  %v3463_v8 = vpack.c.bf16 %v3447_v59, %v3431_v3 }
0x14df   : > { %v3462_v20 = vpack.c.bf16 %v3446_v1, %v3430_v60  ;;  %v3464_v4 = vpack.c.bf16 %v3448_v63, %v3432_v62  ;;  %5535 = vmatpush3.bf16.msra.mxu0 %v6010_v34  ;;  %5557 = vmatpush3.bf16.msra.mxu1 %v6011_v56 }
0x14e1   : > { %4774 = vmatprep.mubr.bf16.mxu0 %v3462_v20  ;;  %4815 = vmatprep.mubr.bf16.mxu1 %v3464_v4 }
0x14e2   : > { %4775 = vmatmul.mubr.bf16.vlgmr.msra.gmra.mxu0 %v3461_v6  ;;  %4816 = vmatmul.mubr.bf16.vlgmr.msra.gmra.mxu1 %v3463_v8 }
0x1542   : > { %v5404_v11 = vpop.f32.mrf.mxu0  ;;  %v5426_v17 = vpop.f32.mrf.mxu1 }
0x1544   : > { %v5405_v19 = vpop.f32.mrf.mxu0  ;;  %v5427_v21 = vpop.f32.mrf.mxu1 }
0x1545   : > { %v5406_v10 = vadd.f32 %v5405_v19, %v5404_v11  ;;  %v5428_v43 = vadd.f32 %v5427_v21, %v5426_v17 }
0x1546   : > { %v5407_v24 = vpop.f32.mrf.mxu0  ;;  %v5429_v25 = vpop.f32.mrf.mxu1 }
0x1547   : > { %v4531_v41 = vadd.f32 %v5406_v10, %v5195_v7 }
0x1548   : > { %v5408_v26 = vpop.f32.mrf.mxu0  ;;  %v5430_v28 = vpop.f32.mrf.mxu1 }
0x1549   : > { %v5409_v42 = vadd.f32 %v5408_v26, %v5407_v24  ;;  %v4572_v38 = vadd.f32 %v5428_v43, %v4531_v41  ;;  %v5431_v46 = vadd.f32 %v5430_v28, %v5429_v25 }
0x154b   : > { %v4534_v45 = vadd.f32 %v5409_v42, %v5195_v7 }
0x154d   : > { %v4575_v49 = vadd.f32 %v5431_v46, %v4534_v45 }
0x1562   : > { %v5448_v29 = vpop.f32.mrf.mxu0  ;;  %v5470_v30 = vpop.f32.mrf.mxu1 }
0x1564   : > { %v5449_v31 = vpop.f32.mrf.mxu0  ;;  %v5471_v32 = vpop.f32.mrf.mxu1 }
0x1565   : > { %v5450_v44 = vadd.f32 %v5449_v31, %v5448_v29  ;;  %v5472_v27 = vadd.f32 %v5471_v32, %v5470_v30 }
0x1566   : > { %v5451_v37 = vpop.f32.mrf.mxu0  ;;  %v5473_v61 = vpop.f32.mrf.mxu1 }
0x1567   : > { %v4613_v47 = vadd.f32 %v5450_v44, %v4572_v38 }
0x1568   : > { %v5452_v5 = vpop.f32.mrf.mxu0  ;;  %v5474_v12 = vpop.f32.mrf.mxu1 }
0x1569   : > { %v5453_v18 = vadd.f32 %v5452_v5, %v5451_v37  ;;  %v4654_v0 = vadd.f32 %v5472_v27, %v4613_v47  ;;  %v5475_v52 = vadd.f32 %v5474_v12, %v5473_v61 }
0x156b   : > { %v4616_v51 = vadd.f32 %v5453_v18, %v4575_v49 }
0x156d   : > { %v4657_v15 = vadd.f32 %v5475_v52, %v4616_v51 }
0x1582   : > { %v5492_v39 = vpop.f32.mrf.mxu0  ;;  %v5514_v40 = vpop.f32.mrf.mxu1 }
0x1584   : > { %v5493_v35 = vpop.f32.mrf.mxu0  ;;  %v5515_v16 = vpop.f32.mrf.mxu1 }
0x1585   : > { %v5494_v13 = vadd.f32 %v5493_v35, %v5492_v39  ;;  %v5516_v36 = vadd.f32 %v5515_v16, %v5514_v40  ;;  %v6086_v40 = vld [vmem:[%s7021_s9] ss:$0 sm:$0xff] }
0x1586   : > { %v5495_v23 = vpop.f32.mrf.mxu0  ;;  %v5517_v48 = vpop.f32.mrf.mxu1  ;;  %v6087_v35 = vld [vmem:[%s7022_s10] ss:$0 sm:$0xff] }
0x1587   : > { %v4695_v14 = vadd.f32 %v5494_v13, %v4654_v0 }
0x1588   : > { %v5496_v50 = vpop.f32.mrf.mxu0  ;;  %v5518_v9 = vpop.f32.mrf.mxu1 }
0x1589   : > { %v5497_v53 = vadd.f32 %v5496_v50, %v5495_v23  ;;  %v4736_v56 = vadd.f32 %v5516_v36, %v4695_v14  ;;  %v5519_v1 = vadd.f32 %v5518_v9, %v5517_v48 }
0x158b   : > { %v4698_v58 = vadd.f32 %v5497_v53, %v4657_v15 }
0x158d   : > { %v4739_v4 = vadd.f32 %v5519_v1, %v4698_v58 }
0x15a2   : > { %v5536_v22 = vpop.f32.mrf.mxu0  ;;  %v5558_v54 = vpop.f32.mrf.mxu1 }
0x15a4   : > { %v5537_v55 = vpop.f32.mrf.mxu0  ;;  %v5559_v34 = vpop.f32.mrf.mxu1 }
0x15a5   : > { %v5538_v59 = vadd.f32 %v5537_v55, %v5536_v22  ;;  %v5560_v2 = vadd.f32 %v5559_v34, %v5558_v54 }
0x15a6   : > { %v5539_v60 = vpop.f32.mrf.mxu0  ;;  %v5561_v62 = vpop.f32.mrf.mxu1 }
0x15a7   : > { %v4777_v63 = vadd.f32 %v5538_v59, %v4736_v56 }
0x15a8   : > { %v5540_v3 = vpop.f32.mrf.mxu0  ;;  %v5562_v20 = vpop.f32.mrf.mxu1 }
0x15a9   : > { %v4818_v6 = vadd.f32 %v5560_v2, %v4777_v63  ;;  %v5541_v8 = vadd.f32 %v5540_v3, %v5539_v60  ;;  %v5563_v17 = vadd.f32 %v5562_v20, %v5561_v62 }
0x15ab   : > { %v4780_v11 = vadd.f32 %v5541_v8, %v4739_v4  ;;  %v4824_v19 = vadd.f32 %v4818_v6, %v6877_v33 }
0x15ad   : > { %v4821_v21 = vadd.f32 %v5563_v17, %v4780_v11  ;;  %4826 = vadd.xlane.f32.xlu1 %v4824_v19 }
0x15af   : > { %v4825_v24 = vadd.f32 %v4821_v21, %v6879_v57 }
0x15b1   : > { %4828 = vadd.xlane.f32.xlu0 %v4825_v24 }
0x1636   : > { %v4827_v25 = vpop.xlane.xlu1 %4826 }
0x1637   : > { %v4830_v26 = vmul.f32 0.0078125, %v4827_v25 }
0x1639   : > { %v4832_v28 = vsub.f32 %v4824_v19, %v4830_v26 }
0x163a   : > { %v4829_v29 = vpop.xlane.xlu0 %4828 }
0x163b   : > { %v4831_v30 = vmul.f32 0.0078125, %v4829_v29  ;;  %v4834_v31 = vmul.f32 %v4832_v28, %v4832_v28 }
0x163d   : > { %v4833_v32 = vsub.f32 %v4825_v24, %v4831_v30  ;;  %4836 = vadd.xlane.f32.xlu0 %v4834_v31 }
0x163f   : > { %v4835_v37 = vmul.f32 %v4833_v32, %v4833_v32 }
0x1641   : > { %4838 = vadd.xlane.f32.xlu0 %v4835_v37 }
0x16c6   : > { %v4837_v61 = vpop.xlane.xlu0 %4836 }
0x16c7   : > { %v4840_v5 = vmul.f32 0.0078125, %v4837_v61 }
0x16c9   : > { %v4842_v33 = vadd.f32 1e-05, %v4840_v5 }
0x16ca   : > { %v4839_v10 = vpop.xlane.xlu0 %4838 }
0x16cb   : > { %6080 = vrsqrt.f32 %v4842_v33  ;;  %v4841_v7 = vmul.f32 0.0078125, %v4839_v10 }
0x16cd   : > { %v4843_v57 = vadd.f32 1e-05, %v4841_v7 }
0x16cf   : > { %6082 = vrsqrt.f32 %v4843_v57 }
0x16d8   : > { %v6081_v12 = vpop.eup %6080 }
0x16d9   : > { %v4846_v39 = vmul.f32 %v6081_v12, %v4832_v28 }
0x16db   : > { %v4848_v41 = vmul.f32 %v6086_v40, %v4846_v39 }
0x16dc   : > { %v6083_v42 = vpop.eup %6082 }
0x16dd   : > { %v4850_v43 = vadd.f32 %v6087_v35, %v4848_v41  ;;  %v4847_v44 = vmul.f32 %v6083_v42, %v4833_v32 }
0x16df   : > { %v4849_v16 = vmul.f32 %v6086_v40, %v4847_v44  ;;  %4852 = vst [vmem:[%s475_s6] sm:$0xff] %v4850_v43 }
0x16e1   : > { %v4851_v38 = vadd.f32 %v6087_v35, %v4849_v16 }
0x16e3   : > { %4853 = vst [vmem:[%s475_s6 + $0x8] sm:$0xff] %v4851_v38 }
0x16e4   : > { %6259 = shalt.err (!%p6256_p6)
}
0x16e5   : > { %s6260_s28 = scalar_lea.hbm %s6967_s1, 256  ;;  %s6264_s14 = scalar_lea.hbm %s7023_s11, 512 }
0x16e6   : > { %p6261_p9 = scmp.ne.s32.totalorder %s6967_s1, %s6260_s28  ;;  %p6265_p4 = scmp.lt.s32.totalorder %s6967_s1, %s7023_s11 }
0x16e7   : > { %p6266_p7 = scmp.lt.s32.totalorder %s6264_s14, %s6260_s28 }
0x16e8   : > { %p6262_p10 = pnand %p6261_p9, %p7055_p2 }
0x16e9   : > { %p6267_p13 = por %p6266_p7, %p6265_p4 }
0x16ea   : > { %p6263_p11 = pneg %p6262_p10 }
0x16ec   : > { %p6268_p0 = pnand %p6267_p13, %p6263_p11 }
0x16ee   : > { %6271 = shalt.err (!%p6268_p0)
}
0x16ef   : > { %s6348_s21 = smov 128   ;;  %s6349_s25 = smov 8  }
0x16f0   : > { %5750 = dma.vmem_to_hbm [thread:$0]  (%p7055_p2), %s6969_s27, 256, %s6967_s1, %s4855_s3, %s6348_s21, %s6348_s21, %s6349_s25  }
0x16f1 PF: > { %s4883_s5 = sand.u32 1, %s6310_s17   ;;  %p7056_p5 = scmp.ne.s32.totalorder %s7045_s29, 0 }
0x16f2   : > { %p7057_p8 = scmp.ge.s32.totalorder %s6322_s20, 2  ;;  %s4884_s23 = scalar_lea.sflag [#allocation4], %s4883_s5 }
0x16f4   : > { %p5773_p12 = pnand %p7057_p8, %p7056_p5 }
0x16f6   : > { %p5774_p3 = pneg %p5773_p12 }
0x16f8   : > { %6305 = dma.done.wait (%p5774_p3), %s4884_s23, 256  }
0x16f9   : > { %6307 = vsyncadd (%p5774_p3), %s4884_s23, 4294967040  ;;  %p27_p1 = scmp.ge.s32.totalorder %s6509_s30, 4   ;;  %s7058_s17 = smov %s6314_s18 }
0x16fa   : > { %s7059_s18 = smov %s6318_s19  ;;  %s7060_s19 = smov %s6520_s12 }
0x16fb   : > { %s7061_s20 = smov %s6509_s30  ;;  %29 = sbr.rel (!%p27_p1) target bundleno = 14 (0xe), region = 136 }
0x1700   :  { %4889 = vsyncpa [#allocation3], 1 }
0x1701   :  { %4891 = vsyncpa [#allocation3 + $0x1], 1 }
0x1702   :  { %4892 = vsyncpa [#allocation6], 1 }
0x1703   :  { %4893 = vsyncpa [#allocation9], 1 }
0x1704   :  { %4894 = vsyncpa [#allocation12], 1 }
0x1705   :  { %4895 = vsyncpa [#allocation4], 1 }
0x1706   :  { %4897 = vsyncpa [#allocation4 + $0x1], 1 }

</bundles_post_ra>
